<compile_context>
chip_gen: v7x
topology: tpu7x:2x2x1
jax: 0.10.0
libtpu: 0.0.40
codegen_flags: <defaults>
</compile_context>

<pallas_src>
import functools

import jax
import jax.numpy as jnp
from jax import lax
from jax.experimental import pallas as pl
from jax.experimental.pallas import tpu as pltpu

LANE = 128
ROW = 16      # bf16 packs 2 rows per sublane -> keep batch tiles multiples of 16


def _round_up(n, m):
    return ((n + m - 1) // m) * m


def _lstm_kernel(x_ref,      # (Tt, Bt, Din_pad)  bf16
                 wih0_ref,   # (Din_pad, 4H)      bf16
                 whh0_ref,   # (H, 4H)            bf16
                 b0_ref,     # (1, 4H)            f32   (b_ih_l0 + b_hh_l0)
                 wih1_ref,   # (H, 4H)            bf16
                 whh1_ref,   # (H, 4H)            bf16
                 b1_ref,     # (1, 4H)            f32   (b_ih_l1 + b_hh_l1)
                 wfc_ref,    # (H, C_pad)         f32
                 bfc_ref,    # (1, C_pad)         f32
                 out_ref,    # (Bt, C_pad)        f32
                 xproj_ref,  # (Tt*Bt, 4H)        f32 scratch
                 h0_s, c0_s, h1_s, c1_s,          # (Bt, H) f32 scratch
                 *, seq_len, unroll):
    Bt, H = h0_s.shape
    Tt = x_ref.shape[0]
    t_idx = pl.program_id(1)
    n_t = pl.num_programs(1)

    @pl.when(t_idx == 0)
    def _init():
        h0_s[...] = jnp.zeros_like(h0_s)
        c0_s[...] = jnp.zeros_like(c0_s)
        h1_s[...] = jnp.zeros_like(h1_s)
        c1_s[...] = jnp.zeros_like(c1_s)

    # Layer-0 input projection for the whole time block: one MXU-dense matmul
    # (M = Tt*Bt instead of M = Bt per step), layer-0 bias folded in via a
    # sublane broadcast.  Stored to VMEM scratch, sliced per step.
    x_flat = x_ref[...].reshape(Tt * Bt, x_ref.shape[2])
    xproj_ref[...] = (
        jnp.dot(x_flat, wih0_ref[...], preferred_element_type=jnp.float32)
        + b0_ref[...])

    # Loop-invariant weights, hoisted once per grid step.
    # TODO(synk): hold whh0 / wih1 / whh1 MXU-stationary across the time loop
    # (pltpu.matmul_push_rhs, one weight set per MXU on v6e/v7x) instead of
    # re-streaming the (128, 512) RHS every step.
    whh0 = whh0_ref[...]
    wih1 = wih1_ref[...]
    whh1 = whh1_ref[...]
    b1 = b1_ref[...]            # (1, 4H): the add broadcasts along sublanes

    def gates_to_state(g, c_prev):
        i = jax.nn.sigmoid(g[:, 0 * H:1 * H])
        f = jax.nn.sigmoid(g[:, 1 * H:2 * H])
        gg = jnp.tanh(g[:, 2 * H:3 * H])
        o = jax.nn.sigmoid(g[:, 3 * H:4 * H])
        c_new = f * c_prev + i * gg
        h_new = o * jnp.tanh(c_new)
        return h_new, c_new

    def step(t_local, carry):
        h0, c0, h1, c1 = carry
        off = pl.multiple_of(t_local * Bt, Bt)
        g0 = xproj_ref[pl.ds(off, Bt), :] + jnp.dot(
            h0.astype(jnp.bfloat16), whh0, preferred_element_type=jnp.float32)
        # Layer-1 recurrent matmul is independent of layer-0's output, so the
        # scheduler can overlap it with layer-0 sigmoid/tanh (EUP) work.
        g1_rec = jnp.dot(h1.astype(jnp.bfloat16), whh1,
                         preferred_element_type=jnp.float32)
        h0n, c0n = gates_to_state(g0, c0)
        g1 = (g1_rec
              + jnp.dot(h0n.astype(jnp.bfloat16), wih1,
                        preferred_element_type=jnp.float32)
              + b1)
        h1n, c1n = gates_to_state(g1, c1)
        return h0n, c0n, h1n, c1n

    carry0 = (h0_s[...], c0_s[...], h1_s[...], c1_s[...])

    def run_plain(c):
        return lax.fori_loop(0, Tt, step, c, unroll=unroll)

    if seq_len % Tt == 0:
        h0n, c0n, h1n, c1n = run_plain(carry0)
    else:
        # Only the last time block is partial: pay the per-step validity
        # selects there and keep the select-free fast path everywhere else.
        def masked_step(t_local, carry):
            new = step(t_local, carry)
            valid = (t_idx * Tt + t_local) < seq_len
            return tuple(jnp.where(valid, n, o) for n, o in zip(new, carry))

        def run_masked(c):
            return lax.fori_loop(0, Tt, masked_step, c, unroll=unroll)

        h0n, c0n, h1n, c1n = lax.cond(t_idx == n_t - 1,
                                      run_masked, run_plain, carry0)

    # Persist state across time-grid blocks.
    h0_s[...] = h0n
    c0_s[...] = c0n
    h1_s[...] = h1n
    c1_s[...] = c1n

    @pl.when(t_idx == n_t - 1)
    def _finalize():
        logits = jnp.dot(h1n, wfc_ref[...],
                         preferred_element_type=jnp.float32) + bfc_ref[...]
        out_ref[...] = jax.nn.sigmoid(logits)


@functools.partial(jax.jit, static_argnames=("hidden_size", "num_classes",
                                             "time_block", "batch_block"))
def lstm_detector_forward(x, packed_params, *, hidden_size=128, num_classes=20,
                          time_block=None, batch_block=None):
    """x: (B, input_size, seq_len) -- same convention as the PyTorch module."""
    B, Din, T = x.shape
    H = hidden_size
    wih0, whh0, b0, wih1, whh1, b1, wfc, bfc = packed_params
    Din_pad = wih0.shape[0]
    C_pad = wfc.shape[1]
    FOUR_H = 4 * H

    # Batch tiling: multiples of 16 (bf16 sublane packing), capped at 32 rows
    # (vreg pressure from the h/c loop carries); split into >= 2 tiles when
    # the padded batch allows so the 'parallel' axis feeds a 2nd TC on v7x.
    B_req = _round_up(max(B, ROW), ROW)
    if batch_block is not None:
        Bt = _round_up(batch_block, ROW)
    elif B_req <= ROW:
        Bt = ROW
    else:
        Bt = min(_round_up((B_req + 1) // 2, ROW), 32)
    B_pad = _round_up(B_req, Bt)
    n_b = B_pad // Bt

    # Time: streamed over an 'arbitrary' grid axis.  Larger Tt amortizes the
    # ~0.35us/step grid overhead and makes the xproj matmul denser; the
    # in-kernel fori_loop unroll is capped at 8.
    Tt = time_block or min(T, 64)
    T_pad = _round_up(T, Tt)
    n_t = T_pad // Tt
    unroll = min(Tt, 8)

    # permute(0,2,1) of the PyTorch module, then time-major for the kernel.
    # TODO(synk): fold this transpose/cast/pad into the kernel's per-block DMA
    # (native-layout BlockSpec + in-kernel XLU transpose, or allow_input_fusion)
    # to save one HBM round trip of x.
    x_tm = jnp.transpose(x, (2, 0, 1)).astype(jnp.bfloat16)
    x_tm = jnp.pad(x_tm, ((0, T_pad - T), (0, B_pad - B), (0, Din_pad - Din)))

    kernel = functools.partial(_lstm_kernel, seq_len=T, unroll=unroll)

    weight_bytes = sum(int(a.size) * a.dtype.itemsize
                       for a in (wih0, whh0, b0, wih1, whh1, b1, wfc, bfc))
    x_blk_bytes = Tt * Bt * Din_pad * 2
    xproj_bytes = Tt * Bt * FOUR_H * 4
    state_bytes = 4 * Bt * H * 4
    out_blk_bytes = Bt * C_pad * 4
    vmem_need = (2 * x_blk_bytes + 2 * weight_bytes + 2 * out_blk_bytes
                 + xproj_bytes + state_bytes)
    vmem_limit = int(min(max(vmem_need + (4 << 20), 16 << 20), 32 << 20))

    flops = (2 * T_pad * B_pad * Din_pad * FOUR_H          # xproj matmul
             + 2 * T * B_pad * 3 * H * FOUR_H              # recurrent dots
             + 2 * B_pad * H * C_pad)                      # fc
    transcendentals = 10 * T * B_pad * H + B_pad * C_pad
    bytes_accessed = int(x_tm.size) * 2 + weight_bytes + B_pad * C_pad * 4

    out = pl.pallas_call(
        kernel,
        out_shape=jax.ShapeDtypeStruct((B_pad, C_pad), jnp.float32),
        grid=(n_b, n_t),
        in_specs=[
            pl.BlockSpec((Tt, Bt, Din_pad), lambda b, t: (t, b, 0)),
            pl.BlockSpec((Din_pad, FOUR_H), lambda b, t: (0, 0)),
            pl.BlockSpec((H, FOUR_H), lambda b, t: (0, 0)),
            pl.BlockSpec((1, FOUR_H), lambda b, t: (0, 0)),
            pl.BlockSpec((H, FOUR_H), lambda b, t: (0, 0)),
            pl.BlockSpec((H, FOUR_H), lambda b, t: (0, 0)),
            pl.BlockSpec((1, FOUR_H), lambda b, t: (0, 0)),
            pl.BlockSpec((H, C_pad), lambda b, t: (0, 0)),
            pl.BlockSpec((1, C_pad), lambda b, t: (0, 0)),
        ],
        out_specs=pl.BlockSpec((Bt, C_pad), lambda b, t: (b, 0)),
        scratch_shapes=[pltpu.VMEM((Tt * Bt, FOUR_H), jnp.float32)]
                       + [pltpu.VMEM((Bt, H), jnp.float32) for _ in range(4)],
        compiler_params=pltpu.CompilerParams(
            dimension_semantics=("parallel", "arbitrary"),
            vmem_limit_bytes=vmem_limit),
        cost_estimate=pl.CostEstimate(flops=flops,
                                      transcendentals=transcendentals,
                                      bytes_accessed=bytes_accessed),
    )(x_tm, wih0, whh0, b0, wih1, whh1, b1, wfc, bfc)

    return out[:B, :num_classes]


def init_raw_params(key, input_size=64, hidden_size=128, num_classes=20):
    """PyTorch-layout parameters with U(-1/sqrt(H), 1/sqrt(H)) init."""
    H = hidden_size
    bound = 1.0 / jnp.sqrt(jnp.float32(H))
    ks = jax.random.split(key, 10)

    def u(k, shape):
        return jax.random.uniform(k, shape, jnp.float32, -bound, bound)

    return (
        u(ks[0], (4 * H, input_size)),   # w_ih_l0
        u(ks[1], (4 * H, H)),            # w_hh_l0
        u(ks[2], (4 * H,)),              # b_ih_l0
        u(ks[3], (4 * H,)),              # b_hh_l0
        u(ks[4], (4 * H, H)),            # w_ih_l1
        u(ks[5], (4 * H, H)),            # w_hh_l1
        u(ks[6], (4 * H,)),              # b_ih_l1
        u(ks[7], (4 * H,)),              # b_hh_l1
        u(ks[8], (num_classes, H)),      # w_fc
        u(ks[9], (num_classes,)),        # b_fc
    )


def pack_params(raw, input_size=64, hidden_size=128, num_classes=20):
    """Pre-transpose / pad / cast the PyTorch weights for the kernel."""
    (w_ih_l0, w_hh_l0, b_ih_l0, b_hh_l0,
     w_ih_l1, w_hh_l1, b_ih_l1, b_hh_l1, w_fc, b_fc) = raw
    H = hidden_size
    Din_pad = _round_up(input_size, LANE)
    C_pad = _round_up(num_classes, LANE)

    wih0 = jnp.pad(w_ih_l0.T, ((0, Din_pad - input_size), (0, 0))
                   ).astype(jnp.bfloat16)                       # (Din_pad, 4H)
    whh0 = w_hh_l0.T.astype(jnp.bfloat16)                       # (H, 4H)
    b0 = (b_ih_l0 + b_hh_l0).reshape(1, 4 * H).astype(jnp.float32)
    wih1 = w_ih_l1.T.astype(jnp.bfloat16)
    whh1 = w_hh_l1.T.astype(jnp.bfloat16)
    b1 = (b_ih_l1 + b_hh_l1).reshape(1, 4 * H).astype(jnp.float32)
    wfc = jnp.pad(w_fc.T, ((0, 0), (0, C_pad - num_classes))).astype(jnp.float32)
    bfc = jnp.pad(b_fc.reshape(1, -1),
                  ((0, 0), (0, C_pad - num_classes))).astype(jnp.float32)
    return (wih0, whh0, b0, wih1, whh1, b1, wfc, bfc)


def reference_forward(x, raw, hidden_size=128):
    """Pure-JAX f32 reference of the PyTorch forward."""
    (w_ih_l0, w_hh_l0, b_ih_l0, b_hh_l0,
     w_ih_l1, w_hh_l1, b_ih_l1, b_hh_l1, w_fc, b_fc) = raw
    H = hidden_size
    xb = jnp.transpose(x, (0, 2, 1)).astype(jnp.float32)   # (B, T, Din)
    B, T, _ = xb.shape

    def cell(x_t, h, c, wih, whh, bi, bh):
        g = x_t @ wih.T + h @ whh.T + bi + bh
        i = jax.nn.sigmoid(g[:, :H])
        f = jax.nn.sigmoid(g[:, H:2 * H])
        gg = jnp.tanh(g[:, 2 * H:3 * H])
        o = jax.nn.sigmoid(g[:, 3 * H:])
        c = f * c + i * gg
        h = o * jnp.tanh(c)
        return h, c

    h0 = c0 = h1 = c1 = jnp.zeros((B, H), jnp.float32)
    for t in range(T):
        h0, c0 = cell(xb[:, t], h0, c0, w_ih_l0, w_hh_l0, b_ih_l0, b_hh_l0)
        h1, c1 = cell(h0, h1, c1, w_ih_l1, w_hh_l1, b_ih_l1, b_hh_l1)
    return jax.nn.sigmoid(h1 @ w_fc.T + b_fc)


if __name__ == "__main__":
    INPUT_SIZE, HIDDEN, NUM_CLASSES = 64, 128, 20

    key = jax.random.PRNGKey(0)
    k_x, k_p, k_x2 = jax.random.split(key, 3)
    raw = init_raw_params(k_p, INPUT_SIZE, HIDDEN, NUM_CLASSES)
    packed = pack_params(raw, INPUT_SIZE, HIDDEN, NUM_CLASSES)

    # Case 1: small shapes matching the module (single grid step, no tail).
    B, T = 2, 8
    x = jax.random.normal(k_x, (B, INPUT_SIZE, T), jnp.float32)
    out = jax.block_until_ready(
        lstm_detector_forward(x, packed, hidden_size=HIDDEN,
                              num_classes=NUM_CLASSES))
    ref = reference_forward(x, raw, hidden_size=HIDDEN)
    assert out.shape == (B, NUM_CLASSES)
    err = float(jnp.max(jnp.abs(out - ref)))
    assert err < 5e-2, f"mismatch vs reference (max abs err {err})"

    # Case 2: exercises the time grid (3 time blocks, masked tail block only)
    # and batch padding.
    B2, T2 = 5, 40
    x2 = jax.random.normal(k_x2, (B2, INPUT_SIZE, T2), jnp.float32)
    out2 = jax.block_until_ready(
        lstm_detector_forward(x2, packed, hidden_size=HIDDEN,
                              num_classes=NUM_CLASSES, time_block=16))
    ref2 = reference_forward(x2, raw, hidden_size=HIDDEN)
    assert out2.shape == (B2, NUM_CLASSES)
    err2 = float(jnp.max(jnp.abs(out2 - ref2)))
    assert err2 < 5e-2, f"mismatch vs reference on gridded case (max abs err {err2})"

    print("KERNEL_OK")
</pallas_src>

<mosaic_0001>
module attributes {stable_mosaic.version = 11 : i64} {
  func.func @_lstm_kernel(%arg0: i32, %arg1: i32, %arg2: memref<8x16x128xbf16, #tpu.memory_space<vmem>>, %arg3: memref<128x512xbf16, #tpu.memory_space<vmem>>, %arg4: memref<128x512xbf16, #tpu.memory_space<vmem>>, %arg5: memref<1x512xf32, #tpu.memory_space<vmem>>, %arg6: memref<128x512xbf16, #tpu.memory_space<vmem>>, %arg7: memref<128x512xbf16, #tpu.memory_space<vmem>>, %arg8: memref<1x512xf32, #tpu.memory_space<vmem>>, %arg9: memref<128x128xf32, #tpu.memory_space<vmem>>, %arg10: memref<1x128xf32, #tpu.memory_space<vmem>>, %arg11: memref<16x128xf32, #tpu.memory_space<vmem>>, %arg12: memref<128x512xf32, #tpu.memory_space<vmem>>, %arg13: memref<16x128xf32, #tpu.memory_space<vmem>>, %arg14: memref<16x128xf32, #tpu.memory_space<vmem>>, %arg15: memref<16x128xf32, #tpu.memory_space<vmem>>, %arg16: memref<16x128xf32, #tpu.memory_space<vmem>>) attributes {dimension_semantics = [#tpu.dimension_semantics<parallel>, #tpu.dimension_semantics<arbitrary>], iteration_bounds = array<i64: 1, 1>, scalar_prefetch = 0 : i64, scratch_operands = 5 : i64, tpu.core_type = #tpu.core_type<tc>, window_params = [{transform_indices = @transform_0, window_bounds = array<i64: 8, 16, 128>}, {pipeline_mode = #tpu.pipeline_mode<synchronous>, transform_indices = @transform_1, window_bounds = array<i64: 128, 512>}, {pipeline_mode = #tpu.pipeline_mode<synchronous>, transform_indices = @transform_2, window_bounds = array<i64: 128, 512>}, {pipeline_mode = #tpu.pipeline_mode<synchronous>, transform_indices = @transform_3, window_bounds = array<i64: 1, 512>}, {pipeline_mode = #tpu.pipeline_mode<synchronous>, transform_indices = @transform_4, window_bounds = array<i64: 128, 512>}, {pipeline_mode = #tpu.pipeline_mode<synchronous>, transform_indices = @transform_5, window_bounds = array<i64: 128, 512>}, {pipeline_mode = #tpu.pipeline_mode<synchronous>, transform_indices = @transform_6, window_bounds = array<i64: 1, 512>}, {pipeline_mode = #tpu.pipeline_mode<synchronous>, transform_indices = @transform_7, window_bounds = array<i64: 128, 128>}, {pipeline_mode = #tpu.pipeline_mode<synchronous>, transform_indices = @transform_8, window_bounds = array<i64: 1, 128>}, {transform_indices = @transform_9, window_bounds = array<i64: 16, 128>}]} {
    %c0_i32 = arith.constant 0 : i32
    %0 = arith.cmpi eq, %arg1, %c0_i32 : i32
    %1 = arith.extui %0 : i1 to i32
    %c0_i32_0 = arith.constant 0 : i32
    %2 = arith.cmpi ne, %1, %c0_i32_0 : i32
    scf.if %2 {
      %cst_123 = arith.constant 0.000000e+00 : f32
      %538 = vector.broadcast %cst_123 : f32 to vector<16x128xf32>
      %c0_124 = arith.constant 0 : index
      %c0_125 = arith.constant 0 : index
      %539 = vector.load %arg13[%c0_124, %c0_125] : memref<16x128xf32, #tpu.memory_space<vmem>>, vector<16x128xf32>
      tpu.vector_store %arg13[%c0_124, %c0_125], %538 {strides = array<i32>} : memref<16x128xf32, #tpu.memory_space<vmem>>, vector<16x128xf32>,
      %cst_126 = arith.constant 0.000000e+00 : f32
      %540 = vector.broadcast %cst_126 : f32 to vector<16x128xf32>
      %c0_127 = arith.constant 0 : index
      %c0_128 = arith.constant 0 : index
      %541 = vector.load %arg14[%c0_127, %c0_128] : memref<16x128xf32, #tpu.memory_space<vmem>>, vector<16x128xf32>
      tpu.vector_store %arg14[%c0_127, %c0_128], %540 {strides = array<i32>} : memref<16x128xf32, #tpu.memory_space<vmem>>, vector<16x128xf32>,
      %cst_129 = arith.constant 0.000000e+00 : f32
      %542 = vector.broadcast %cst_129 : f32 to vector<16x128xf32>
      %c0_130 = arith.constant 0 : index
      %c0_131 = arith.constant 0 : index
      %543 = vector.load %arg15[%c0_130, %c0_131] : memref<16x128xf32, #tpu.memory_space<vmem>>, vector<16x128xf32>
      tpu.vector_store %arg15[%c0_130, %c0_131], %542 {strides = array<i32>} : memref<16x128xf32, #tpu.memory_space<vmem>>, vector<16x128xf32>,
      %cst_132 = arith.constant 0.000000e+00 : f32
      %544 = vector.broadcast %cst_132 : f32 to vector<16x128xf32>
      %c0_133 = arith.constant 0 : index
      %c0_134 = arith.constant 0 : index
      %545 = vector.load %arg16[%c0_133, %c0_134] : memref<16x128xf32, #tpu.memory_space<vmem>>, vector<16x128xf32>
      tpu.vector_store %arg16[%c0_133, %c0_134], %544 {strides = array<i32>} : memref<16x128xf32, #tpu.memory_space<vmem>>, vector<16x128xf32>,
    } else {
    }
    %c0 = arith.constant 0 : index
    %c0_1 = arith.constant 0 : index
    %c0_2 = arith.constant 0 : index
    %3 = vector.load %arg2[%c0, %c0_1, %c0_2] : memref<8x16x128xbf16, #tpu.memory_space<vmem>>, vector<8x16x128xbf16>
    %4 = vector.shape_cast %3 : vector<8x16x128xbf16> to vector<128x128xbf16>
    %c0_3 = arith.constant 0 : index
    %c0_4 = arith.constant 0 : index
    %5 = vector.load %arg3[%c0_3, %c0_4] : memref<128x512xbf16, #tpu.memory_space<vmem>>, vector<128x512xbf16>
    %cst = arith.constant dense<0.000000e+00> : vector<128x512xf32>
    %6 = tpu.matmul %4, %5, %cst {dimension_numbers = #tpu.dot_dimension_numbers<[1], [0], [0], [1], [0, 0, 1, 1], [], []>} : vector<128x128xbf16>, vector<128x512xbf16>, vector<128x512xf32> -> vector<128x512xf32>
    %c0_5 = arith.constant 0 : index
    %c0_6 = arith.constant 0 : index
    %7 = vector.load %arg5[%c0_5, %c0_6] : memref<1x512xf32, #tpu.memory_space<vmem>>, vector<1x512xf32>
    %8 = vector.broadcast %7 : vector<1x512xf32> to vector<128x512xf32>
    %9 = arith.addf %6, %8 : vector<128x512xf32>
    %c0_7 = arith.constant 0 : index
    %c0_8 = arith.constant 0 : index
    %10 = vector.load %arg12[%c0_7, %c0_8] : memref<128x512xf32, #tpu.memory_space<vmem>>, vector<128x512xf32>
    tpu.vector_store %arg12[%c0_7, %c0_8], %9 {strides = array<i32>} : memref<128x512xf32, #tpu.memory_space<vmem>>, vector<128x512xf32>,
    %c0_9 = arith.constant 0 : index
    %c0_10 = arith.constant 0 : index
    %11 = vector.load %arg4[%c0_9, %c0_10] : memref<128x512xbf16, #tpu.memory_space<vmem>>, vector<128x512xbf16>
    %c0_11 = arith.constant 0 : index
    %c0_12 = arith.constant 0 : index
    %12 = vector.load %arg6[%c0_11, %c0_12] : memref<128x512xbf16, #tpu.memory_space<vmem>>, vector<128x512xbf16>
    %c0_13 = arith.constant 0 : index
    %c0_14 = arith.constant 0 : index
    %13 = vector.load %arg7[%c0_13, %c0_14] : memref<128x512xbf16, #tpu.memory_space<vmem>>, vector<128x512xbf16>
    %c0_15 = arith.constant 0 : index
    %c0_16 = arith.constant 0 : index
    %14 = vector.load %arg8[%c0_15, %c0_16] : memref<1x512xf32, #tpu.memory_space<vmem>>, vector<1x512xf32>
    %c0_17 = arith.constant 0 : index
    %c0_18 = arith.constant 0 : index
    %15 = vector.load %arg13[%c0_17, %c0_18] : memref<16x128xf32, #tpu.memory_space<vmem>>, vector<16x128xf32>
    %c0_19 = arith.constant 0 : index
    %c0_20 = arith.constant 0 : index
    %16 = vector.load %arg14[%c0_19, %c0_20] : memref<16x128xf32, #tpu.memory_space<vmem>>, vector<16x128xf32>
    %c0_21 = arith.constant 0 : index
    %c0_22 = arith.constant 0 : index
    %17 = vector.load %arg15[%c0_21, %c0_22] : memref<16x128xf32, #tpu.memory_space<vmem>>, vector<16x128xf32>
    %c0_23 = arith.constant 0 : index
    %c0_24 = arith.constant 0 : index
    %18 = vector.load %arg16[%c0_23, %c0_24] : memref<16x128xf32, #tpu.memory_space<vmem>>, vector<16x128xf32>
    %c0_i32_25 = arith.constant 0 : i32
    %c16_i32 = arith.constant 16 : i32
    %19 = arith.muli %c0_i32_25, %c16_i32 : i32
    %20 = tpu.assume_multiple %19, 16 : i32
    %21 = arith.index_cast %20 : i32 to index
    %c0_26 = arith.constant 0 : index
    %22 = vector.load %arg12[%21, %c0_26] : memref<128x512xf32, #tpu.memory_space<vmem>>, vector<16x512xf32>
    %23 = arith.truncf %15 : vector<16x128xf32> to vector<16x128xbf16>
    %cst_27 = arith.constant dense<0.000000e+00> : vector<16x512xf32>
    %24 = tpu.matmul %23, %11, %cst_27 {dimension_numbers = #tpu.dot_dimension_numbers<[1], [0], [0], [1], [0, 0, 1, 1], [], []>} : vector<16x128xbf16>, vector<128x512xbf16>, vector<16x512xf32> -> vector<16x512xf32>
    %25 = arith.addf %22, %24 : vector<16x512xf32>
    %26 = arith.truncf %17 : vector<16x128xf32> to vector<16x128xbf16>
    %cst_28 = arith.constant dense<0.000000e+00> : vector<16x512xf32>
    %27 = tpu.matmul %26, %13, %cst_28 {dimension_numbers = #tpu.dot_dimension_numbers<[1], [0], [0], [1], [0, 0, 1, 1], [], []>} : vector<16x128xbf16>, vector<128x512xbf16>, vector<16x512xf32> -> vector<16x512xf32>
    %28 = vector.extract_strided_slice %25 {offsets = [0, 0], sizes = [16, 128], strides = [1, 1]} : vector<16x512xf32> to vector<16x128xf32>
    %29 = arith.negf %28 : vector<16x128xf32>
    %30 = math.exp %29 : vector<16x128xf32>
    %cst_29 = arith.constant 1.000000e+00 : f32
    %31 = vector.broadcast %cst_29 : f32 to vector<16x128xf32>
    %32 = arith.addf %31, %30 : vector<16x128xf32>
    %33 = arith.divf %31, %32 : vector<16x128xf32>
    %34 = vector.extract_strided_slice %25 {offsets = [0, 128], sizes = [16, 128], strides = [1, 1]} : vector<16x512xf32> to vector<16x128xf32>
    %35 = arith.negf %34 : vector<16x128xf32>
    %36 = math.exp %35 : vector<16x128xf32>
    %cst_30 = arith.constant 1.000000e+00 : f32
    %37 = vector.broadcast %cst_30 : f32 to vector<16x128xf32>
    %38 = arith.addf %37, %36 : vector<16x128xf32>
    %39 = arith.divf %37, %38 : vector<16x128xf32>
    %40 = vector.extract_strided_slice %25 {offsets = [0, 256], sizes = [16, 128], strides = [1, 1]} : vector<16x512xf32> to vector<16x128xf32>
    %41 = math.tanh %40 : vector<16x128xf32>
    %42 = vector.extract_strided_slice %25 {offsets = [0, 384], sizes = [16, 128], strides = [1, 1]} : vector<16x512xf32> to vector<16x128xf32>
    %43 = arith.negf %42 : vector<16x128xf32>
    %44 = math.exp %43 : vector<16x128xf32>
    %cst_31 = arith.constant 1.000000e+00 : f32
    %45 = vector.broadcast %cst_31 : f32 to vector<16x128xf32>
    %46 = arith.addf %45, %44 : vector<16x128xf32>
    %47 = arith.divf %45, %46 : vector<16x128xf32>
    %48 = arith.mulf %39, %16 : vector<16x128xf32>
    %49 = arith.mulf %33, %41 : vector<16x128xf32>
    %50 = arith.addf %48, %49 : vector<16x128xf32>
    %51 = math.tanh %50 : vector<16x128xf32>
    %52 = arith.mulf %47, %51 : vector<16x128xf32>
    %53 = arith.truncf %52 : vector<16x128xf32> to vector<16x128xbf16>
    %cst_32 = arith.constant dense<0.000000e+00> : vector<16x512xf32>
    %54 = tpu.matmul %53, %12, %cst_32 {dimension_numbers = #tpu.dot_dimension_numbers<[1], [0], [0], [1], [0, 0, 1, 1], [], []>} : vector<16x128xbf16>, vector<128x512xbf16>, vector<16x512xf32> -> vector<16x512xf32>
    %55 = arith.addf %27, %54 : vector<16x512xf32>
    %56 = vector.broadcast %14 : vector<1x512xf32> to vector<16x512xf32>
    %57 = arith.addf %55, %56 : vector<16x512xf32>
    %58 = vector.extract_strided_slice %57 {offsets = [0, 0], sizes = [16, 128], strides = [1, 1]} : vector<16x512xf32> to vector<16x128xf32>
    %59 = arith.negf %58 : vector<16x128xf32>
    %60 = math.exp %59 : vector<16x128xf32>
    %cst_33 = arith.constant 1.000000e+00 : f32
    %61 = vector.broadcast %cst_33 : f32 to vector<16x128xf32>
    %62 = arith.addf %61, %60 : vector<16x128xf32>
    %63 = arith.divf %61, %62 : vector<16x128xf32>
    %64 = vector.extract_strided_slice %57 {offsets = [0, 128], sizes = [16, 128], strides = [1, 1]} : vector<16x512xf32> to vector<16x128xf32>
    %65 = arith.negf %64 : vector<16x128xf32>
    %66 = math.exp %65 : vector<16x128xf32>
    %cst_34 = arith.constant 1.000000e+00 : f32
    %67 = vector.broadcast %cst_34 : f32 to vector<16x128xf32>
    %68 = arith.addf %67, %66 : vector<16x128xf32>
    %69 = arith.divf %67, %68 : vector<16x128xf32>
    %70 = vector.extract_strided_slice %57 {offsets = [0, 256], sizes = [16, 128], strides = [1, 1]} : vector<16x512xf32> to vector<16x128xf32>
    %71 = math.tanh %70 : vector<16x128xf32>
    %72 = vector.extract_strided_slice %57 {offsets = [0, 384], sizes = [16, 128], strides = [1, 1]} : vector<16x512xf32> to vector<16x128xf32>
    %73 = arith.negf %72 : vector<16x128xf32>
    %74 = math.exp %73 : vector<16x128xf32>
    %cst_35 = arith.constant 1.000000e+00 : f32
    %75 = vector.broadcast %cst_35 : f32 to vector<16x128xf32>
    %76 = arith.addf %75, %74 : vector<16x128xf32>
    %77 = arith.divf %75, %76 : vector<16x128xf32>
    %78 = arith.mulf %69, %18 : vector<16x128xf32>
    %79 = arith.mulf %63, %71 : vector<16x128xf32>
    %80 = arith.addf %78, %79 : vector<16x128xf32>
    %81 = math.tanh %80 : vector<16x128xf32>
    %82 = arith.mulf %77, %81 : vector<16x128xf32>
    %c1_i32 = arith.constant 1 : i32
    %c16_i32_36 = arith.constant 16 : i32
    %83 = arith.muli %c1_i32, %c16_i32_36 : i32
    %84 = tpu.assume_multiple %83, 16 : i32
    %85 = arith.index_cast %84 : i32 to index
    %c0_37 = arith.constant 0 : index
    %86 = vector.load %arg12[%85, %c0_37] : memref<128x512xf32, #tpu.memory_space<vmem>>, vector<16x512xf32>
    %87 = arith.truncf %52 : vector<16x128xf32> to vector<16x128xbf16>
    %cst_38 = arith.constant dense<0.000000e+00> : vector<16x512xf32>
    %88 = tpu.matmul %87, %11, %cst_38 {dimension_numbers = #tpu.dot_dimension_numbers<[1], [0], [0], [1], [0, 0, 1, 1], [], []>} : vector<16x128xbf16>, vector<128x512xbf16>, vector<16x512xf32> -> vector<16x512xf32>
    %89 = arith.addf %86, %88 : vector<16x512xf32>
    %90 = arith.truncf %82 : vector<16x128xf32> to vector<16x128xbf16>
    %cst_39 = arith.constant dense<0.000000e+00> : vector<16x512xf32>
    %91 = tpu.matmul %90, %13, %cst_39 {dimension_numbers = #tpu.dot_dimension_numbers<[1], [0], [0], [1], [0, 0, 1, 1], [], []>} : vector<16x128xbf16>, vector<128x512xbf16>, vector<16x512xf32> -> vector<16x512xf32>
    %92 = vector.extract_strided_slice %89 {offsets = [0, 0], sizes = [16, 128], strides = [1, 1]} : vector<16x512xf32> to vector<16x128xf32>
    %93 = arith.negf %92 : vector<16x128xf32>
    %94 = math.exp %93 : vector<16x128xf32>
    %cst_40 = arith.constant 1.000000e+00 : f32
    %95 = vector.broadcast %cst_40 : f32 to vector<16x128xf32>
    %96 = arith.addf %95, %94 : vector<16x128xf32>
    %97 = arith.divf %95, %96 : vector<16x128xf32>
    %98 = vector.extract_strided_slice %89 {offsets = [0, 128], sizes = [16, 128], strides = [1, 1]} : vector<16x512xf32> to vector<16x128xf32>
    %99 = arith.negf %98 : vector<16x128xf32>
    %100 = math.exp %99 : vector<16x128xf32>
    %cst_41 = arith.constant 1.000000e+00 : f32
    %101 = vector.broadcast %cst_41 : f32 to vector<16x128xf32>
    %102 = arith.addf %101, %100 : vector<16x128xf32>
    %103 = arith.divf %101, %102 : vector<16x128xf32>
    %104 = vector.extract_strided_slice %89 {offsets = [0, 256], sizes = [16, 128], strides = [1, 1]} : vector<16x512xf32> to vector<16x128xf32>
    %105 = math.tanh %104 : vector<16x128xf32>
    %106 = vector.extract_strided_slice %89 {offsets = [0, 384], sizes = [16, 128], strides = [1, 1]} : vector<16x512xf32> to vector<16x128xf32>
    %107 = arith.negf %106 : vector<16x128xf32>
    %108 = math.exp %107 : vector<16x128xf32>
    %cst_42 = arith.constant 1.000000e+00 : f32
    %109 = vector.broadcast %cst_42 : f32 to vector<16x128xf32>
    %110 = arith.addf %109, %108 : vector<16x128xf32>
    %111 = arith.divf %109, %110 : vector<16x128xf32>
    %112 = arith.mulf %103, %50 : vector<16x128xf32>
    %113 = arith.mulf %97, %105 : vector<16x128xf32>
    %114 = arith.addf %112, %113 : vector<16x128xf32>
    %115 = math.tanh %114 : vector<16x128xf32>
    %116 = arith.mulf %111, %115 : vector<16x128xf32>
    %117 = arith.truncf %116 : vector<16x128xf32> to vector<16x128xbf16>
    %cst_43 = arith.constant dense<0.000000e+00> : vector<16x512xf32>
    %118 = tpu.matmul %117, %12, %cst_43 {dimension_numbers = #tpu.dot_dimension_numbers<[1], [0], [0], [1], [0, 0, 1, 1], [], []>} : vector<16x128xbf16>, vector<128x512xbf16>, vector<16x512xf32> -> vector<16x512xf32>
    %119 = arith.addf %91, %118 : vector<16x512xf32>
    %120 = vector.broadcast %14 : vector<1x512xf32> to vector<16x512xf32>
    %121 = arith.addf %119, %120 : vector<16x512xf32>
    %122 = vector.extract_strided_slice %121 {offsets = [0, 0], sizes = [16, 128], strides = [1, 1]} : vector<16x512xf32> to vector<16x128xf32>
    %123 = arith.negf %122 : vector<16x128xf32>
    %124 = math.exp %123 : vector<16x128xf32>
    %cst_44 = arith.constant 1.000000e+00 : f32
    %125 = vector.broadcast %cst_44 : f32 to vector<16x128xf32>
    %126 = arith.addf %125, %124 : vector<16x128xf32>
    %127 = arith.divf %125, %126 : vector<16x128xf32>
    %128 = vector.extract_strided_slice %121 {offsets = [0, 128], sizes = [16, 128], strides = [1, 1]} : vector<16x512xf32> to vector<16x128xf32>
    %129 = arith.negf %128 : vector<16x128xf32>
    %130 = math.exp %129 : vector<16x128xf32>
    %cst_45 = arith.constant 1.000000e+00 : f32
    %131 = vector.broadcast %cst_45 : f32 to vector<16x128xf32>
    %132 = arith.addf %131, %130 : vector<16x128xf32>
    %133 = arith.divf %131, %132 : vector<16x128xf32>
    %134 = vector.extract_strided_slice %121 {offsets = [0, 256], sizes = [16, 128], strides = [1, 1]} : vector<16x512xf32> to vector<16x128xf32>
    %135 = math.tanh %134 : vector<16x128xf32>
    %136 = vector.extract_strided_slice %121 {offsets = [0, 384], sizes = [16, 128], strides = [1, 1]} : vector<16x512xf32> to vector<16x128xf32>
    %137 = arith.negf %136 : vector<16x128xf32>
    %138 = math.exp %137 : vector<16x128xf32>
    %cst_46 = arith.constant 1.000000e+00 : f32
    %139 = vector.broadcast %cst_46 : f32 to vector<16x128xf32>
    %140 = arith.addf %139, %138 : vector<16x128xf32>
    %141 = arith.divf %139, %140 : vector<16x128xf32>
    %142 = arith.mulf %133, %80 : vector<16x128xf32>
    %143 = arith.mulf %127, %135 : vector<16x128xf32>
    %144 = arith.addf %142, %143 : vector<16x128xf32>
    %145 = math.tanh %144 : vector<16x128xf32>
    %146 = arith.mulf %141, %145 : vector<16x128xf32>
    %c2_i32 = arith.constant 2 : i32
    %c16_i32_47 = arith.constant 16 : i32
    %147 = arith.muli %c2_i32, %c16_i32_47 : i32
    %148 = tpu.assume_multiple %147, 16 : i32
    %149 = arith.index_cast %148 : i32 to index
    %c0_48 = arith.constant 0 : index
    %150 = vector.load %arg12[%149, %c0_48] : memref<128x512xf32, #tpu.memory_space<vmem>>, vector<16x512xf32>
    %151 = arith.truncf %116 : vector<16x128xf32> to vector<16x128xbf16>
    %cst_49 = arith.constant dense<0.000000e+00> : vector<16x512xf32>
    %152 = tpu.matmul %151, %11, %cst_49 {dimension_numbers = #tpu.dot_dimension_numbers<[1], [0], [0], [1], [0, 0, 1, 1], [], []>} : vector<16x128xbf16>, vector<128x512xbf16>, vector<16x512xf32> -> vector<16x512xf32>
    %153 = arith.addf %150, %152 : vector<16x512xf32>
    %154 = arith.truncf %146 : vector<16x128xf32> to vector<16x128xbf16>
    %cst_50 = arith.constant dense<0.000000e+00> : vector<16x512xf32>
    %155 = tpu.matmul %154, %13, %cst_50 {dimension_numbers = #tpu.dot_dimension_numbers<[1], [0], [0], [1], [0, 0, 1, 1], [], []>} : vector<16x128xbf16>, vector<128x512xbf16>, vector<16x512xf32> -> vector<16x512xf32>
    %156 = vector.extract_strided_slice %153 {offsets = [0, 0], sizes = [16, 128], strides = [1, 1]} : vector<16x512xf32> to vector<16x128xf32>
    %157 = arith.negf %156 : vector<16x128xf32>
    %158 = math.exp %157 : vector<16x128xf32>
    %cst_51 = arith.constant 1.000000e+00 : f32
    %159 = vector.broadcast %cst_51 : f32 to vector<16x128xf32>
    %160 = arith.addf %159, %158 : vector<16x128xf32>
    %161 = arith.divf %159, %160 : vector<16x128xf32>
    %162 = vector.extract_strided_slice %153 {offsets = [0, 128], sizes = [16, 128], strides = [1, 1]} : vector<16x512xf32> to vector<16x128xf32>
    %163 = arith.negf %162 : vector<16x128xf32>
    %164 = math.exp %163 : vector<16x128xf32>
    %cst_52 = arith.constant 1.000000e+00 : f32
    %165 = vector.broadcast %cst_52 : f32 to vector<16x128xf32>
    %166 = arith.addf %165, %164 : vector<16x128xf32>
    %167 = arith.divf %165, %166 : vector<16x128xf32>
    %168 = vector.extract_strided_slice %153 {offsets = [0, 256], sizes = [16, 128], strides = [1, 1]} : vector<16x512xf32> to vector<16x128xf32>
    %169 = math.tanh %168 : vector<16x128xf32>
    %170 = vector.extract_strided_slice %153 {offsets = [0, 384], sizes = [16, 128], strides = [1, 1]} : vector<16x512xf32> to vector<16x128xf32>
    %171 = arith.negf %170 : vector<16x128xf32>
    %172 = math.exp %171 : vector<16x128xf32>
    %cst_53 = arith.constant 1.000000e+00 : f32
    %173 = vector.broadcast %cst_53 : f32 to vector<16x128xf32>
    %174 = arith.addf %173, %172 : vector<16x128xf32>
    %175 = arith.divf %173, %174 : vector<16x128xf32>
    %176 = arith.mulf %167, %114 : vector<16x128xf32>
    %177 = arith.mulf %161, %169 : vector<16x128xf32>
    %178 = arith.addf %176, %177 : vector<16x128xf32>
    %179 = math.tanh %178 : vector<16x128xf32>
    %180 = arith.mulf %175, %179 : vector<16x128xf32>
    %181 = arith.truncf %180 : vector<16x128xf32> to vector<16x128xbf16>
    %cst_54 = arith.constant dense<0.000000e+00> : vector<16x512xf32>
    %182 = tpu.matmul %181, %12, %cst_54 {dimension_numbers = #tpu.dot_dimension_numbers<[1], [0], [0], [1], [0, 0, 1, 1], [], []>} : vector<16x128xbf16>, vector<128x512xbf16>, vector<16x512xf32> -> vector<16x512xf32>
    %183 = arith.addf %155, %182 : vector<16x512xf32>
    %184 = vector.broadcast %14 : vector<1x512xf32> to vector<16x512xf32>
    %185 = arith.addf %183, %184 : vector<16x512xf32>
    %186 = vector.extract_strided_slice %185 {offsets = [0, 0], sizes = [16, 128], strides = [1, 1]} : vector<16x512xf32> to vector<16x128xf32>
    %187 = arith.negf %186 : vector<16x128xf32>
    %188 = math.exp %187 : vector<16x128xf32>
    %cst_55 = arith.constant 1.000000e+00 : f32
    %189 = vector.broadcast %cst_55 : f32 to vector<16x128xf32>
    %190 = arith.addf %189, %188 : vector<16x128xf32>
    %191 = arith.divf %189, %190 : vector<16x128xf32>
    %192 = vector.extract_strided_slice %185 {offsets = [0, 128], sizes = [16, 128], strides = [1, 1]} : vector<16x512xf32> to vector<16x128xf32>
    %193 = arith.negf %192 : vector<16x128xf32>
    %194 = math.exp %193 : vector<16x128xf32>
    %cst_56 = arith.constant 1.000000e+00 : f32
    %195 = vector.broadcast %cst_56 : f32 to vector<16x128xf32>
    %196 = arith.addf %195, %194 : vector<16x128xf32>
    %197 = arith.divf %195, %196 : vector<16x128xf32>
    %198 = vector.extract_strided_slice %185 {offsets = [0, 256], sizes = [16, 128], strides = [1, 1]} : vector<16x512xf32> to vector<16x128xf32>
    %199 = math.tanh %198 : vector<16x128xf32>
    %200 = vector.extract_strided_slice %185 {offsets = [0, 384], sizes = [16, 128], strides = [1, 1]} : vector<16x512xf32> to vector<16x128xf32>
    %201 = arith.negf %200 : vector<16x128xf32>
    %202 = math.exp %201 : vector<16x128xf32>
    %cst_57 = arith.constant 1.000000e+00 : f32
    %203 = vector.broadcast %cst_57 : f32 to vector<16x128xf32>
    %204 = arith.addf %203, %202 : vector<16x128xf32>
    %205 = arith.divf %203, %204 : vector<16x128xf32>
    %206 = arith.mulf %197, %144 : vector<16x128xf32>
    %207 = arith.mulf %191, %199 : vector<16x128xf32>
    %208 = arith.addf %206, %207 : vector<16x128xf32>
    %209 = math.tanh %208 : vector<16x128xf32>
    %210 = arith.mulf %205, %209 : vector<16x128xf32>
    %c3_i32 = arith.constant 3 : i32
    %c16_i32_58 = arith.constant 16 : i32
    %211 = arith.muli %c3_i32, %c16_i32_58 : i32
    %212 = tpu.assume_multiple %211, 16 : i32
    %213 = arith.index_cast %212 : i32 to index
    %c0_59 = arith.constant 0 : index
    %214 = vector.load %arg12[%213, %c0_59] : memref<128x512xf32, #tpu.memory_space<vmem>>, vector<16x512xf32>
    %215 = arith.truncf %180 : vector<16x128xf32> to vector<16x128xbf16>
    %cst_60 = arith.constant dense<0.000000e+00> : vector<16x512xf32>
    %216 = tpu.matmul %215, %11, %cst_60 {dimension_numbers = #tpu.dot_dimension_numbers<[1], [0], [0], [1], [0, 0, 1, 1], [], []>} : vector<16x128xbf16>, vector<128x512xbf16>, vector<16x512xf32> -> vector<16x512xf32>
    %217 = arith.addf %214, %216 : vector<16x512xf32>
    %218 = arith.truncf %210 : vector<16x128xf32> to vector<16x128xbf16>
    %cst_61 = arith.constant dense<0.000000e+00> : vector<16x512xf32>
    %219 = tpu.matmul %218, %13, %cst_61 {dimension_numbers = #tpu.dot_dimension_numbers<[1], [0], [0], [1], [0, 0, 1, 1], [], []>} : vector<16x128xbf16>, vector<128x512xbf16>, vector<16x512xf32> -> vector<16x512xf32>
    %220 = vector.extract_strided_slice %217 {offsets = [0, 0], sizes = [16, 128], strides = [1, 1]} : vector<16x512xf32> to vector<16x128xf32>
    %221 = arith.negf %220 : vector<16x128xf32>
    %222 = math.exp %221 : vector<16x128xf32>
    %cst_62 = arith.constant 1.000000e+00 : f32
    %223 = vector.broadcast %cst_62 : f32 to vector<16x128xf32>
    %224 = arith.addf %223, %222 : vector<16x128xf32>
    %225 = arith.divf %223, %224 : vector<16x128xf32>
    %226 = vector.extract_strided_slice %217 {offsets = [0, 128], sizes = [16, 128], strides = [1, 1]} : vector<16x512xf32> to vector<16x128xf32>
    %227 = arith.negf %226 : vector<16x128xf32>
    %228 = math.exp %227 : vector<16x128xf32>
    %cst_63 = arith.constant 1.000000e+00 : f32
    %229 = vector.broadcast %cst_63 : f32 to vector<16x128xf32>
    %230 = arith.addf %229, %228 : vector<16x128xf32>
    %231 = arith.divf %229, %230 : vector<16x128xf32>
    %232 = vector.extract_strided_slice %217 {offsets = [0, 256], sizes = [16, 128], strides = [1, 1]} : vector<16x512xf32> to vector<16x128xf32>
    %233 = math.tanh %232 : vector<16x128xf32>
    %234 = vector.extract_strided_slice %217 {offsets = [0, 384], sizes = [16, 128], strides = [1, 1]} : vector<16x512xf32> to vector<16x128xf32>
    %235 = arith.negf %234 : vector<16x128xf32>
    %236 = math.exp %235 : vector<16x128xf32>
    %cst_64 = arith.constant 1.000000e+00 : f32
    %237 = vector.broadcast %cst_64 : f32 to vector<16x128xf32>
    %238 = arith.addf %237, %236 : vector<16x128xf32>
    %239 = arith.divf %237, %238 : vector<16x128xf32>
    %240 = arith.mulf %231, %178 : vector<16x128xf32>
    %241 = arith.mulf %225, %233 : vector<16x128xf32>
    %242 = arith.addf %240, %241 : vector<16x128xf32>
    %243 = math.tanh %242 : vector<16x128xf32>
    %244 = arith.mulf %239, %243 : vector<16x128xf32>
    %245 = arith.truncf %244 : vector<16x128xf32> to vector<16x128xbf16>
    %cst_65 = arith.constant dense<0.000000e+00> : vector<16x512xf32>
    %246 = tpu.matmul %245, %12, %cst_65 {dimension_numbers = #tpu.dot_dimension_numbers<[1], [0], [0], [1], [0, 0, 1, 1], [], []>} : vector<16x128xbf16>, vector<128x512xbf16>, vector<16x512xf32> -> vector<16x512xf32>
    %247 = arith.addf %219, %246 : vector<16x512xf32>
    %248 = vector.broadcast %14 : vector<1x512xf32> to vector<16x512xf32>
    %249 = arith.addf %247, %248 : vector<16x512xf32>
    %250 = vector.extract_strided_slice %249 {offsets = [0, 0], sizes = [16, 128], strides = [1, 1]} : vector<16x512xf32> to vector<16x128xf32>
    %251 = arith.negf %250 : vector<16x128xf32>
    %252 = math.exp %251 : vector<16x128xf32>
    %cst_66 = arith.constant 1.000000e+00 : f32
    %253 = vector.broadcast %cst_66 : f32 to vector<16x128xf32>
    %254 = arith.addf %253, %252 : vector<16x128xf32>
    %255 = arith.divf %253, %254 : vector<16x128xf32>
    %256 = vector.extract_strided_slice %249 {offsets = [0, 128], sizes = [16, 128], strides = [1, 1]} : vector<16x512xf32> to vector<16x128xf32>
    %257 = arith.negf %256 : vector<16x128xf32>
    %258 = math.exp %257 : vector<16x128xf32>
    %cst_67 = arith.constant 1.000000e+00 : f32
    %259 = vector.broadcast %cst_67 : f32 to vector<16x128xf32>
    %260 = arith.addf %259, %258 : vector<16x128xf32>
    %261 = arith.divf %259, %260 : vector<16x128xf32>
    %262 = vector.extract_strided_slice %249 {offsets = [0, 256], sizes = [16, 128], strides = [1, 1]} : vector<16x512xf32> to vector<16x128xf32>
    %263 = math.tanh %262 : vector<16x128xf32>
    %264 = vector.extract_strided_slice %249 {offsets = [0, 384], sizes = [16, 128], strides = [1, 1]} : vector<16x512xf32> to vector<16x128xf32>
    %265 = arith.negf %264 : vector<16x128xf32>
    %266 = math.exp %265 : vector<16x128xf32>
    %cst_68 = arith.constant 1.000000e+00 : f32
    %267 = vector.broadcast %cst_68 : f32 to vector<16x128xf32>
    %268 = arith.addf %267, %266 : vector<16x128xf32>
    %269 = arith.divf %267, %268 : vector<16x128xf32>
    %270 = arith.mulf %261, %208 : vector<16x128xf32>
    %271 = arith.mulf %255, %263 : vector<16x128xf32>
    %272 = arith.addf %270, %271 : vector<16x128xf32>
    %273 = math.tanh %272 : vector<16x128xf32>
    %274 = arith.mulf %269, %273 : vector<16x128xf32>
    %c4_i32 = arith.constant 4 : i32
    %c16_i32_69 = arith.constant 16 : i32
    %275 = arith.muli %c4_i32, %c16_i32_69 : i32
    %276 = tpu.assume_multiple %275, 16 : i32
    %277 = arith.index_cast %276 : i32 to index
    %c0_70 = arith.constant 0 : index
    %278 = vector.load %arg12[%277, %c0_70] : memref<128x512xf32, #tpu.memory_space<vmem>>, vector<16x512xf32>
    %279 = arith.truncf %244 : vector<16x128xf32> to vector<16x128xbf16>
    %cst_71 = arith.constant dense<0.000000e+00> : vector<16x512xf32>
    %280 = tpu.matmul %279, %11, %cst_71 {dimension_numbers = #tpu.dot_dimension_numbers<[1], [0], [0], [1], [0, 0, 1, 1], [], []>} : vector<16x128xbf16>, vector<128x512xbf16>, vector<16x512xf32> -> vector<16x512xf32>
    %281 = arith.addf %278, %280 : vector<16x512xf32>
    %282 = arith.truncf %274 : vector<16x128xf32> to vector<16x128xbf16>
    %cst_72 = arith.constant dense<0.000000e+00> : vector<16x512xf32>
    %283 = tpu.matmul %282, %13, %cst_72 {dimension_numbers = #tpu.dot_dimension_numbers<[1], [0], [0], [1], [0, 0, 1, 1], [], []>} : vector<16x128xbf16>, vector<128x512xbf16>, vector<16x512xf32> -> vector<16x512xf32>
    %284 = vector.extract_strided_slice %281 {offsets = [0, 0], sizes = [16, 128], strides = [1, 1]} : vector<16x512xf32> to vector<16x128xf32>
    %285 = arith.negf %284 : vector<16x128xf32>
    %286 = math.exp %285 : vector<16x128xf32>
    %cst_73 = arith.constant 1.000000e+00 : f32
    %287 = vector.broadcast %cst_73 : f32 to vector<16x128xf32>
    %288 = arith.addf %287, %286 : vector<16x128xf32>
    %289 = arith.divf %287, %288 : vector<16x128xf32>
    %290 = vector.extract_strided_slice %281 {offsets = [0, 128], sizes = [16, 128], strides = [1, 1]} : vector<16x512xf32> to vector<16x128xf32>
    %291 = arith.negf %290 : vector<16x128xf32>
    %292 = math.exp %291 : vector<16x128xf32>
    %cst_74 = arith.constant 1.000000e+00 : f32
    %293 = vector.broadcast %cst_74 : f32 to vector<16x128xf32>
    %294 = arith.addf %293, %292 : vector<16x128xf32>
    %295 = arith.divf %293, %294 : vector<16x128xf32>
    %296 = vector.extract_strided_slice %281 {offsets = [0, 256], sizes = [16, 128], strides = [1, 1]} : vector<16x512xf32> to vector<16x128xf32>
    %297 = math.tanh %296 : vector<16x128xf32>
    %298 = vector.extract_strided_slice %281 {offsets = [0, 384], sizes = [16, 128], strides = [1, 1]} : vector<16x512xf32> to vector<16x128xf32>
    %299 = arith.negf %298 : vector<16x128xf32>
    %300 = math.exp %299 : vector<16x128xf32>
    %cst_75 = arith.constant 1.000000e+00 : f32
    %301 = vector.broadcast %cst_75 : f32 to vector<16x128xf32>
    %302 = arith.addf %301, %300 : vector<16x128xf32>
    %303 = arith.divf %301, %302 : vector<16x128xf32>
    %304 = arith.mulf %295, %242 : vector<16x128xf32>
    %305 = arith.mulf %289, %297 : vector<16x128xf32>
    %306 = arith.addf %304, %305 : vector<16x128xf32>
    %307 = math.tanh %306 : vector<16x128xf32>
    %308 = arith.mulf %303, %307 : vector<16x128xf32>
    %309 = arith.truncf %308 : vector<16x128xf32> to vector<16x128xbf16>
    %cst_76 = arith.constant dense<0.000000e+00> : vector<16x512xf32>
    %310 = tpu.matmul %309, %12, %cst_76 {dimension_numbers = #tpu.dot_dimension_numbers<[1], [0], [0], [1], [0, 0, 1, 1], [], []>} : vector<16x128xbf16>, vector<128x512xbf16>, vector<16x512xf32> -> vector<16x512xf32>
    %311 = arith.addf %283, %310 : vector<16x512xf32>
    %312 = vector.broadcast %14 : vector<1x512xf32> to vector<16x512xf32>
    %313 = arith.addf %311, %312 : vector<16x512xf32>
    %314 = vector.extract_strided_slice %313 {offsets = [0, 0], sizes = [16, 128], strides = [1, 1]} : vector<16x512xf32> to vector<16x128xf32>
    %315 = arith.negf %314 : vector<16x128xf32>
    %316 = math.exp %315 : vector<16x128xf32>
    %cst_77 = arith.constant 1.000000e+00 : f32
    %317 = vector.broadcast %cst_77 : f32 to vector<16x128xf32>
    %318 = arith.addf %317, %316 : vector<16x128xf32>
    %319 = arith.divf %317, %318 : vector<16x128xf32>
    %320 = vector.extract_strided_slice %313 {offsets = [0, 128], sizes = [16, 128], strides = [1, 1]} : vector<16x512xf32> to vector<16x128xf32>
    %321 = arith.negf %320 : vector<16x128xf32>
    %322 = math.exp %321 : vector<16x128xf32>
    %cst_78 = arith.constant 1.000000e+00 : f32
    %323 = vector.broadcast %cst_78 : f32 to vector<16x128xf32>
    %324 = arith.addf %323, %322 : vector<16x128xf32>
    %325 = arith.divf %323, %324 : vector<16x128xf32>
    %326 = vector.extract_strided_slice %313 {offsets = [0, 256], sizes = [16, 128], strides = [1, 1]} : vector<16x512xf32> to vector<16x128xf32>
    %327 = math.tanh %326 : vector<16x128xf32>
    %328 = vector.extract_strided_slice %313 {offsets = [0, 384], sizes = [16, 128], strides = [1, 1]} : vector<16x512xf32> to vector<16x128xf32>
    %329 = arith.negf %328 : vector<16x128xf32>
    %330 = math.exp %329 : vector<16x128xf32>
    %cst_79 = arith.constant 1.000000e+00 : f32
    %331 = vector.broadcast %cst_79 : f32 to vector<16x128xf32>
    %332 = arith.addf %331, %330 : vector<16x128xf32>
    %333 = arith.divf %331, %332 : vector<16x128xf32>
    %334 = arith.mulf %325, %272 : vector<16x128xf32>
    %335 = arith.mulf %319, %327 : vector<16x128xf32>
    %336 = arith.addf %334, %335 : vector<16x128xf32>
    %337 = math.tanh %336 : vector<16x128xf32>
    %338 = arith.mulf %333, %337 : vector<16x128xf32>
    %c5_i32 = arith.constant 5 : i32
    %c16_i32_80 = arith.constant 16 : i32
    %339 = arith.muli %c5_i32, %c16_i32_80 : i32
    %340 = tpu.assume_multiple %339, 16 : i32
    %341 = arith.index_cast %340 : i32 to index
    %c0_81 = arith.constant 0 : index
    %342 = vector.load %arg12[%341, %c0_81] : memref<128x512xf32, #tpu.memory_space<vmem>>, vector<16x512xf32>
    %343 = arith.truncf %308 : vector<16x128xf32> to vector<16x128xbf16>
    %cst_82 = arith.constant dense<0.000000e+00> : vector<16x512xf32>
    %344 = tpu.matmul %343, %11, %cst_82 {dimension_numbers = #tpu.dot_dimension_numbers<[1], [0], [0], [1], [0, 0, 1, 1], [], []>} : vector<16x128xbf16>, vector<128x512xbf16>, vector<16x512xf32> -> vector<16x512xf32>
    %345 = arith.addf %342, %344 : vector<16x512xf32>
    %346 = arith.truncf %338 : vector<16x128xf32> to vector<16x128xbf16>
    %cst_83 = arith.constant dense<0.000000e+00> : vector<16x512xf32>
    %347 = tpu.matmul %346, %13, %cst_83 {dimension_numbers = #tpu.dot_dimension_numbers<[1], [0], [0], [1], [0, 0, 1, 1], [], []>} : vector<16x128xbf16>, vector<128x512xbf16>, vector<16x512xf32> -> vector<16x512xf32>
    %348 = vector.extract_strided_slice %345 {offsets = [0, 0], sizes = [16, 128], strides = [1, 1]} : vector<16x512xf32> to vector<16x128xf32>
    %349 = arith.negf %348 : vector<16x128xf32>
    %350 = math.exp %349 : vector<16x128xf32>
    %cst_84 = arith.constant 1.000000e+00 : f32
    %351 = vector.broadcast %cst_84 : f32 to vector<16x128xf32>
    %352 = arith.addf %351, %350 : vector<16x128xf32>
    %353 = arith.divf %351, %352 : vector<16x128xf32>
    %354 = vector.extract_strided_slice %345 {offsets = [0, 128], sizes = [16, 128], strides = [1, 1]} : vector<16x512xf32> to vector<16x128xf32>
    %355 = arith.negf %354 : vector<16x128xf32>
    %356 = math.exp %355 : vector<16x128xf32>
    %cst_85 = arith.constant 1.000000e+00 : f32
    %357 = vector.broadcast %cst_85 : f32 to vector<16x128xf32>
    %358 = arith.addf %357, %356 : vector<16x128xf32>
    %359 = arith.divf %357, %358 : vector<16x128xf32>
    %360 = vector.extract_strided_slice %345 {offsets = [0, 256], sizes = [16, 128], strides = [1, 1]} : vector<16x512xf32> to vector<16x128xf32>
    %361 = math.tanh %360 : vector<16x128xf32>
    %362 = vector.extract_strided_slice %345 {offsets = [0, 384], sizes = [16, 128], strides = [1, 1]} : vector<16x512xf32> to vector<16x128xf32>
    %363 = arith.negf %362 : vector<16x128xf32>
    %364 = math.exp %363 : vector<16x128xf32>
    %cst_86 = arith.constant 1.000000e+00 : f32
    %365 = vector.broadcast %cst_86 : f32 to vector<16x128xf32>
    %366 = arith.addf %365, %364 : vector<16x128xf32>
    %367 = arith.divf %365, %366 : vector<16x128xf32>
    %368 = arith.mulf %359, %306 : vector<16x128xf32>
    %369 = arith.mulf %353, %361 : vector<16x128xf32>
    %370 = arith.addf %368, %369 : vector<16x128xf32>
    %371 = math.tanh %370 : vector<16x128xf32>
    %372 = arith.mulf %367, %371 : vector<16x128xf32>
    %373 = arith.truncf %372 : vector<16x128xf32> to vector<16x128xbf16>
    %cst_87 = arith.constant dense<0.000000e+00> : vector<16x512xf32>
    %374 = tpu.matmul %373, %12, %cst_87 {dimension_numbers = #tpu.dot_dimension_numbers<[1], [0], [0], [1], [0, 0, 1, 1], [], []>} : vector<16x128xbf16>, vector<128x512xbf16>, vector<16x512xf32> -> vector<16x512xf32>
    %375 = arith.addf %347, %374 : vector<16x512xf32>
    %376 = vector.broadcast %14 : vector<1x512xf32> to vector<16x512xf32>
    %377 = arith.addf %375, %376 : vector<16x512xf32>
    %378 = vector.extract_strided_slice %377 {offsets = [0, 0], sizes = [16, 128], strides = [1, 1]} : vector<16x512xf32> to vector<16x128xf32>
    %379 = arith.negf %378 : vector<16x128xf32>
    %380 = math.exp %379 : vector<16x128xf32>
    %cst_88 = arith.constant 1.000000e+00 : f32
    %381 = vector.broadcast %cst_88 : f32 to vector<16x128xf32>
    %382 = arith.addf %381, %380 : vector<16x128xf32>
    %383 = arith.divf %381, %382 : vector<16x128xf32>
    %384 = vector.extract_strided_slice %377 {offsets = [0, 128], sizes = [16, 128], strides = [1, 1]} : vector<16x512xf32> to vector<16x128xf32>
    %385 = arith.negf %384 : vector<16x128xf32>
    %386 = math.exp %385 : vector<16x128xf32>
    %cst_89 = arith.constant 1.000000e+00 : f32
    %387 = vector.broadcast %cst_89 : f32 to vector<16x128xf32>
    %388 = arith.addf %387, %386 : vector<16x128xf32>
    %389 = arith.divf %387, %388 : vector<16x128xf32>
    %390 = vector.extract_strided_slice %377 {offsets = [0, 256], sizes = [16, 128], strides = [1, 1]} : vector<16x512xf32> to vector<16x128xf32>
    %391 = math.tanh %390 : vector<16x128xf32>
    %392 = vector.extract_strided_slice %377 {offsets = [0, 384], sizes = [16, 128], strides = [1, 1]} : vector<16x512xf32> to vector<16x128xf32>
    %393 = arith.negf %392 : vector<16x128xf32>
    %394 = math.exp %393 : vector<16x128xf32>
    %cst_90 = arith.constant 1.000000e+00 : f32
    %395 = vector.broadcast %cst_90 : f32 to vector<16x128xf32>
    %396 = arith.addf %395, %394 : vector<16x128xf32>
    %397 = arith.divf %395, %396 : vector<16x128xf32>
    %398 = arith.mulf %389, %336 : vector<16x128xf32>
    %399 = arith.mulf %383, %391 : vector<16x128xf32>
    %400 = arith.addf %398, %399 : vector<16x128xf32>
    %401 = math.tanh %400 : vector<16x128xf32>
    %402 = arith.mulf %397, %401 : vector<16x128xf32>
    %c6_i32 = arith.constant 6 : i32
    %c16_i32_91 = arith.constant 16 : i32
    %403 = arith.muli %c6_i32, %c16_i32_91 : i32
    %404 = tpu.assume_multiple %403, 16 : i32
    %405 = arith.index_cast %404 : i32 to index
    %c0_92 = arith.constant 0 : index
    %406 = vector.load %arg12[%405, %c0_92] : memref<128x512xf32, #tpu.memory_space<vmem>>, vector<16x512xf32>
    %407 = arith.truncf %372 : vector<16x128xf32> to vector<16x128xbf16>
    %cst_93 = arith.constant dense<0.000000e+00> : vector<16x512xf32>
    %408 = tpu.matmul %407, %11, %cst_93 {dimension_numbers = #tpu.dot_dimension_numbers<[1], [0], [0], [1], [0, 0, 1, 1], [], []>} : vector<16x128xbf16>, vector<128x512xbf16>, vector<16x512xf32> -> vector<16x512xf32>
    %409 = arith.addf %406, %408 : vector<16x512xf32>
    %410 = arith.truncf %402 : vector<16x128xf32> to vector<16x128xbf16>
    %cst_94 = arith.constant dense<0.000000e+00> : vector<16x512xf32>
    %411 = tpu.matmul %410, %13, %cst_94 {dimension_numbers = #tpu.dot_dimension_numbers<[1], [0], [0], [1], [0, 0, 1, 1], [], []>} : vector<16x128xbf16>, vector<128x512xbf16>, vector<16x512xf32> -> vector<16x512xf32>
    %412 = vector.extract_strided_slice %409 {offsets = [0, 0], sizes = [16, 128], strides = [1, 1]} : vector<16x512xf32> to vector<16x128xf32>
    %413 = arith.negf %412 : vector<16x128xf32>
    %414 = math.exp %413 : vector<16x128xf32>
    %cst_95 = arith.constant 1.000000e+00 : f32
    %415 = vector.broadcast %cst_95 : f32 to vector<16x128xf32>
    %416 = arith.addf %415, %414 : vector<16x128xf32>
    %417 = arith.divf %415, %416 : vector<16x128xf32>
    %418 = vector.extract_strided_slice %409 {offsets = [0, 128], sizes = [16, 128], strides = [1, 1]} : vector<16x512xf32> to vector<16x128xf32>
    %419 = arith.negf %418 : vector<16x128xf32>
    %420 = math.exp %419 : vector<16x128xf32>
    %cst_96 = arith.constant 1.000000e+00 : f32
    %421 = vector.broadcast %cst_96 : f32 to vector<16x128xf32>
    %422 = arith.addf %421, %420 : vector<16x128xf32>
    %423 = arith.divf %421, %422 : vector<16x128xf32>
    %424 = vector.extract_strided_slice %409 {offsets = [0, 256], sizes = [16, 128], strides = [1, 1]} : vector<16x512xf32> to vector<16x128xf32>
    %425 = math.tanh %424 : vector<16x128xf32>
    %426 = vector.extract_strided_slice %409 {offsets = [0, 384], sizes = [16, 128], strides = [1, 1]} : vector<16x512xf32> to vector<16x128xf32>
    %427 = arith.negf %426 : vector<16x128xf32>
    %428 = math.exp %427 : vector<16x128xf32>
    %cst_97 = arith.constant 1.000000e+00 : f32
    %429 = vector.broadcast %cst_97 : f32 to vector<16x128xf32>
    %430 = arith.addf %429, %428 : vector<16x128xf32>
    %431 = arith.divf %429, %430 : vector<16x128xf32>
    %432 = arith.mulf %423, %370 : vector<16x128xf32>
    %433 = arith.mulf %417, %425 : vector<16x128xf32>
    %434 = arith.addf %432, %433 : vector<16x128xf32>
    %435 = math.tanh %434 : vector<16x128xf32>
    %436 = arith.mulf %431, %435 : vector<16x128xf32>
    %437 = arith.truncf %436 : vector<16x128xf32> to vector<16x128xbf16>
    %cst_98 = arith.constant dense<0.000000e+00> : vector<16x512xf32>
    %438 = tpu.matmul %437, %12, %cst_98 {dimension_numbers = #tpu.dot_dimension_numbers<[1], [0], [0], [1], [0, 0, 1, 1], [], []>} : vector<16x128xbf16>, vector<128x512xbf16>, vector<16x512xf32> -> vector<16x512xf32>
    %439 = arith.addf %411, %438 : vector<16x512xf32>
    %440 = vector.broadcast %14 : vector<1x512xf32> to vector<16x512xf32>
    %441 = arith.addf %439, %440 : vector<16x512xf32>
    %442 = vector.extract_strided_slice %441 {offsets = [0, 0], sizes = [16, 128], strides = [1, 1]} : vector<16x512xf32> to vector<16x128xf32>
    %443 = arith.negf %442 : vector<16x128xf32>
    %444 = math.exp %443 : vector<16x128xf32>
    %cst_99 = arith.constant 1.000000e+00 : f32
    %445 = vector.broadcast %cst_99 : f32 to vector<16x128xf32>
    %446 = arith.addf %445, %444 : vector<16x128xf32>
    %447 = arith.divf %445, %446 : vector<16x128xf32>
    %448 = vector.extract_strided_slice %441 {offsets = [0, 128], sizes = [16, 128], strides = [1, 1]} : vector<16x512xf32> to vector<16x128xf32>
    %449 = arith.negf %448 : vector<16x128xf32>
    %450 = math.exp %449 : vector<16x128xf32>
    %cst_100 = arith.constant 1.000000e+00 : f32
    %451 = vector.broadcast %cst_100 : f32 to vector<16x128xf32>
    %452 = arith.addf %451, %450 : vector<16x128xf32>
    %453 = arith.divf %451, %452 : vector<16x128xf32>
    %454 = vector.extract_strided_slice %441 {offsets = [0, 256], sizes = [16, 128], strides = [1, 1]} : vector<16x512xf32> to vector<16x128xf32>
    %455 = math.tanh %454 : vector<16x128xf32>
    %456 = vector.extract_strided_slice %441 {offsets = [0, 384], sizes = [16, 128], strides = [1, 1]} : vector<16x512xf32> to vector<16x128xf32>
    %457 = arith.negf %456 : vector<16x128xf32>
    %458 = math.exp %457 : vector<16x128xf32>
    %cst_101 = arith.constant 1.000000e+00 : f32
    %459 = vector.broadcast %cst_101 : f32 to vector<16x128xf32>
    %460 = arith.addf %459, %458 : vector<16x128xf32>
    %461 = arith.divf %459, %460 : vector<16x128xf32>
    %462 = arith.mulf %453, %400 : vector<16x128xf32>
    %463 = arith.mulf %447, %455 : vector<16x128xf32>
    %464 = arith.addf %462, %463 : vector<16x128xf32>
    %465 = math.tanh %464 : vector<16x128xf32>
    %466 = arith.mulf %461, %465 : vector<16x128xf32>
    %c7_i32 = arith.constant 7 : i32
    %c16_i32_102 = arith.constant 16 : i32
    %467 = arith.muli %c7_i32, %c16_i32_102 : i32
    %468 = tpu.assume_multiple %467, 16 : i32
    %469 = arith.index_cast %468 : i32 to index
    %c0_103 = arith.constant 0 : index
    %470 = vector.load %arg12[%469, %c0_103] : memref<128x512xf32, #tpu.memory_space<vmem>>, vector<16x512xf32>
    %471 = arith.truncf %436 : vector<16x128xf32> to vector<16x128xbf16>
    %cst_104 = arith.constant dense<0.000000e+00> : vector<16x512xf32>
    %472 = tpu.matmul %471, %11, %cst_104 {dimension_numbers = #tpu.dot_dimension_numbers<[1], [0], [0], [1], [0, 0, 1, 1], [], []>} : vector<16x128xbf16>, vector<128x512xbf16>, vector<16x512xf32> -> vector<16x512xf32>
    %473 = arith.addf %470, %472 : vector<16x512xf32>
    %474 = arith.truncf %466 : vector<16x128xf32> to vector<16x128xbf16>
    %cst_105 = arith.constant dense<0.000000e+00> : vector<16x512xf32>
    %475 = tpu.matmul %474, %13, %cst_105 {dimension_numbers = #tpu.dot_dimension_numbers<[1], [0], [0], [1], [0, 0, 1, 1], [], []>} : vector<16x128xbf16>, vector<128x512xbf16>, vector<16x512xf32> -> vector<16x512xf32>
    %476 = vector.extract_strided_slice %473 {offsets = [0, 0], sizes = [16, 128], strides = [1, 1]} : vector<16x512xf32> to vector<16x128xf32>
    %477 = arith.negf %476 : vector<16x128xf32>
    %478 = math.exp %477 : vector<16x128xf32>
    %cst_106 = arith.constant 1.000000e+00 : f32
    %479 = vector.broadcast %cst_106 : f32 to vector<16x128xf32>
    %480 = arith.addf %479, %478 : vector<16x128xf32>
    %481 = arith.divf %479, %480 : vector<16x128xf32>
    %482 = vector.extract_strided_slice %473 {offsets = [0, 128], sizes = [16, 128], strides = [1, 1]} : vector<16x512xf32> to vector<16x128xf32>
    %483 = arith.negf %482 : vector<16x128xf32>
    %484 = math.exp %483 : vector<16x128xf32>
    %cst_107 = arith.constant 1.000000e+00 : f32
    %485 = vector.broadcast %cst_107 : f32 to vector<16x128xf32>
    %486 = arith.addf %485, %484 : vector<16x128xf32>
    %487 = arith.divf %485, %486 : vector<16x128xf32>
    %488 = vector.extract_strided_slice %473 {offsets = [0, 256], sizes = [16, 128], strides = [1, 1]} : vector<16x512xf32> to vector<16x128xf32>
    %489 = math.tanh %488 : vector<16x128xf32>
    %490 = vector.extract_strided_slice %473 {offsets = [0, 384], sizes = [16, 128], strides = [1, 1]} : vector<16x512xf32> to vector<16x128xf32>
    %491 = arith.negf %490 : vector<16x128xf32>
    %492 = math.exp %491 : vector<16x128xf32>
    %cst_108 = arith.constant 1.000000e+00 : f32
    %493 = vector.broadcast %cst_108 : f32 to vector<16x128xf32>
    %494 = arith.addf %493, %492 : vector<16x128xf32>
    %495 = arith.divf %493, %494 : vector<16x128xf32>
    %496 = arith.mulf %487, %434 : vector<16x128xf32>
    %497 = arith.mulf %481, %489 : vector<16x128xf32>
    %498 = arith.addf %496, %497 : vector<16x128xf32>
    %499 = math.tanh %498 : vector<16x128xf32>
    %500 = arith.mulf %495, %499 : vector<16x128xf32>
    %501 = arith.truncf %500 : vector<16x128xf32> to vector<16x128xbf16>
    %cst_109 = arith.constant dense<0.000000e+00> : vector<16x512xf32>
    %502 = tpu.matmul %501, %12, %cst_109 {dimension_numbers = #tpu.dot_dimension_numbers<[1], [0], [0], [1], [0, 0, 1, 1], [], []>} : vector<16x128xbf16>, vector<128x512xbf16>, vector<16x512xf32> -> vector<16x512xf32>
    %503 = arith.addf %475, %502 : vector<16x512xf32>
    %504 = vector.broadcast %14 : vector<1x512xf32> to vector<16x512xf32>
    %505 = arith.addf %503, %504 : vector<16x512xf32>
    %506 = vector.extract_strided_slice %505 {offsets = [0, 0], sizes = [16, 128], strides = [1, 1]} : vector<16x512xf32> to vector<16x128xf32>
    %507 = arith.negf %506 : vector<16x128xf32>
    %508 = math.exp %507 : vector<16x128xf32>
    %cst_110 = arith.constant 1.000000e+00 : f32
    %509 = vector.broadcast %cst_110 : f32 to vector<16x128xf32>
    %510 = arith.addf %509, %508 : vector<16x128xf32>
    %511 = arith.divf %509, %510 : vector<16x128xf32>
    %512 = vector.extract_strided_slice %505 {offsets = [0, 128], sizes = [16, 128], strides = [1, 1]} : vector<16x512xf32> to vector<16x128xf32>
    %513 = arith.negf %512 : vector<16x128xf32>
    %514 = math.exp %513 : vector<16x128xf32>
    %cst_111 = arith.constant 1.000000e+00 : f32
    %515 = vector.broadcast %cst_111 : f32 to vector<16x128xf32>
    %516 = arith.addf %515, %514 : vector<16x128xf32>
    %517 = arith.divf %515, %516 : vector<16x128xf32>
    %518 = vector.extract_strided_slice %505 {offsets = [0, 256], sizes = [16, 128], strides = [1, 1]} : vector<16x512xf32> to vector<16x128xf32>
    %519 = math.tanh %518 : vector<16x128xf32>
    %520 = vector.extract_strided_slice %505 {offsets = [0, 384], sizes = [16, 128], strides = [1, 1]} : vector<16x512xf32> to vector<16x128xf32>
    %521 = arith.negf %520 : vector<16x128xf32>
    %522 = math.exp %521 : vector<16x128xf32>
    %cst_112 = arith.constant 1.000000e+00 : f32
    %523 = vector.broadcast %cst_112 : f32 to vector<16x128xf32>
    %524 = arith.addf %523, %522 : vector<16x128xf32>
    %525 = arith.divf %523, %524 : vector<16x128xf32>
    %526 = arith.mulf %517, %464 : vector<16x128xf32>
    %527 = arith.mulf %511, %519 : vector<16x128xf32>
    %528 = arith.addf %526, %527 : vector<16x128xf32>
    %529 = math.tanh %528 : vector<16x128xf32>
    %530 = arith.mulf %525, %529 : vector<16x128xf32>
    %c8_i32 = arith.constant 8 : i32
    %c0_113 = arith.constant 0 : index
    %c0_114 = arith.constant 0 : index
    %531 = vector.load %arg13[%c0_113, %c0_114] : memref<16x128xf32, #tpu.memory_space<vmem>>, vector<16x128xf32>
    tpu.vector_store %arg13[%c0_113, %c0_114], %500 {strides = array<i32>} : memref<16x128xf32, #tpu.memory_space<vmem>>, vector<16x128xf32>,
    %c0_115 = arith.constant 0 : index
    %c0_116 = arith.constant 0 : index
    %532 = vector.load %arg14[%c0_115, %c0_116] : memref<16x128xf32, #tpu.memory_space<vmem>>, vector<16x128xf32>
    tpu.vector_store %arg14[%c0_115, %c0_116], %498 {strides = array<i32>} : memref<16x128xf32, #tpu.memory_space<vmem>>, vector<16x128xf32>,
    %c0_117 = arith.constant 0 : index
    %c0_118 = arith.constant 0 : index
    %533 = vector.load %arg15[%c0_117, %c0_118] : memref<16x128xf32, #tpu.memory_space<vmem>>, vector<16x128xf32>
    tpu.vector_store %arg15[%c0_117, %c0_118], %530 {strides = array<i32>} : memref<16x128xf32, #tpu.memory_space<vmem>>, vector<16x128xf32>,
    %c0_119 = arith.constant 0 : index
    %c0_120 = arith.constant 0 : index
    %534 = vector.load %arg16[%c0_119, %c0_120] : memref<16x128xf32, #tpu.memory_space<vmem>>, vector<16x128xf32>
    tpu.vector_store %arg16[%c0_119, %c0_120], %528 {strides = array<i32>} : memref<16x128xf32, #tpu.memory_space<vmem>>, vector<16x128xf32>,
    %c0_i32_121 = arith.constant 0 : i32
    %535 = arith.cmpi eq, %arg1, %c0_i32_121 : i32
    %536 = arith.extui %535 : i1 to i32
    %c0_i32_122 = arith.constant 0 : i32
    %537 = arith.cmpi ne, %536, %c0_i32_122 : i32
    scf.if %537 {
      %c0_123 = arith.constant 0 : index
      %c0_124 = arith.constant 0 : index
      %538 = vector.load %arg9[%c0_123, %c0_124] : memref<128x128xf32, #tpu.memory_space<vmem>>, vector<128x128xf32>
      %cst_125 = arith.constant dense<0.000000e+00> : vector<16x128xf32>
      %539 = tpu.matmul %530, %538, %cst_125 {dimension_numbers = #tpu.dot_dimension_numbers<[1], [0], [0], [1], [0, 0, 1, 1], [], []>} : vector<16x128xf32>, vector<128x128xf32>, vector<16x128xf32> -> vector<16x128xf32>
      %c0_126 = arith.constant 0 : index
      %c0_127 = arith.constant 0 : index
      %540 = vector.load %arg10[%c0_126, %c0_127] : memref<1x128xf32, #tpu.memory_space<vmem>>, vector<1x128xf32>
      %541 = vector.broadcast %540 : vector<1x128xf32> to vector<16x128xf32>
      %542 = arith.addf %539, %541 : vector<16x128xf32>
      %543 = arith.negf %542 : vector<16x128xf32>
      %544 = math.exp %543 : vector<16x128xf32>
      %cst_128 = arith.constant 1.000000e+00 : f32
      %545 = vector.broadcast %cst_128 : f32 to vector<16x128xf32>
      %546 = arith.addf %545, %544 : vector<16x128xf32>
      %547 = arith.divf %545, %546 : vector<16x128xf32>
      %c0_129 = arith.constant 0 : index
      %c0_130 = arith.constant 0 : index
      %548 = vector.load %arg11[%c0_129, %c0_130] : memref<16x128xf32, #tpu.memory_space<vmem>>, vector<16x128xf32>
      tpu.vector_store %arg11[%c0_129, %c0_130], %547 {strides = array<i32>} : memref<16x128xf32, #tpu.memory_space<vmem>>, vector<16x128xf32>,
    } else {
    }
    return
  }
  func.func @transform_0(%arg0: i32, %arg1: i32) -> (i32, i32, i32) {
    %c0_i32 = arith.constant 0 : i32
    %c0_i32_0 = arith.constant 0 : i32
    return %arg1, %arg0, %c0_i32 : i32, i32, i32
  }
  func.func @transform_1(%arg0: i32, %arg1: i32) -> (i32, i32) {
    %c0_i32 = arith.constant 0 : i32
    %c0_i32_0 = arith.constant 0 : i32
    %c0_i32_1 = arith.constant 0 : i32
    return %c0_i32, %c0_i32_0 : i32, i32
  }
  func.func @transform_2(%arg0: i32, %arg1: i32) -> (i32, i32) {
    %c0_i32 = arith.constant 0 : i32
    %c0_i32_0 = arith.constant 0 : i32
    %c0_i32_1 = arith.constant 0 : i32
    return %c0_i32, %c0_i32_0 : i32, i32
  }
  func.func @transform_3(%arg0: i32, %arg1: i32) -> (i32, i32) {
    %c0_i32 = arith.constant 0 : i32
    %c0_i32_0 = arith.constant 0 : i32
    %c0_i32_1 = arith.constant 0 : i32
    return %c0_i32, %c0_i32_0 : i32, i32
  }
  func.func @transform_4(%arg0: i32, %arg1: i32) -> (i32, i32) {
    %c0_i32 = arith.constant 0 : i32
    %c0_i32_0 = arith.constant 0 : i32
    %c0_i32_1 = arith.constant 0 : i32
    return %c0_i32, %c0_i32_0 : i32, i32
  }
  func.func @transform_5(%arg0: i32, %arg1: i32) -> (i32, i32) {
    %c0_i32 = arith.constant 0 : i32
    %c0_i32_0 = arith.constant 0 : i32
    %c0_i32_1 = arith.constant 0 : i32
    return %c0_i32, %c0_i32_0 : i32, i32
  }
  func.func @transform_6(%arg0: i32, %arg1: i32) -> (i32, i32) {
    %c0_i32 = arith.constant 0 : i32
    %c0_i32_0 = arith.constant 0 : i32
    %c0_i32_1 = arith.constant 0 : i32
    return %c0_i32, %c0_i32_0 : i32, i32
  }
  func.func @transform_7(%arg0: i32, %arg1: i32) -> (i32, i32) {
    %c0_i32 = arith.constant 0 : i32
    %c0_i32_0 = arith.constant 0 : i32
    %c0_i32_1 = arith.constant 0 : i32
    return %c0_i32, %c0_i32_0 : i32, i32
  }
  func.func @transform_8(%arg0: i32, %arg1: i32) -> (i32, i32) {
    %c0_i32 = arith.constant 0 : i32
    %c0_i32_0 = arith.constant 0 : i32
    %c0_i32_1 = arith.constant 0 : i32
    return %c0_i32, %c0_i32_0 : i32, i32
  }
  func.func @transform_9(%arg0: i32, %arg1: i32) -> (i32, i32) {
    %c0_i32 = arith.constant 0 : i32
    %c0_i32_0 = arith.constant 0 : i32
    return %arg0, %c0_i32 : i32, i32
  }
}

</mosaic_0001>

<bundles_post_ra>
// kernel: lstm_detector_forward.1
= control target key start
LH: loop header
LB: loop body
LE: loop exit
PB: predicated region body
PF: predicated region fallthrough
CT: control target
= control target key end

     0   :  { %14 = vsyncpa [#allocation8], 0  ;;  %s7986_s0 = inlined_call_operand.vmem [shape: bf16[8,16,128], index: 0, kind: input, shape index: {}]   ;;  %s7987_s1 = inlined_call_operand.hbm [shape: bf16[128,512], index: 1, kind: input, shape index: {}]   ;;  %s7988_s2 = inlined_call_operand.hbm [shape: bf16[128,512], index: 2, kind: input, shape index: {}]   ;;  %s7989_s3 = inlined_call_operand.vmem [shape: f32[1,512], index: 3, kind: input, shape index: {}]   ;;  %s7990_s4 = inlined_call_operand.hbm [shape: bf16[128,512], index: 4, kind: input, shape index: {}]   ;;  %s7991_s5 = inlined_call_operand.hbm [shape: bf16[128,512], index: 5, kind: input, shape index: {}]   ;;  %s7992_s6 = inlined_call_operand.vmem [shape: f32[1,512], index: 6, kind: input, shape index: {}]   ;;  %s7993_s7 = inlined_call_operand.hbm [shape: f32[128,128], index: 7, kind: input, shape index: {}]   ;;  %s7994_s8 = inlined_call_operand.vmem [shape: f32[1,128], index: 8, kind: input, shape index: {}]   ;;  %s7995_s9 = inlined_call_operand.vmem [shape: f32[16,128], index: 9, kind: output, shape index: {}]  }
   0x1   :  { %15 = vsyncpa [#allocation10], 0 }
   0x2   :  { %16 = vsyncpa [#allocation13], 0  ;;  %s6040_s30 = smov [#allocation9]   ;;  %s6041_s11 = smov [#allocation12]  }
   0x3   :  { %s36_s10 = sshll.u32 %s6040_s30, 4  ;;  %s62_s12 = sshll.u32 %s6041_s11, 4  ;;  %s37_s10 = int_to_ptr.vmem [resolvable:$true] %s36_s10  ;;  %s6101_s12 = int_to_ptr.vmem [resolvable:$true] %s62_s12 }
   0x4   :  { %s5924_s15 = scalar_lea.hbm %s7988_s2, 4096 }
   0x5   :  { %p5925_p0 = scmp.ne.s32.totalorder %s7988_s2, %s5924_s15  ;;  %p5928_p1 = scmp.lt.u32.totalorder %s5924_s15, %s7988_s2 }
   0x7   :  { %p5930_p2 = pnand %p5928_p1, %p5925_p0 }
   0x9   :  { %5933 = shalt.err (!%p5930_p2)
}
   0xa   :  { %s5934_s20 = scalar_lea.vmem %s37_s10, 4096  ;;  %p5939_p4 = scmp.lt.s32.totalorder %s37_s10, %s37_s10 }
   0xb   :  { %p5935_p3 = scmp.ne.s32.totalorder %s37_s10, %s5934_s20  ;;  %p5940_p5 = scmp.lt.s32.totalorder %s5934_s20, %s5934_s20 }
   0xd   :  { %p5941_p6 = por %p5940_p5, %p5939_p4 }
   0xf   :  { %p5942_p7 = pnand %p5941_p6, %p5935_p3 }
  0x11   :  { %5945 = shalt.err (!%p5942_p7)
}
  0x12   :  { %s6042_s21 = smov 256   ;;  %s6043_s22 = smov 16  }
  0x13   :  { %42 = dma.hbm_to_vmem [thread:$0]  %s7988_s2, 4096, %s37_s10, [#allocation10], %s6042_s21, %s6042_s21, %s6043_s22  }
  0x14   :  { %s5946_s27 = scalar_lea.hbm %s7991_s5, 4096 }
  0x15   :  { %p5947_p8 = scmp.ne.s32.totalorder %s7991_s5, %s5946_s27  ;;  %p5950_p9 = scmp.lt.u32.totalorder %s5946_s27, %s7991_s5 }
  0x17   :  { %p5952_p10 = pnand %p5950_p9, %p5947_p8 }
  0x19   :  { %5955 = shalt.err (!%p5952_p10)
}
  0x1a   :  { %s5956_s13 = scalar_lea.vmem %s6101_s12, 4096  ;;  %p5961_p12 = scmp.lt.s32.totalorder %s6101_s12, %s6101_s12 }
  0x1b   :  { %p5957_p11 = scmp.ne.s32.totalorder %s6101_s12, %s5956_s13  ;;  %p5962_p13 = scmp.lt.s32.totalorder %s5956_s13, %s5956_s13 }
  0x1d   :  { %p5963_p0 = por %p5962_p13, %p5961_p12 }
  0x1f   :  { %p5964_p1 = pnand %p5963_p0, %p5957_p11 }
  0x21   :  { %5967 = shalt.err (!%p5964_p1)
}
  0x22   :  { %68 = dma.hbm_to_vmem [thread:$0]  %s7991_s5, 4096, %s6101_s12, [#allocation13], %s6042_s21, %s6042_s21, %s6043_s22  }
  0x23   :  { %s6044_s14 = smov [#allocation7]   ;;  %s6045_s16 = smov [#allocation11]  }
  0x24   :  { %s24_s15 = sshll.u32 %s6044_s14, 4  ;;  %s50_s17 = sshll.u32 %s6045_s16, 4  ;;  %s25_s15 = int_to_ptr.vmem [resolvable:$true] %s24_s15  ;;  %s6138_s17 = int_to_ptr.vmem [resolvable:$true] %s50_s17 }
  0x25   :  { %s5968_s20 = scalar_lea.hbm %s7987_s1, 4096 }
  0x26   :  { %p5969_p2 = scmp.ne.s32.totalorder %s7987_s1, %s5968_s20  ;;  %p5972_p3 = scmp.lt.u32.totalorder %s5968_s20, %s7987_s1 }
  0x28   :  { %p5974_p4 = pnand %p5972_p3, %p5969_p2 }
  0x2a   :  { %5977 = shalt.err (!%p5974_p4)
}
  0x2b   :  { %s5978_s5 = scalar_lea.vmem %s25_s15, 4096  ;;  %p5983_p6 = scmp.lt.s32.totalorder %s25_s15, %s25_s15 }
  0x2c   :  { %p5979_p5 = scmp.ne.s32.totalorder %s25_s15, %s5978_s5  ;;  %p5984_p7 = scmp.lt.s32.totalorder %s5978_s5, %s5978_s5 }
  0x2e   :  { %p5985_p8 = por %p5984_p7, %p5983_p6 }
  0x30   :  { %p5986_p9 = pnand %p5985_p8, %p5979_p5 }
  0x32   :  { %5989 = shalt.err (!%p5986_p9)
}
  0x33   :  { %30 = dma.hbm_to_vmem [thread:$0]  %s7987_s1, 4096, %s25_s15, [#allocation8], %s6042_s21, %s6042_s21, %s6043_s22  }
  0x34   :  { %s5990_s30 = scalar_lea.hbm %s7990_s4, 4096 }
  0x35   :  { %p5991_p10 = scmp.ne.s32.totalorder %s7990_s4, %s5990_s30  ;;  %p5994_p11 = scmp.lt.u32.totalorder %s5990_s30, %s7990_s4 }
  0x37   :  { %p5996_p12 = pnand %p5994_p11, %p5991_p10 }
  0x39   :  { %5999 = shalt.err (!%p5996_p12)
}
  0x3a   :  { %s6000_s14 = scalar_lea.vmem %s6138_s17, 4096  ;;  %p6005_p0 = scmp.lt.s32.totalorder %s6138_s17, %s6138_s17 }
  0x3b   :  { %p6001_p13 = scmp.ne.s32.totalorder %s6138_s17, %s6000_s14  ;;  %p6006_p1 = scmp.lt.s32.totalorder %s6000_s14, %s6000_s14 }
  0x3d   :  { %p6007_p2 = por %p6006_p1, %p6005_p0 }
  0x3f   :  { %p6008_p3 = pnand %p6007_p2, %p6001_p13 }
  0x41   :  { %6011 = shalt.err (!%p6008_p3)
}
  0x42   :  { %56 = dma.hbm_to_vmem [thread:$0]  %s7990_s4, 4096, %s6138_s17, [#allocation10], %s6042_s21, %s6042_s21, %s6043_s22  }
  0x43   :  { %s6046_s16 = smov [#allocation14]   ;;  %s6012_s23 = scalar_lea.hbm %s7993_s7, 2048 }
  0x44   :  { %s76_s18 = sshll.u32 %s6046_s16, 4  ;;  %p6013_p4 = scmp.ne.s32.totalorder %s7993_s7, %s6012_s23  ;;  %s77_s18 = int_to_ptr.vmem [resolvable:$true] %s76_s18 }
  0x45   :  { %p6016_p5 = scmp.lt.u32.totalorder %s6012_s23, %s7993_s7 }
  0x47   :  { %p6018_p6 = pnand %p6016_p5, %p6013_p4 }
  0x49   :  { %6021 = shalt.err (!%p6018_p6)
}
  0x4a   :  { %s6022_s12 = scalar_lea.vmem %s77_s18, 2048  ;;  %p6027_p8 = scmp.lt.s32.totalorder %s77_s18, %s77_s18 }
  0x4b   :  { %p6023_p7 = scmp.ne.s32.totalorder %s77_s18, %s6022_s12  ;;  %p6028_p9 = scmp.lt.s32.totalorder %s6022_s12, %s6022_s12 }
  0x4d   :  { %p6029_p10 = por %p6028_p9, %p6027_p8 }
  0x4f   :  { %p6030_p11 = pnand %p6029_p10, %p6023_p7 }
  0x51   :  { %6033 = shalt.err (!%p6030_p11)
}
  0x52   :  { %s6047_s4 = smov 128   ;;  %s6048_s21 = smov 8  }
  0x53   :  { %82 = dma.hbm_to_vmem [thread:$0]  %s7993_s7, 2048, %s77_s18, [#allocation13], %s6047_s4, %s6047_s4, %s6048_s21  }
  0x54   :  { %6034 = dma.done.wait [#allocation8], 4096  }
  0x55   :  { %6035 = vsyncadd [#allocation8], 4294963200 }
  0x56   :  { %6036 = dma.done.wait [#allocation10], 8192  }
  0x57   :  { %6037 = vsyncadd [#allocation10], 4294959104 }
  0x58   :  { %6038 = dma.done.wait [#allocation13], 6144  }
  0x59   :  { %6039 = vsyncadd [#allocation13], 4294961152  ;;  %v7998_v0 = vmov 0   ;;  %v5012_v1 = vld [vmem:[#allocation7 + $0x4] ss:$16 sps:$4 sm:$0xff]   ;;  %v5064_v43 = vld [vmem:[%s7986_s0 + $0x8] sm:$0xff]  }
  0x5a   :  { %423 = vmatprep.mubr.bf16.mxu0 %v7998_v0  ;;  %536 = vmatprep.mubr.bf16.mxu1 %v7998_v0  ;;  %v5014_v2 = vld [vmem:[#allocation7 + $0xc] ss:$16 sps:$4 sm:$0xff]   ;;  %v5016_v3 = vld [vmem:[#allocation7] ss:$16 sps:$4 sm:$0xff]   ;;  %v5017_v4 = vld [vmem:[#allocation7 + $0x8] ss:$16 sps:$4 sm:$0xff]  }
  0x5b   :  { %391 = vmatprep.subr.bf16.mxu0 %v5012_v1  ;;  %504 = vmatprep.subr.bf16.mxu1 %v5014_v2  ;;  %v5018_v5 = vld [vmem:[#allocation7 + $0x24] ss:$16 sps:$4 sm:$0xff]   ;;  %v5020_v6 = vld [vmem:[#allocation7 + $0x2c] ss:$16 sps:$4 sm:$0xff]   ;;  %v5022_v7 = vld [vmem:[#allocation7 + $0x20] ss:$16 sps:$4 sm:$0xff]  }
  0x5c   :  { %392 = vmatpush1.bf16.msra.mxu0 %v5016_v3  ;;  %505 = vmatpush1.bf16.msra.mxu1 %v5017_v4  ;;  %v5023_v8 = vld [vmem:[#allocation7 + $0x28] ss:$16 sps:$4 sm:$0xff]   ;;  %v5024_v9 = vld [vmem:[#allocation7 + $0x44] ss:$16 sps:$4 sm:$0xff]   ;;  %v5026_v10 = vld [vmem:[#allocation7 + $0x4c] ss:$16 sps:$4 sm:$0xff]  }
  0x5d   :  { %393 = vmatprep.subr.bf16.mxu0 %v5018_v5  ;;  %506 = vmatprep.subr.bf16.mxu1 %v5020_v6  ;;  %v5028_v11 = vld [vmem:[#allocation7 + $0x40] ss:$16 sps:$4 sm:$0xff]   ;;  %v5029_v12 = vld [vmem:[#allocation7 + $0x48] ss:$16 sps:$4 sm:$0xff]   ;;  %v5030_v13 = vld [vmem:[#allocation7 + $0x64] ss:$16 sps:$4 sm:$0xff]  }
  0x5e   :  { %v5032_v14 = vld [vmem:[#allocation7 + $0x6c] ss:$16 sps:$4 sm:$0xff]   ;;  %v5034_v15 = vld [vmem:[#allocation7 + $0x60] ss:$16 sps:$4 sm:$0xff]   ;;  %v5035_v16 = vld [vmem:[#allocation7 + $0x68] ss:$16 sps:$4 sm:$0xff]  }
  0x5f   :  { %v5036_v17 = vld [vmem:[#allocation7 + $0x84] ss:$16 sps:$4 sm:$0xff]   ;;  %v5038_v18 = vld [vmem:[#allocation7 + $0x8c] ss:$16 sps:$4 sm:$0xff]   ;;  %v5040_v19 = vld [vmem:[#allocation7 + $0x80] ss:$16 sps:$4 sm:$0xff]  }
  0x60   :  { %394 = vmatpush1.bf16.msra.mxu0 %v5022_v7  ;;  %507 = vmatpush1.bf16.msra.mxu1 %v5023_v8  ;;  %v5041_v20 = vld [vmem:[#allocation7 + $0x88] ss:$16 sps:$4 sm:$0xff]   ;;  %v5042_v21 = vld [vmem:[#allocation7 + $0xa4] ss:$16 sps:$4 sm:$0xff]   ;;  %v5044_v22 = vld [vmem:[#allocation7 + $0xac] ss:$16 sps:$4 sm:$0xff]  }
  0x61   :  { %395 = vmatprep.subr.bf16.mxu0 %v5024_v9  ;;  %508 = vmatprep.subr.bf16.mxu1 %v5026_v10  ;;  %v5046_v23 = vld [vmem:[#allocation7 + $0xa0] ss:$16 sps:$4 sm:$0xff]   ;;  %v5047_v24 = vld [vmem:[#allocation7 + $0xa8] ss:$16 sps:$4 sm:$0xff]   ;;  %v5048_v25 = vld [vmem:[#allocation7 + $0xc4] ss:$16 sps:$4 sm:$0xff]  }
  0x62   :  { %v5050_v26 = vld [vmem:[#allocation7 + $0xcc] ss:$16 sps:$4 sm:$0xff]   ;;  %v5052_v27 = vld [vmem:[#allocation7 + $0xc0] ss:$16 sps:$4 sm:$0xff]   ;;  %v5053_v28 = vld [vmem:[#allocation7 + $0xc8] ss:$16 sps:$4 sm:$0xff]  }
  0x63   :  { %v5054_v29 = vld [vmem:[#allocation7 + $0xe4] ss:$16 sps:$4 sm:$0xff]   ;;  %v5056_v30 = vld [vmem:[#allocation7 + $0xec] ss:$16 sps:$4 sm:$0xff]   ;;  %v5058_v31 = vld [vmem:[#allocation7 + $0xe0] ss:$16 sps:$4 sm:$0xff]  }
  0x64   :  { %396 = vmatpush1.bf16.msra.mxu0 %v5028_v11  ;;  %509 = vmatpush1.bf16.msra.mxu1 %v5029_v12  ;;  %v5059_v32 = vld [vmem:[#allocation7 + $0xe8] ss:$16 sps:$4 sm:$0xff]   ;;  %v6189_v33 = vld [vmem:[#allocation9 + $0x4] ss:$16 sps:$4 sm:$0xff]   ;;  %v6191_v34 = vld [vmem:[#allocation9 + $0xc] ss:$16 sps:$4 sm:$0xff]  }
  0x65   :  { %397 = vmatprep.subr.bf16.mxu0 %v5030_v13  ;;  %510 = vmatprep.subr.bf16.mxu1 %v5032_v14  ;;  %v5060_v35 = vld [vmem:[%s7986_s0] sm:$0xff]   ;;  %v6202_v38 = vld [vmem:[#allocation9 + $0x8] ss:$16 sps:$4 sm:$0xff]   ;;  %v6204_v39 = vld [vmem:[#allocation9 + $0x2c] ss:$16 sps:$4 sm:$0xff]   ;;  %v7996_v10 = vmov 0.0|0.0  }
  0x66   :  { %v6196_v36 = vld [vmem:[#allocation9] ss:$16 sps:$4 sm:$0xff]   ;;  %v6199_v37 = vld [vmem:[#allocation9 + $0x24] ss:$16 sps:$4 sm:$0xff]   ;;  %v6215_v42 = vld [vmem:[#allocation9 + $0x28] ss:$16 sps:$4 sm:$0xff]  }
  0x67   :  { %v6208_v40 = vld [vmem:[#allocation9 + $0x20] ss:$16 sps:$4 sm:$0xff]   ;;  %v6212_v41 = vld [vmem:[#allocation9 + $0x44] ss:$16 sps:$4 sm:$0xff]   ;;  %v6227_v46 = vld [vmem:[#allocation9 + $0x4c] ss:$16 sps:$4 sm:$0xff]  }
  0x68   :  { %398 = vmatpush1.bf16.msra.mxu0 %v5034_v15  ;;  %511 = vmatpush1.bf16.msra.mxu1 %v5035_v16  ;;  %v6222_v44 = vld [vmem:[#allocation9 + $0x40] ss:$16 sps:$4 sm:$0xff]   ;;  %v6224_v45 = vld [vmem:[#allocation9 + $0x64] ss:$16 sps:$4 sm:$0xff]   ;;  %v6230_v47 = vld [vmem:[#allocation9 + $0x48] ss:$16 sps:$4 sm:$0xff]  }
  0x69   :  { %399 = vmatprep.subr.bf16.mxu0 %v5036_v17  ;;  %512 = vmatprep.subr.bf16.mxu1 %v5038_v18  ;;  %v6232_v48 = vld [vmem:[#allocation9 + $0x6c] ss:$16 sps:$4 sm:$0xff]   ;;  %v6237_v49 = vld [vmem:[#allocation9 + $0x60] ss:$16 sps:$4 sm:$0xff]   ;;  %v6240_v50 = vld [vmem:[#allocation9 + $0x84] ss:$16 sps:$4 sm:$0xff]  }
  0x6a   :  { %v6244_v51 = vld [vmem:[#allocation9 + $0x68] ss:$16 sps:$4 sm:$0xff]   ;;  %v5070_v52 = vld [vmem:[%s7986_s0 + $0x10] sm:$0xff]   ;;  %v6253_v54 = vld [vmem:[#allocation9 + $0x8c] ss:$16 sps:$4 sm:$0xff]  }
  0x6b   :  { %v6250_v53 = vld [vmem:[#allocation9 + $0x80] ss:$16 sps:$4 sm:$0xff]   ;;  %v6256_v55 = vld [vmem:[#allocation9 + $0xa4] ss:$16 sps:$4 sm:$0xff]   ;;  %v6259_v56 = vld [vmem:[#allocation9 + $0x88] ss:$16 sps:$4 sm:$0xff]  }
  0x6c   :  { %400 = vmatpush1.bf16.msra.mxu0 %v5040_v19  ;;  %513 = vmatpush1.bf16.msra.mxu1 %v5041_v20  ;;  %v6261_v57 = vld [vmem:[#allocation9 + $0xac] ss:$16 sps:$4 sm:$0xff]   ;;  %v6263_v58 = vld [vmem:[#allocation9 + $0xa0] ss:$16 sps:$4 sm:$0xff]   ;;  %v6267_v59 = vld [vmem:[#allocation9 + $0xc4] ss:$16 sps:$4 sm:$0xff]  }
  0x6d   :  { %401 = vmatprep.subr.bf16.mxu0 %v5042_v21  ;;  %514 = vmatprep.subr.bf16.mxu1 %v5044_v22  ;;  %v6269_v60 = vld [vmem:[#allocation9 + $0xa8] ss:$16 sps:$4 sm:$0xff]   ;;  %v6278_v62 = vld [vmem:[#allocation9 + $0xc0] ss:$16 sps:$4 sm:$0xff]   ;;  %v6281_v63 = vld [vmem:[#allocation9 + $0xcc] ss:$16 sps:$4 sm:$0xff]  }
  0x6e   :  { %v5077_v61 = vld [vmem:[%s7986_s0 + $0x18] sm:$0xff]   ;;  %v6283_v1 = vld [vmem:[#allocation9 + $0xe4] ss:$16 sps:$4 sm:$0xff]   ;;  %v6292_v4 = vld [vmem:[#allocation9 + $0xe0] ss:$16 sps:$4 sm:$0xff]  }
  0x6f   :  { %v6285_v2 = vld [vmem:[#allocation9 + $0xc8] ss:$16 sps:$4 sm:$0xff]   ;;  %v6288_v3 = vld [vmem:[#allocation9 + $0xec] ss:$16 sps:$4 sm:$0xff]   ;;  %v5084_v6 = vld [vmem:[%s7986_s0 + $0x20] sm:$0xff]  }
  0x70   :  { %402 = vmatpush1.bf16.msra.mxu0 %v5046_v23  ;;  %515 = vmatpush1.bf16.msra.mxu1 %v5047_v24  ;;  %v6296_v5 = vld [vmem:[#allocation9 + $0xe8] ss:$16 sps:$4 sm:$0xff]   ;;  %v5098_v8 = vld [vmem:[%s7986_s0 + $0x30] sm:$0xff]   ;;  %v6331_v12 = vld [vmem:[#allocation11 + $0xc] ss:$16 sps:$4 sm:$0xff]  }
  0x71   :  { %403 = vmatprep.subr.bf16.mxu0 %v5048_v25  ;;  %516 = vmatprep.subr.bf16.mxu1 %v5050_v26  ;;  %v5091_v7 = vld [vmem:[%s7986_s0 + $0x28] sm:$0xff]   ;;  %v5106_v9 = vld [vmem:[%s7986_s0 + $0x38] sm:$0xff]   ;;  %v6329_v11 = vld [vmem:[#allocation11 + $0x4] ss:$16 sps:$4 sm:$0xff]  }
  0x72   :  { %v6333_v13 = vld [vmem:[#allocation11] ss:$16 sps:$4 sm:$0xff]   ;;  %v6335_v14 = vld [vmem:[#allocation11 + $0x8] ss:$16 sps:$4 sm:$0xff]   ;;  %v6341_v15 = vld [vmem:[#allocation11 + $0x24] ss:$16 sps:$4 sm:$0xff]  }
  0x73   :  { %v6343_v16 = vld [vmem:[#allocation11 + $0x2c] ss:$16 sps:$4 sm:$0xff]   ;;  %v6345_v17 = vld [vmem:[#allocation11 + $0x20] ss:$16 sps:$4 sm:$0xff]   ;;  %v6347_v18 = vld [vmem:[#allocation11 + $0x28] ss:$16 sps:$4 sm:$0xff]  }
  0x74   :  { %404 = vmatpush1.bf16.msra.mxu0 %v5052_v27  ;;  %517 = vmatpush1.bf16.msra.mxu1 %v5053_v28  ;;  %v6353_v19 = vld [vmem:[#allocation11 + $0x44] ss:$16 sps:$4 sm:$0xff]   ;;  %v6355_v20 = vld [vmem:[#allocation11 + $0x4c] ss:$16 sps:$4 sm:$0xff]   ;;  %v6357_v21 = vld [vmem:[#allocation11 + $0x40] ss:$16 sps:$4 sm:$0xff]  }
  0x75   :  { %405 = vmatprep.subr.bf16.mxu0 %v5054_v29  ;;  %518 = vmatprep.subr.bf16.mxu1 %v5056_v30  ;;  %8262 = vst [vmem:[#allocation18_spill] sm:$0xff] %v6357_v21  ;;  %v6359_v22 = vld [vmem:[#allocation11 + $0x48] ss:$16 sps:$4 sm:$0xff]   ;;  %v6365_v23 = vld [vmem:[#allocation11 + $0x64] ss:$16 sps:$4 sm:$0xff]  }
  0x76   :  { %8263 = vst [vmem:[#allocation19_spill] sm:$0xff] %v6359_v22  ;;  %8264 = vst [vmem:[#allocation20_spill] sm:$0xff] %v6365_v23  ;;  %v6367_v24 = vld [vmem:[#allocation11 + $0x6c] ss:$16 sps:$4 sm:$0xff]   ;;  %v6369_v25 = vld [vmem:[#allocation11 + $0x60] ss:$16 sps:$4 sm:$0xff]  }
  0x77   :  { %8265 = vst [vmem:[#allocation21_spill] sm:$0xff] %v6367_v24  ;;  %8266 = vst [vmem:[#allocation22_spill] sm:$0xff] %v6369_v25  ;;  %v6371_v26 = vld [vmem:[#allocation11 + $0x68] ss:$16 sps:$4 sm:$0xff]   ;;  %v6377_v27 = vld [vmem:[#allocation11 + $0x84] ss:$16 sps:$4 sm:$0xff]  }
  0x78   :  { %406 = vmatpush1.bf16.msra.mxu0 %v5058_v31  ;;  %519 = vmatpush1.bf16.msra.mxu1 %v5059_v32  ;;  %8267 = vst [vmem:[#allocation23_spill] sm:$0xff] %v6371_v26  ;;  %8268 = vst [vmem:[#allocation24_spill] sm:$0xff] %v6377_v27  ;;  %v6379_v28 = vld [vmem:[#allocation11 + $0x8c] ss:$16 sps:$4 sm:$0xff]   ;;  %v6381_v29 = vld [vmem:[#allocation11 + $0x80] ss:$16 sps:$4 sm:$0xff]  }
  0x79   :  { %958 = vmatprep.subr.bf16.mxu0 %v6189_v33  ;;  %1001 = vmatprep.subr.bf16.mxu1 %v6191_v34  ;;  %8269 = vst [vmem:[#allocation25_spill] sm:$0xff] %v6379_v28  ;;  %8270 = vst [vmem:[#allocation26_spill] sm:$0xff] %v6381_v29  ;;  %v6383_v30 = vld [vmem:[#allocation11 + $0x88] ss:$16 sps:$4 sm:$0xff]   ;;  %v6387_v31 = vld [vmem:[#allocation11 + $0xa4] ss:$16 sps:$4 sm:$0xff]  }
  0x7a   :  { %8271 = vst [vmem:[#allocation27_spill] sm:$0xff] %v6383_v30  ;;  %8272 = vst [vmem:[#allocation28_spill] sm:$0xff] %v6387_v31  ;;  %v6389_v32 = vld [vmem:[#allocation11 + $0xac] ss:$16 sps:$4 sm:$0xff]  }
  0x7b   :  { %424 = vmatmul.mubr.bf16.vlgmr.msra.gmra.mrb[0].mxu0 %v5060_v35  ;;  %537 = vmatmul.mubr.bf16.vlgmr.msra.gmra.mrb[0].mxu1 %v5060_v35  ;;  %8273 = vst [vmem:[#allocation29_spill] sm:$0xff] %v6389_v32  ;;  %v6393_v35 = vld [vmem:[#allocation11 + $0xa0] ss:$16 sps:$4 sm:$0xff]  }
  0x7c   :  { %959 = vmatpush1.bf16.msra.mxu0 %v6196_v36  ;;  %433 = vmatprep.mubr.bf16.mxu0 %v7998_v0  ;;  %8274 = vst [vmem:[#allocation30_spill] sm:$0xff] %v6393_v35 }
  0x7d   :  { %546 = vmatprep.mubr.bf16.mxu1 %v7998_v0  ;;  %960 = vmatprep.subr.bf16.mxu0 %v6199_v37 }
  0x7e   :  { %1002 = vmatpush1.bf16.msra.mxu1 %v6202_v38 }
  0x7f   :  { %1003 = vmatprep.subr.bf16.mxu1 %v6204_v39 }
  0x80   :  { %961 = vmatpush1.bf16.msra.mxu0 %v6208_v40 }
  0x81   :  { %962 = vmatprep.subr.bf16.mxu0 %v6212_v41 }
  0x82   :  { %1004 = vmatpush1.bf16.msra.mxu1 %v6215_v42 }
  0x83   :  { %434 = vmatmul.mubr.bf16.gmra.mrb[4].mxu0 %v5064_v43  ;;  %547 = vmatmul.mubr.bf16.gmra.mrb[4].mxu1 %v5064_v43  ;;  %v6395_v43 = vld [vmem:[#allocation11 + $0xa8] ss:$16 sps:$4 sm:$0xff]  }
  0x84   :  { %443 = vmatprep.mubr.bf16.mxu0 %v7998_v0  ;;  %556 = vmatprep.mubr.bf16.mxu1 %v7998_v0  ;;  %8275 = vst [vmem:[#allocation31_spill] sm:$0xff] %v6395_v43 }
  0x85   :  { %963 = vmatpush1.bf16.msra.mxu0 %v6222_v44  ;;  %1005 = vmatprep.subr.bf16.mxu1 %v6227_v46 }
  0x86   :  { %964 = vmatprep.subr.bf16.mxu0 %v6224_v45  ;;  %1006 = vmatpush1.bf16.msra.mxu1 %v6230_v47 }
  0x87   :  { %1007 = vmatprep.subr.bf16.mxu1 %v6232_v48 }
  0x89   :  { %965 = vmatpush1.bf16.msra.mxu0 %v6237_v49 }
  0x8a   :  { %966 = vmatprep.subr.bf16.mxu0 %v6240_v50  ;;  %1008 = vmatpush1.bf16.msra.mxu1 %v6244_v51 }
  0x8b   :  { %444 = vmatmul.mubr.bf16.gmra.mrb[8].mxu0 %v5070_v52  ;;  %557 = vmatmul.mubr.bf16.gmra.mrb[8].mxu1 %v5070_v52  ;;  %v6399_v52 = vld [vmem:[#allocation11 + $0xc4] ss:$16 sps:$4 sm:$0xff]  }
  0x8c   :  { %453 = vmatprep.mubr.bf16.mxu0 %v7998_v0  ;;  %566 = vmatprep.mubr.bf16.mxu1 %v7998_v0  ;;  %8276 = vst [vmem:[#allocation32_spill] sm:$0xff] %v6399_v52 }
  0x8d   :  { %967 = vmatpush1.bf16.msra.mxu0 %v6250_v53  ;;  %1009 = vmatprep.subr.bf16.mxu1 %v6253_v54 }
  0x8e   :  { %968 = vmatprep.subr.bf16.mxu0 %v6256_v55  ;;  %1010 = vmatpush1.bf16.msra.mxu1 %v6259_v56 }
  0x8f   :  { %1011 = vmatprep.subr.bf16.mxu1 %v6261_v57 }
  0x91   :  { %969 = vmatpush1.bf16.msra.mxu0 %v6263_v58 }
  0x92   :  { %970 = vmatprep.subr.bf16.mxu0 %v6267_v59  ;;  %1012 = vmatpush1.bf16.msra.mxu1 %v6269_v60 }
  0x93   :  { %454 = vmatmul.mubr.bf16.gmra.mrb[12].mxu0 %v5077_v61  ;;  %567 = vmatmul.mubr.bf16.gmra.mrb[12].mxu1 %v5077_v61  ;;  %v6401_v61 = vld [vmem:[#allocation11 + $0xcc] ss:$16 sps:$4 sm:$0xff]  }
  0x94   :  { %463 = vmatprep.mubr.bf16.mxu0 %v7998_v0  ;;  %576 = vmatprep.mubr.bf16.mxu1 %v7998_v0  ;;  %8277 = vst [vmem:[#allocation33_spill] sm:$0xff] %v6401_v61 }
  0x95   :  { %971 = vmatpush1.bf16.msra.mxu0 %v6278_v62  ;;  %1013 = vmatprep.subr.bf16.mxu1 %v6281_v63 }
  0x96   :  { %972 = vmatprep.subr.bf16.mxu0 %v6283_v1  ;;  %1014 = vmatpush1.bf16.msra.mxu1 %v6285_v2 }
  0x97   :  { %1015 = vmatprep.subr.bf16.mxu1 %v6288_v3 }
  0x99   :  { %973 = vmatpush1.bf16.msra.mxu0 %v6292_v4 }
  0x9a   :  { %1016 = vmatpush1.bf16.msra.mxu1 %v6296_v5  ;;  %1262 = vmatprep.subr.bf16.mxu0 %v6329_v11 }
  0x9b   :  { %464 = vmatmul.mubr.bf16.gmra.mrb[16].mxu0 %v5084_v6  ;;  %577 = vmatmul.mubr.bf16.gmra.mrb[16].mxu1 %v5084_v6  ;;  %v6405_v6 = vld [vmem:[#allocation11 + $0xc0] ss:$16 sps:$4 sm:$0xff]  }
  0x9c   :  { %473 = vmatprep.mubr.bf16.mxu0 %v7998_v0  ;;  %586 = vmatprep.mubr.bf16.mxu1 %v7998_v0  ;;  %8278 = vst [vmem:[#allocation34_spill] sm:$0xff] %v6405_v6 }
  0x9d   :  { %1305 = vmatprep.subr.bf16.mxu1 %v6331_v12 }
  0xa3   :  { %474 = vmatmul.mubr.bf16.gmra.mrb[20].mxu0 %v5091_v7  ;;  %587 = vmatmul.mubr.bf16.gmra.mrb[20].mxu1 %v5091_v7  ;;  %v6407_v7 = vld [vmem:[#allocation11 + $0xc8] ss:$16 sps:$4 sm:$0xff]  }
  0xa4   :  { %483 = vmatprep.mubr.bf16.mxu0 %v7998_v0  ;;  %596 = vmatprep.mubr.bf16.mxu1 %v7998_v0  ;;  %8279 = vst [vmem:[#allocation35_spill] sm:$0xff] %v6407_v7 }
  0xab   :  { %484 = vmatmul.mubr.bf16.gmra.mrb[24].mxu0 %v5098_v8  ;;  %597 = vmatmul.mubr.bf16.gmra.mrb[24].mxu1 %v5098_v8  ;;  %v6411_v8 = vld [vmem:[#allocation11 + $0xe4] ss:$16 sps:$4 sm:$0xff]  }
  0xac   :  { %493 = vmatprep.mubr.bf16.mxu0 %v7998_v0  ;;  %606 = vmatprep.mubr.bf16.mxu1 %v7998_v0  ;;  %8280 = vst [vmem:[#allocation36_spill] sm:$0xff] %v6411_v8 }
  0xb3   :  { %494 = vmatmul.mubr.bf16.gmra.mrb[28].mxu0 %v5106_v9  ;;  %607 = vmatmul.mubr.bf16.gmra.mrb[28].mxu1 %v5106_v9  ;;  %v6413_v9 = vld [vmem:[#allocation11 + $0xec] ss:$16 sps:$4 sm:$0xff]  }
  0xb4   :  { %990 = vmatprep.mubr.bf16.mxu0 %v7998_v0  ;;  %1033 = vmatprep.mubr.bf16.mxu1 %v7998_v0  ;;  %8281 = vst [vmem:[#allocation37_spill] sm:$0xff] %v6413_v9 }
  0xbb   :  { %991 = vmatmul.mubr.bf16.vlgmr.msra.gmra.mrb[0].mxu0 %v7996_v10  ;;  %1034 = vmatmul.mubr.bf16.vlgmr.msra.gmra.mrb[0].mxu1 %v7996_v10  ;;  %v6417_v10 = vld [vmem:[#allocation11 + $0xe0] ss:$16 sps:$4 sm:$0xff]  }
  0xbc   :  { %1294 = vmatprep.mubr.bf16.mxu0 %v7998_v0  ;;  %1337 = vmatprep.mubr.bf16.mxu1 %v7998_v0  ;;  %8282 = vst [vmem:[#allocation38_spill] sm:$0xff] %v6417_v10  ;;  %v6419_v0 = vld [vmem:[#allocation11 + $0xe8] ss:$16 sps:$4 sm:$0xff]  }
  0xbd   :  { %1263 = vmatpush1.bf16.msra.mxu0 %v6333_v13  ;;  %1306 = vmatpush1.bf16.msra.mxu1 %v6335_v14  ;;  %8283 = vst [vmem:[#allocation39_spill] sm:$0xff] %v6419_v0 }
  0xbe   :  { %1264 = vmatprep.subr.bf16.mxu0 %v6341_v15  ;;  %1307 = vmatprep.subr.bf16.mxu1 %v6343_v16 }
  0xc1   :  { %1265 = vmatpush1.bf16.msra.mxu0 %v6345_v17  ;;  %1308 = vmatpush1.bf16.msra.mxu1 %v6347_v18 }
  0xc2   :  { %1266 = vmatprep.subr.bf16.mxu0 %v6353_v19  ;;  %1309 = vmatprep.subr.bf16.mxu1 %v6355_v20 }
  0xc5   :  { %1267 = vmatpush1.bf16.msra.mxu0 %v6357_v21  ;;  %1310 = vmatpush1.bf16.msra.mxu1 %v6359_v22 }
  0xc6   :  { %1268 = vmatprep.subr.bf16.mxu0 %v6365_v23  ;;  %1311 = vmatprep.subr.bf16.mxu1 %v6367_v24 }
  0xc9   :  { %1269 = vmatpush1.bf16.msra.mxu0 %v6369_v25  ;;  %1312 = vmatpush1.bf16.msra.mxu1 %v6371_v26 }
  0xca   :  { %1270 = vmatprep.subr.bf16.mxu0 %v6377_v27  ;;  %1313 = vmatprep.subr.bf16.mxu1 %v6379_v28 }
  0xcd   :  { %1271 = vmatpush1.bf16.msra.mxu0 %v6381_v29  ;;  %1314 = vmatpush1.bf16.msra.mxu1 %v6383_v30 }
  0xce   :  { %1272 = vmatprep.subr.bf16.mxu0 %v6387_v31  ;;  %1315 = vmatprep.subr.bf16.mxu1 %v6389_v32 }
  0xd1   :  { %1273 = vmatpush1.bf16.msra.mxu0 %v6393_v35  ;;  %1316 = vmatpush1.bf16.msra.mxu1 %v6395_v43  ;;  %v6423_v43 = vld [vmem:[#allocation12 + $0x4] ss:$16 sps:$4 sm:$0xff]  }
  0xd2   :  { %1274 = vmatprep.subr.bf16.mxu0 %v6399_v52  ;;  %1317 = vmatprep.subr.bf16.mxu1 %v6401_v61  ;;  %8284 = vst [vmem:[#allocation40_spill] sm:$0xff] %v6423_v43  ;;  %v6425_v52 = vld [vmem:[#allocation12 + $0xc] ss:$16 sps:$4 sm:$0xff]  }
  0xd3   :  { %8285 = vst [vmem:[#allocation41_spill] sm:$0xff] %v6425_v52 }
  0xd5   :  { %1275 = vmatpush1.bf16.msra.mxu0 %v6405_v6  ;;  %1318 = vmatpush1.bf16.msra.mxu1 %v6407_v7  ;;  %v163_v7 = vlaneseq }
  0xd6   :  { %1276 = vmatprep.subr.bf16.mxu0 %v6411_v8  ;;  %1319 = vmatprep.subr.bf16.mxu1 %v6413_v9  ;;  %v161_v9 = vld [vmem:[%s7989_s3] sm:$0xf] }
  0xd7   :  { %v6431_v6 = vshrl.u32 %v163_v7, 7 }
  0xd9   :  { %1277 = vmatpush1.bf16.msra.mxu0 %v6417_v10  ;;  %1320 = vmatpush1.bf16.msra.mxu1 %v6419_v0  ;;  %v8036_v61 = vsub.s32 0, %v6431_v6  ;;  %v8041_v8 = vsub.s32 1, %v6431_v6  ;;  %v8050_v7 = vsub.s32 3, %v6431_v6 }
  0xda   :  { %1508 = vmatprep.subr.bf16.mxu0 %v6423_v43  ;;  %1551 = vmatprep.subr.bf16.mxu1 %v6425_v52 }
  0xdb   :  { %v6440_v10 = vrot.slane %v161_v9, %v8036_v61  ;;  %v6444_v43 = vrot.slane %v161_v9, %v8041_v8  ;;  %v8053_v61 = vsub.s32 2, %v6431_v6  ;;  %v6453_v23 = vrot.slane %v161_v9, %v8050_v7 }
  0xdd   :  { %8286 = vst [vmem:[#allocation42_spill] sm:$0xff] %v6440_v10  ;;  %8287 = vst [vmem:[#allocation43_spill] sm:$0xff] %v6444_v43 }
 0x18e   :  { %v992_v52 = vpop.f32.mrb[0].mxu0  ;;  %v1035_v0 = vpop.f32.mrb[0].mxu1 }
 0x18f   :  { %v4809_v35 = vadd.f32 %v992_v52, %v6440_v10  ;;  %v994_v32 = vpop.f32.mrb[1].mxu0  ;;  %v1037_v31 = vpop.f32.mrb[1].mxu1 }
 0x190   :  { %v4810_v30 = vadd.f32 %v994_v32, %v6444_v43  ;;  %v996_v29 = vpop.f32.mrb[2].mxu0  ;;  %v1039_v28 = vpop.f32.mrb[2].mxu1  ;;  %v4842_v21 = vadd.f32 %v1037_v31, %v6453_v23 }
 0x191   :  { %v4561_v27 = vmul.f32 -1.442695, %v4809_v35  ;;  %v4811_v26 = vadd.f32 %v996_v29, %v6440_v10  ;;  %v998_v25 = vpop.f32.mrb[3].mxu0  ;;  %v1041_v8 = vpop.f32.mrb[3].mxu1  ;;  %v6458_v35 = vrot.slane %v161_v9, %v8053_v61 }
 0x192   :  { %v4563_v24 = vmul.f32 -1.442695, %v4810_v30  ;;  %v4812_v52 = vadd.f32 %v998_v25, %v6444_v43  ;;  %v4565_v30 = vmul.f32 -1.442695, %v4842_v21  ;;  %v4844_v7 = vadd.f32 %v1041_v8, %v6453_v23 }
 0x193   :  { %5212 = vpow2.f32 %v4561_v27  ;;  %v4562_v22 = vmul.f32 -1.442695, %v4811_v26  ;;  %8288 = vst [vmem:[#allocation44_spill] sm:$0xff] %v6458_v35  ;;  %v4841_v29 = vadd.f32 %v1035_v0, %v6458_v35  ;;  %v4843_v10 = vadd.f32 %v1039_v28, %v6458_v35 }
 0x194   :  { %5214 = vpow2.f32 %v4563_v24  ;;  %v4564_v32 = vmul.f32 -1.442695, %v4812_v52  ;;  %v4566_v27 = vmul.f32 -1.442695, %v4844_v7 }
 0x195   :  { %5216 = vpow2.f32 %v4562_v22 }
 0x196   :  { %5218 = vpow2.f32 %v4564_v32 }
 0x197   :  { %5220 = vtanh.f32 %v4841_v29 }
 0x198   :  { %5222 = vpow2.f32 %v4565_v30 }
 0x199   :  { %5224 = vtanh.f32 %v4843_v10 }
 0x19d   :  { %v5213_v25 = vpop.eup %5212 }
 0x19e   :  { %v5215_v26 = vpop.eup %5214  ;;  %v1059_v24 = vadd.f32 1.0, %v5213_v25 }
 0x19f   :  { %v1071_v52 = vadd.f32 1.0, %v5215_v26  ;;  %v5217_v9 = vpop.eup %5216 }
 0x1a0   :  { %5226 = vrcp.f32 %v1059_v24  ;;  %v1060_v22 = vadd.f32 1.0, %v5217_v9  ;;  %v5219_v31 = vpop.eup %5218 }
 0x1a1   :  { %5228 = vrcp.f32 %v1071_v52  ;;  %v1072_v0 = vadd.f32 1.0, %v5219_v31  ;;  %v5221_v21 = vpop.eup %5220 }
 0x1a2   :  { %5230 = vpow2.f32 %v4566_v27  ;;  %v5223_v8 = vpop.eup %5222 }
 0x1a3   :  { %5232 = vrcp.f32 %v1060_v22  ;;  %v5225_v28 = vpop.eup %5224  ;;  %v1085_v26 = vadd.f32 1.0, %v5223_v8 }
 0x1a4   :  { %5234 = vrcp.f32 %v1072_v0 }
 0x1a5   :  { %5236 = vrcp.f32 %v1085_v26  ;;  %v6490_v26 = vld [vmem:[#allocation12 + $0x44] ss:$16 sps:$4 sm:$0xff]  }
 0x1a6   :  { %8289 = vst [vmem:[#allocation45_spill] sm:$0xff] %v6490_v26 }
 0x1aa   :  { %v5227_v32 = vpop.eup %5226 }
 0x1ab   :  { %v5229_v29 = vpop.eup %5228  ;;  %v1093_v61 = vmul.f32 %v5227_v32, %v5221_v21 }
 0x1ac   :  { %v5231_v25 = vpop.eup %5230  ;;  %v1091_v30 = vmul.f32 0.0, %v5229_v29 }
 0x1ad   :  { %v5233_v7 = vpop.eup %5232  ;;  %v1086_v9 = vadd.f32 1.0, %v5231_v25  ;;  %v6476_v25 = vld [vmem:[#allocation12 + $0x24] ss:$16 sps:$4 sm:$0xff]  }
 0x1ae   :  { %v6464_v10 = vadd.f32 %v1093_v61, %v1091_v30  ;;  %v1094_v24 = vmul.f32 %v5233_v7, %v5225_v28  ;;  %v5235_v52 = vpop.eup %5234  ;;  %v6470_v61 = vld [vmem:[#allocation12] ss:$16 sps:$4 sm:$0xff]   ;;  %v6472_v28 = vld [vmem:[#allocation12 + $0x8] ss:$16 sps:$4 sm:$0xff]   ;;  %v6478_v30 = vld [vmem:[#allocation12 + $0x2c] ss:$16 sps:$4 sm:$0xff]  }
 0x1af   :  { %v1092_v35 = vmul.f32 0.0, %v5235_v52  ;;  %v5237_v22 = vpop.eup %5236  ;;  %v6486_v7 = vld [vmem:[#allocation12 + $0x28] ss:$16 sps:$4 sm:$0xff]   ;;  %v8291_v52 = vmov 0  }
 0x1b0   :  { %5238 = vtanh.f32 %v6464_v10 }
 0x1b1   :  { %v6467_v27 = vadd.f32 %v1094_v24, %v1092_v35  ;;  %5240 = vrcp.f32 %v1086_v9  ;;  %v6484_v35 = vld [vmem:[#allocation12 + $0x20] ss:$16 sps:$4 sm:$0xff]   ;;  %v6492_v24 = vld [vmem:[#allocation12 + $0x4c] ss:$16 sps:$4 sm:$0xff]  }
 0x1b2   :  { %8290 = vst [vmem:[#allocation46_spill] sm:$0xff] %v6492_v24  ;;  %v6498_v9 = vld [vmem:[#allocation12 + $0x40] ss:$16 sps:$4 sm:$0xff]  }
 0x1b3   :  { %5242 = vtanh.f32 %v6467_v27  ;;  %8292 = vst [vmem:[#allocation47_spill] sm:$0xff] %v6498_v9 }
 0x1ba   :  { %v5239_v31 = vpop.eup %5238 }
 0x1bb   :  { %v5241_v0 = vpop.eup %5240  ;;  %v1099_v32 = vmul.f32 %v5239_v31, %v5237_v22  ;;  %v6500_v22 = vld [vmem:[#allocation12 + $0x48] ss:$16 sps:$4 sm:$0xff]   ;;  %v6504_v31 = vld [vmem:[#allocation12 + $0x64] ss:$16 sps:$4 sm:$0xff]  }
 0x1bc   :  { %8293 = vst [vmem:[#allocation48_spill] sm:$0xff] %v6500_v22  ;;  %8294 = vst [vmem:[#allocation49_spill] sm:$0xff] %v6504_v31 }
 0x1bd   :  { %v5243_v21 = vpop.eup %5242 }
 0x1be   :  { %v1100_v8 = vmul.f32 %v5243_v21, %v5241_v0  ;;  %v6506_v0 = vld [vmem:[#allocation12 + $0x6c] ss:$16 sps:$4 sm:$0xff]   ;;  %v6510_v21 = vld [vmem:[#allocation12 + $0x60] ss:$16 sps:$4 sm:$0xff]  }
 0x1bf   :  { %8295 = vst [vmem:[#allocation50_spill] sm:$0xff] %v6506_v0  ;;  %8296 = vst [vmem:[#allocation51_spill] sm:$0xff] %v6510_v21 }
 0x1c0   :  { %v6474_v29 = vpack.c.bf16 %v1100_v8, %v1099_v32  ;;  %v6512_v32 = vld [vmem:[#allocation12 + $0x68] ss:$16 sps:$4 sm:$0xff]   ;;  %v6516_v8 = vld [vmem:[#allocation12 + $0x84] ss:$16 sps:$4 sm:$0xff]  }
 0x1c1   :  { %8297 = vst [vmem:[#allocation52_spill] sm:$0xff] %v6512_v32  ;;  %8298 = vst [vmem:[#allocation53_spill] sm:$0xff] %v6516_v8 }
 0x1c2   :  { %1295 = vmatmul.mubr.bf16.vlgmr.msra.gmra.mrb[32].mxu0 %v6474_v29  ;;  %1338 = vmatmul.mubr.bf16.vlgmr.msra.gmra.mrb[32].mxu1 %v6474_v29 }
 0x1c3   :  { %1509 = vmatpush1.bf16.msra.mxu0 %v6470_v61  ;;  %1552 = vmatpush1.bf16.msra.mxu1 %v6472_v28 }
 0x1c4   :  { %1510 = vmatprep.subr.bf16.mxu0 %v6476_v25  ;;  %1553 = vmatprep.subr.bf16.mxu1 %v6478_v30 }
 0x1c5   :  { %1540 = vmatprep.mubr.bf16.mxu0 %v8291_v52  ;;  %1583 = vmatprep.mubr.bf16.mxu1 %v8291_v52 }
 0x1c7   :  { %1511 = vmatpush1.bf16.msra.mxu0 %v6484_v35  ;;  %1554 = vmatpush1.bf16.msra.mxu1 %v6486_v7 }
 0x1c8   :  { %1512 = vmatprep.subr.bf16.mxu0 %v6490_v26  ;;  %1555 = vmatprep.subr.bf16.mxu1 %v6492_v24  ;;  %v6518_v26 = vld [vmem:[#allocation12 + $0x8c] ss:$16 sps:$4 sm:$0xff]   ;;  %v6522_v24 = vld [vmem:[#allocation12 + $0x80] ss:$16 sps:$4 sm:$0xff]  }
 0x1c9   :  { %8299 = vst [vmem:[#allocation54_spill] sm:$0xff] %v6518_v26  ;;  %8300 = vst [vmem:[#allocation55_spill] sm:$0xff] %v6522_v24 }
 0x1cb   :  { %1513 = vmatpush1.bf16.msra.mxu0 %v6498_v9  ;;  %1556 = vmatpush1.bf16.msra.mxu1 %v6500_v22  ;;  %v6524_v9 = vld [vmem:[#allocation12 + $0x88] ss:$16 sps:$4 sm:$0xff]   ;;  %v6528_v22 = vld [vmem:[#allocation12 + $0xa4] ss:$16 sps:$4 sm:$0xff]  }
 0x1cc   :  { %1514 = vmatprep.subr.bf16.mxu0 %v6504_v31  ;;  %1557 = vmatprep.subr.bf16.mxu1 %v6506_v0  ;;  %8301 = vst [vmem:[#allocation56_spill] sm:$0xff] %v6524_v9  ;;  %8302 = vst [vmem:[#allocation57_spill] sm:$0xff] %v6528_v22  ;;  %v6530_v31 = vld [vmem:[#allocation12 + $0xac] ss:$16 sps:$4 sm:$0xff]   ;;  %v6534_v0 = vld [vmem:[#allocation12 + $0xa0] ss:$16 sps:$4 sm:$0xff]  }
 0x1cd   :  { %8303 = vst [vmem:[#allocation58_spill] sm:$0xff] %v6530_v31  ;;  %8304 = vst [vmem:[#allocation59_spill] sm:$0xff] %v6534_v0 }
 0x1cf   :  { %1515 = vmatpush1.bf16.msra.mxu0 %v6510_v21  ;;  %1558 = vmatpush1.bf16.msra.mxu1 %v6512_v32  ;;  %v6536_v21 = vld [vmem:[#allocation12 + $0xa8] ss:$16 sps:$4 sm:$0xff]   ;;  %v6540_v32 = vld [vmem:[#allocation12 + $0xc4] ss:$16 sps:$4 sm:$0xff]  }
 0x1d0   :  { %1516 = vmatprep.subr.bf16.mxu0 %v6516_v8  ;;  %1559 = vmatprep.subr.bf16.mxu1 %v6518_v26  ;;  %v6542_v8 = vld [vmem:[#allocation12 + $0xcc] ss:$16 sps:$4 sm:$0xff]   ;;  %v6546_v26 = vld [vmem:[#allocation12 + $0xc0] ss:$16 sps:$4 sm:$0xff]  }
 0x1d1   :  { %8305 = vst [vmem:[#allocation60_spill] sm:$0xff] %v6542_v8 }
 0x1d3   :  { %1517 = vmatpush1.bf16.msra.mxu0 %v6522_v24  ;;  %1560 = vmatpush1.bf16.msra.mxu1 %v6524_v9  ;;  %v6548_v24 = vld [vmem:[#allocation12 + $0xc8] ss:$16 sps:$4 sm:$0xff]   ;;  %v6552_v9 = vld [vmem:[#allocation12 + $0xe4] ss:$16 sps:$4 sm:$0xff]  }
 0x1d4   :  { %1518 = vmatprep.subr.bf16.mxu0 %v6528_v22  ;;  %1561 = vmatprep.subr.bf16.mxu1 %v6530_v31  ;;  %v6554_v22 = vld [vmem:[#allocation12 + $0xec] ss:$16 sps:$4 sm:$0xff]   ;;  %v6558_v31 = vld [vmem:[#allocation12 + $0xe0] ss:$16 sps:$4 sm:$0xff]  }
 0x1d7   :  { %1519 = vmatpush1.bf16.msra.mxu0 %v6534_v0  ;;  %1562 = vmatpush1.bf16.msra.mxu1 %v6536_v21  ;;  %v6560_v0 = vld [vmem:[#allocation12 + $0xe8] ss:$16 sps:$4 sm:$0xff]  }
 0x1d8   :  { %1520 = vmatprep.subr.bf16.mxu0 %v6540_v32  ;;  %1563 = vmatprep.subr.bf16.mxu1 %v6542_v8  ;;  %v8306_v8 = vmov 0.0|0.0  }
 0x1db   :  { %1521 = vmatpush1.bf16.msra.mxu0 %v6546_v26  ;;  %1564 = vmatpush1.bf16.msra.mxu1 %v6548_v24 }
 0x1dc   :  { %1522 = vmatprep.subr.bf16.mxu0 %v6552_v9  ;;  %1565 = vmatprep.subr.bf16.mxu1 %v6554_v22 }
 0x1df   :  { %1523 = vmatpush1.bf16.msra.mxu0 %v6558_v31  ;;  %1566 = vmatpush1.bf16.msra.mxu1 %v6560_v0 }
 0x1e0   :  { %1682 = vmatprep.subr.bf16.mxu0 %v6189_v33  ;;  %1725 = vmatprep.subr.bf16.mxu1 %v6191_v34  ;;  %v8307_v33 = vld [vmem:[#allocation18_spill] sm:$0xff]  ;;  %v8308_v34 = vld [vmem:[#allocation19_spill] sm:$0xff] }
 0x1e2   :  { %1541 = vmatmul.mubr.bf16.vlgmr.msra.gmra.mrb[32].mxu0 %v8306_v8  ;;  %1584 = vmatmul.mubr.bf16.vlgmr.msra.gmra.mrb[32].mxu1 %v8306_v8 }
 0x1e3   :  { %1683 = vmatpush1.bf16.msra.mxu0 %v6196_v36  ;;  %1726 = vmatpush1.bf16.msra.mxu1 %v6202_v38  ;;  %v8309_v36 = vld [vmem:[#allocation20_spill] sm:$0xff]  ;;  %v8311_v38 = vld [vmem:[#allocation22_spill] sm:$0xff] }
 0x1e4   :  { %1684 = vmatprep.subr.bf16.mxu0 %v6199_v37  ;;  %1727 = vmatprep.subr.bf16.mxu1 %v6204_v39  ;;  %v8310_v37 = vld [vmem:[#allocation21_spill] sm:$0xff]  ;;  %v8312_v39 = vld [vmem:[#allocation23_spill] sm:$0xff] }
 0x1e5   :  { %1714 = vmatprep.mubr.bf16.mxu0 %v8291_v52  ;;  %1757 = vmatprep.mubr.bf16.mxu1 %v8291_v52 }
 0x1e7   :  { %1685 = vmatpush1.bf16.msra.mxu0 %v6208_v40  ;;  %1728 = vmatpush1.bf16.msra.mxu1 %v6215_v42  ;;  %v8313_v40 = vld [vmem:[#allocation24_spill] sm:$0xff]  ;;  %v8315_v42 = vld [vmem:[#allocation26_spill] sm:$0xff] }
 0x1e8   :  { %1686 = vmatprep.subr.bf16.mxu0 %v6212_v41  ;;  %1729 = vmatprep.subr.bf16.mxu1 %v6227_v46  ;;  %v8314_v41 = vld [vmem:[#allocation25_spill] sm:$0xff] }
 0x1e9   :  { %v8318_v46 = vld [vmem:[#allocation29_spill] sm:$0xff] }
 0x1eb   :  { %1687 = vmatpush1.bf16.msra.mxu0 %v6222_v44  ;;  %1730 = vmatpush1.bf16.msra.mxu1 %v6230_v47  ;;  %v8316_v44 = vld [vmem:[#allocation27_spill] sm:$0xff]  ;;  %v8319_v47 = vld [vmem:[#allocation30_spill] sm:$0xff] }
 0x1ec   :  { %1688 = vmatprep.subr.bf16.mxu0 %v6224_v45  ;;  %1731 = vmatprep.subr.bf16.mxu1 %v6232_v48  ;;  %v8317_v45 = vld [vmem:[#allocation28_spill] sm:$0xff]  ;;  %v8320_v48 = vld [vmem:[#allocation31_spill] sm:$0xff] }
 0x1ef   :  { %1689 = vmatpush1.bf16.msra.mxu0 %v6237_v49  ;;  %1732 = vmatpush1.bf16.msra.mxu1 %v6244_v51  ;;  %v8321_v49 = vld [vmem:[#allocation32_spill] sm:$0xff]  ;;  %v8323_v51 = vld [vmem:[#allocation34_spill] sm:$0xff] }
 0x1f0   :  { %1690 = vmatprep.subr.bf16.mxu0 %v6240_v50  ;;  %1733 = vmatprep.subr.bf16.mxu1 %v6253_v54  ;;  %v8322_v50 = vld [vmem:[#allocation33_spill] sm:$0xff]  ;;  %v8325_v54 = vld [vmem:[#allocation36_spill] sm:$0xff] }
 0x1f3   :  { %1691 = vmatpush1.bf16.msra.mxu0 %v6250_v53  ;;  %1734 = vmatpush1.bf16.msra.mxu1 %v6259_v56  ;;  %v8324_v53 = vld [vmem:[#allocation35_spill] sm:$0xff]  ;;  %v8327_v56 = vld [vmem:[#allocation38_spill] sm:$0xff] }
 0x1f4   :  { %1692 = vmatprep.subr.bf16.mxu0 %v6256_v55  ;;  %1735 = vmatprep.subr.bf16.mxu1 %v6261_v57  ;;  %v8326_v55 = vld [vmem:[#allocation37_spill] sm:$0xff]  ;;  %v8328_v57 = vld [vmem:[#allocation39_spill] sm:$0xff] }
 0x1f7   :  { %1693 = vmatpush1.bf16.msra.mxu0 %v6263_v58  ;;  %1736 = vmatpush1.bf16.msra.mxu1 %v6269_v60  ;;  %v8329_v58 = vld [vmem:[#allocation40_spill] sm:$0xff]  ;;  %v777_v60 = vld [vmem:[%s7992_s6] sm:$0xf] }
 0x1f8   :  { %1694 = vmatprep.subr.bf16.mxu0 %v6267_v59  ;;  %1737 = vmatprep.subr.bf16.mxu1 %v6281_v63  ;;  %v8330_v59 = vld [vmem:[#allocation41_spill] sm:$0xff] }
 0x1fb   :  { %1695 = vmatpush1.bf16.msra.mxu0 %v6278_v62  ;;  %1738 = vmatpush1.bf16.msra.mxu1 %v6285_v2  ;;  %v8331_v62 = vsub.s32 0, %v6431_v6 }
 0x1fc   :  { %1696 = vmatprep.subr.bf16.mxu0 %v6283_v1  ;;  %1739 = vmatprep.subr.bf16.mxu1 %v6288_v3  ;;  %v8333_v1 = vsub.s32 1, %v6431_v6 }
 0x1fd   :  { %v6645_v63 = vrot.slane %v777_v60, %v8331_v62 }
 0x1fe   :  { %v6649_v2 = vrot.slane %v777_v60, %v8333_v1 }
 0x1ff   :  { %1697 = vmatpush1.bf16.msra.mxu0 %v6292_v4  ;;  %1740 = vmatpush1.bf16.msra.mxu1 %v6296_v5  ;;  %8332 = vst [vmem:[#allocation18_spill] sm:$0xff] %v6645_v63 }
 0x200   :  { %1826 = vmatprep.subr.bf16.mxu0 %v6329_v11  ;;  %1869 = vmatprep.subr.bf16.mxu1 %v6331_v12 }
 0x202   :  { %1715 = vmatmul.mubr.bf16.vlgmr.msra.gmra.mrb[4].mxu0 %v6474_v29  ;;  %1758 = vmatmul.mubr.bf16.vlgmr.msra.gmra.mrb[4].mxu1 %v6474_v29 }
 0x203   :  { %1827 = vmatpush1.bf16.msra.mxu0 %v6333_v13  ;;  %1870 = vmatpush1.bf16.msra.mxu1 %v6335_v14 }
 0x204   :  { %1828 = vmatprep.subr.bf16.mxu0 %v6341_v15  ;;  %1871 = vmatprep.subr.bf16.mxu1 %v6343_v16 }
 0x205   :  { %1858 = vmatprep.mubr.bf16.mxu0 %v8291_v52  ;;  %1901 = vmatprep.mubr.bf16.mxu1 %v8291_v52 }
 0x207   :  { %1829 = vmatpush1.bf16.msra.mxu0 %v6345_v17  ;;  %1872 = vmatpush1.bf16.msra.mxu1 %v6347_v18 }
 0x208   :  { %1830 = vmatprep.subr.bf16.mxu0 %v6353_v19  ;;  %1873 = vmatprep.subr.bf16.mxu1 %v6355_v20 }
 0x20b   :  { %1831 = vmatpush1.bf16.msra.mxu0 %v8307_v33  ;;  %1874 = vmatpush1.bf16.msra.mxu1 %v8308_v34 }
 0x20c   :  { %1832 = vmatprep.subr.bf16.mxu0 %v8309_v36  ;;  %1875 = vmatprep.subr.bf16.mxu1 %v8310_v37 }
 0x20f   :  { %1833 = vmatpush1.bf16.msra.mxu0 %v8311_v38  ;;  %1876 = vmatpush1.bf16.msra.mxu1 %v8312_v39 }
 0x210   :  { %1834 = vmatprep.subr.bf16.mxu0 %v8313_v40  ;;  %1877 = vmatprep.subr.bf16.mxu1 %v8314_v41 }
 0x213   :  { %1835 = vmatpush1.bf16.msra.mxu0 %v8315_v42  ;;  %1878 = vmatpush1.bf16.msra.mxu1 %v8316_v44 }
 0x214   :  { %1836 = vmatprep.subr.bf16.mxu0 %v8317_v45  ;;  %1879 = vmatprep.subr.bf16.mxu1 %v8318_v46 }
 0x217   :  { %1837 = vmatpush1.bf16.msra.mxu0 %v8319_v47  ;;  %1880 = vmatpush1.bf16.msra.mxu1 %v8320_v48 }
 0x218   :  { %1838 = vmatprep.subr.bf16.mxu0 %v8321_v49  ;;  %1881 = vmatprep.subr.bf16.mxu1 %v8322_v50 }
 0x21b   :  { %1839 = vmatpush1.bf16.msra.mxu0 %v8323_v51  ;;  %1882 = vmatpush1.bf16.msra.mxu1 %v8324_v53  ;;  %v8334_v51 = vsub.s32 3, %v6431_v6 }
 0x21c   :  { %1840 = vmatprep.subr.bf16.mxu0 %v8325_v54  ;;  %1883 = vmatprep.subr.bf16.mxu1 %v8326_v55 }
 0x21d   :  { %v6656_v1 = vrot.slane %v777_v60, %v8334_v51 }
 0x21f   :  { %1841 = vmatpush1.bf16.msra.mxu0 %v8327_v56  ;;  %1884 = vmatpush1.bf16.msra.mxu1 %v8328_v57  ;;  %8335 = vst [vmem:[#allocation19_spill] sm:$0xff] %v6656_v1 }
 0x220   :  { %1912 = vmatprep.subr.bf16.mxu0 %v8329_v58  ;;  %1955 = vmatprep.subr.bf16.mxu1 %v8330_v59 }
 0x2b5   :  { %v1542_v3 = vpop.f32.mrb[32].mxu0  ;;  %v1585_v4 = vpop.f32.mrb[32].mxu1 }
 0x2b6   :  { %v1615_v5 = vadd.f32 %v6645_v63, %v1542_v3  ;;  %v1544_v29 = vpop.f32.mrb[33].mxu0  ;;  %v1587_v8 = vpop.f32.mrb[33].mxu1 }
 0x2b7   :  { %v1616_v59 = vadd.f32 %v6649_v2, %v1544_v29  ;;  %v1546_v58 = vpop.f32.mrb[34].mxu0  ;;  %v1589_v57 = vpop.f32.mrb[34].mxu1  ;;  %v8336_v29 = vsub.s32 2, %v6431_v6 }
 0x2b8   :  { %v4631_v56 = vmul.f32 -1.442695, %v1615_v5  ;;  %v1619_v55 = vadd.f32 %v6645_v63, %v1546_v58  ;;  %v1548_v54 = vpop.f32.mrb[35].mxu0  ;;  %v1591_v62 = vpop.f32.mrb[35].mxu1  ;;  %v1618_v5 = vadd.f32 %v6656_v1, %v1587_v8 }
 0x2b9   :  { %v4633_v53 = vmul.f32 -1.442695, %v1616_v59  ;;  %v1620_v50 = vadd.f32 %v6649_v2, %v1548_v54  ;;  %v6661_v48 = vrot.slane %v777_v60, %v8336_v29  ;;  %v1622_v58 = vadd.f32 %v6656_v1, %v1591_v62 }
 0x2ba   :  { %5244 = vpow2.f32 %v4631_v56  ;;  %v4632_v3 = vmul.f32 -1.442695, %v1619_v55  ;;  %v4635_v51 = vmul.f32 -1.442695, %v1618_v5 }
 0x2bb   :  { %5246 = vpow2.f32 %v4633_v53  ;;  %v4634_v49 = vmul.f32 -1.442695, %v1620_v50  ;;  %8337 = vst [vmem:[#allocation20_spill] sm:$0xff] %v6661_v48  ;;  %v1617_v59 = vadd.f32 %v6661_v48, %v1585_v4  ;;  %v4636_v63 = vmul.f32 -1.442695, %v1622_v58 }
 0x2bc   :  { %5248 = vpow2.f32 %v4632_v3  ;;  %v1621_v50 = vadd.f32 %v6661_v48, %v1589_v57 }
 0x2bd   :  { %5250 = vpow2.f32 %v4634_v49 }
 0x2be   :  { %5252 = vtanh.f32 %v1617_v59 }
 0x2bf   :  { %5254 = vpow2.f32 %v4635_v51 }
 0x2c0   :  { %5256 = vpow2.f32 %v4636_v63 }
 0x2c4   :  { %v5245_v47 = vpop.eup %5244 }
 0x2c5   :  { %v5247_v54 = vpop.eup %5246  ;;  %v1629_v55 = vadd.f32 1.0, %v5245_v47 }
 0x2c6   :  { %v1641_v6 = vadd.f32 1.0, %v5247_v54  ;;  %v5249_v53 = vpop.eup %5248 }
 0x2c7   :  { %5258 = vrcp.f32 %v1629_v55  ;;  %v1630_v56 = vadd.f32 1.0, %v5249_v53  ;;  %v5251_v60 = vpop.eup %5250  ;;  %v8338_v53 = vld [vmem:[#allocation42_spill] sm:$0xff] }
 0x2c8   :  { %5260 = vrcp.f32 %v1641_v6  ;;  %v1642_v49 = vadd.f32 1.0, %v5251_v60  ;;  %v5253_v4 = vpop.eup %5252 }
 0x2c9   :  { %5262 = vtanh.f32 %v1621_v50  ;;  %v5255_v8 = vpop.eup %5254 }
 0x2ca   :  { %5264 = vrcp.f32 %v1630_v56  ;;  %v5257_v62 = vpop.eup %5256  ;;  %v1655_v57 = vadd.f32 1.0, %v5255_v8 }
 0x2cb   :  { %5266 = vrcp.f32 %v1642_v49  ;;  %v1656_v63 = vadd.f32 1.0, %v5257_v62 }
 0x2cc   :  { %5268 = vrcp.f32 %v1655_v57 }
 0x2cd   :  { %5270 = vrcp.f32 %v1656_v63 }
 0x2d1   :  { %v5259_v3 = vpop.eup %5258 }
 0x2d2   :  { %v5261_v29 = vpop.eup %5260  ;;  %v1663_v47 = vmul.f32 %v5259_v3, %v5253_v4 }
 0x2d3   :  { %v5263_v5 = vpop.eup %5262  ;;  %v1661_v58 = vmul.f32 0.0, %v5261_v29 }
 0x2d4   :  { %v5265_v59 = vpop.eup %5264 }
 0x2d5   :  { %v6667_v51 = vadd.f32 %v1663_v47, %v1661_v58  ;;  %v1664_v54 = vmul.f32 %v5265_v59, %v5263_v5  ;;  %v1716_v55 = vpop.f32.mrb[4].mxu0  ;;  %v1759_v6 = vpop.f32.mrb[4].mxu1 }
 0x2d6   :  { %v5267_v50 = vpop.eup %5266  ;;  %v4813_v56 = vadd.f32 %v1716_v55, %v8338_v53  ;;  %v1718_v60 = vpop.f32.mrb[5].mxu0 }
 0x2d7   :  { %v1761_v49 = vpop.f32.mrb[5].mxu1  ;;  %v1662_v48 = vmul.f32 0.0, %v5267_v50  ;;  %v4814_v1 = vadd.f32 %v1718_v60, %v6444_v43  ;;  %v1720_v4 = vpop.f32.mrb[6].mxu0  ;;  %5272 = vtanh.f32 %v6667_v51 }
 0x2d8   :  { %v1763_v3 = vpop.f32.mrb[6].mxu1  ;;  %v4637_v8 = vmul.f32 -1.442695, %v4813_v56  ;;  %v4815_v62 = vadd.f32 %v1720_v4, %v8338_v53  ;;  %v1722_v29 = vpop.f32.mrb[7].mxu0  ;;  %v4846_v63 = vadd.f32 %v1761_v49, %v6453_v23  ;;  %v8339_v56 = vld [vmem:[#allocation44_spill] sm:$0xff] }
 0x2d9   :  { %v1765_v47 = vpop.f32.mrb[7].mxu1  ;;  %v6673_v5 = vadd.f32 %v1664_v54, %v1662_v48  ;;  %v4639_v58 = vmul.f32 -1.442695, %v4814_v1  ;;  %v4816_v59 = vadd.f32 %v1722_v29, %v6444_v43  ;;  %v5269_v50 = vpop.eup %5268  ;;  %v4845_v60 = vadd.f32 %v1759_v6, %v8339_v56 }
 0x2da   :  { %5274 = vpow2.f32 %v4637_v8  ;;  %v4638_v57 = vmul.f32 -1.442695, %v4815_v62  ;;  %v5271_v4 = vpop.eup %5270  ;;  %v4641_v53 = vmul.f32 -1.442695, %v4846_v63  ;;  %v4848_v48 = vadd.f32 %v1765_v47, %v6453_v23 }
 0x2db   :  { %5276 = vtanh.f32 %v6673_v5  ;;  %v4640_v55 = vmul.f32 -1.442695, %v4816_v59  ;;  %v4847_v8 = vadd.f32 %v1763_v3, %v8339_v56 }
 0x2dc   :  { %5278 = vpow2.f32 %v4639_v58  ;;  %v4642_v59 = vmul.f32 -1.442695, %v4848_v48 }
 0x2dd   :  { %5280 = vpow2.f32 %v4638_v57 }
 0x2de   :  { %5282 = vpow2.f32 %v4640_v55 }
 0x2df   :  { %5284 = vtanh.f32 %v4845_v60 }
 0x2e0   :  { %5286 = vpow2.f32 %v4641_v53 }
 0x2e1   :  { %v5273_v1 = vpop.eup %5272 }
 0x2e2   :  { %v1669_v49 = vmul.f32 %v5273_v1, %v5269_v50 }
 0x2e4   :  { %v5275_v54 = vpop.eup %5274 }
 0x2e5   :  { %v5277_v62 = vpop.eup %5276  ;;  %v1783_v29 = vadd.f32 1.0, %v5275_v54 }
 0x2e6   :  { %v5279_v58 = vpop.eup %5278  ;;  %v1670_v57 = vmul.f32 %v5277_v62, %v5271_v4 }
 0x2e7   :  { %5288 = vrcp.f32 %v1783_v29  ;;  %v1795_v55 = vadd.f32 1.0, %v5279_v58  ;;  %v5281_v43 = vpop.eup %5280 }
 0x2e8   :  { %5290 = vtanh.f32 %v4847_v8  ;;  %v6681_v6 = vpack.c.bf16 %v1670_v57, %v1669_v49  ;;  %v1784_v47 = vadd.f32 1.0, %v5281_v43  ;;  %v5283_v63 = vpop.eup %5282 }
 0x2e9   :  { %5292 = vrcp.f32 %v1795_v55  ;;  %v1796_v3 = vadd.f32 1.0, %v5283_v63  ;;  %v5285_v54 = vpop.eup %5284 }
 0x2ea   :  { %5294 = vpow2.f32 %v4642_v59  ;;  %v5287_v60 = vpop.eup %5286 }
 0x2eb   :  { %5296 = vrcp.f32 %v1784_v47  ;;  %v1809_v8 = vadd.f32 1.0, %v5287_v60  ;;  %v8341_v60 = vld [vmem:[#allocation46_spill] sm:$0xff] }
 0x2ec   :  { %5298 = vrcp.f32 %v1796_v3 }
 0x2ed   :  { %5300 = vrcp.f32 %v1809_v8  ;;  %v8354_v8 = vld [vmem:[#allocation59_spill] sm:$0xff] }
 0x2f1   :  { %v5289_v56 = vpop.eup %5288 }
 0x2f2   :  { %v5291_v53 = vpop.eup %5290  ;;  %v1817_v48 = vmul.f32 %v5289_v56, %v5285_v54 }
 0x2f3   :  { %v5293_v50 = vpop.eup %5292 }
 0x2f4   :  { %v5295_v4 = vpop.eup %5294  ;;  %v1815_v1 = vmul.f32 %v5293_v50, %v6464_v10  ;;  %v8348_v50 = vld [vmem:[#allocation53_spill] sm:$0xff] }
 0x2f5   :  { %v5297_v62 = vpop.eup %5296  ;;  %v1810_v49 = vadd.f32 1.0, %v5295_v4  ;;  %v8351_v4 = vld [vmem:[#allocation56_spill] sm:$0xff] }
 0x2f6   :  { %v6684_v29 = vadd.f32 %v1817_v48, %v1815_v1  ;;  %v1818_v58 = vmul.f32 %v5297_v62, %v5291_v53  ;;  %v5299_v43 = vpop.eup %5298  ;;  %v8342_v53 = vld [vmem:[#allocation47_spill] sm:$0xff]  ;;  %v8347_v48 = vld [vmem:[#allocation52_spill] sm:$0xff]  ;;  %v8352_v1 = vld [vmem:[#allocation57_spill] sm:$0xff] }
 0x2f7   :  { %v1816_v59 = vmul.f32 %v5299_v43, %v6467_v27  ;;  %v5301_v56 = vpop.eup %5300  ;;  %v8340_v27 = vld [vmem:[#allocation45_spill] sm:$0xff]  ;;  %v8353_v62 = vld [vmem:[#allocation58_spill] sm:$0xff] }
 0x2f8   :  { %5302 = vtanh.f32 %v6684_v29  ;;  %v6727_v43 = vld [vmem:[#allocation9 + $0x4] ss:$16 sps:$4 sm:$0xff]  }
 0x2f9   :  { %v6688_v57 = vadd.f32 %v1818_v58, %v1816_v59  ;;  %5304 = vrcp.f32 %v1810_v49  ;;  %v8355_v58 = vld [vmem:[#allocation60_spill] sm:$0xff]  ;;  %v6730_v49 = vld [vmem:[#allocation9 + $0xc] ss:$16 sps:$4 sm:$0xff]  }
 0x2fa   :  { %v6735_v59 = vld [vmem:[#allocation9] ss:$16 sps:$4 sm:$0xff]  }
 0x2fb   :  { %5306 = vtanh.f32 %v6688_v57 }
 0x302   :  { %v5303_v55 = vpop.eup %5302 }
 0x303   :  { %v5305_v10 = vpop.eup %5304  ;;  %v1823_v63 = vmul.f32 %v5303_v55, %v5301_v56  ;;  %v6738_v56 = vld [vmem:[#allocation9 + $0x8] ss:$16 sps:$4 sm:$0xff]   ;;  %v6741_v55 = vld [vmem:[#allocation9 + $0x24] ss:$16 sps:$4 sm:$0xff]  }
 0x305   :  { %v5307_v47 = vpop.eup %5306 }
 0x306   :  { %v1824_v3 = vmul.f32 %v5307_v47, %v5305_v10  ;;  %v6744_v10 = vld [vmem:[#allocation9 + $0x2c] ss:$16 sps:$4 sm:$0xff]   ;;  %v6752_v47 = vld [vmem:[#allocation9 + $0x28] ss:$16 sps:$4 sm:$0xff]  }
 0x308   :  { %v6691_v54 = vpack.c.bf16 %v1824_v3, %v1823_v63  ;;  %v6755_v63 = vld [vmem:[#allocation9 + $0x44] ss:$16 sps:$4 sm:$0xff]   ;;  %v6758_v3 = vld [vmem:[#allocation9 + $0x4c] ss:$16 sps:$4 sm:$0xff]  }
 0x30a   :  { %1859 = vmatmul.mubr.bf16.vlgmr.msra.gmra.mrb[36].mxu0 %v6691_v54  ;;  %1902 = vmatmul.mubr.bf16.vlgmr.msra.gmra.mrb[36].mxu1 %v6691_v54 }
 0x30b   :  { %1913 = vmatpush1.bf16.msra.mxu0 %v6470_v61  ;;  %1956 = vmatpush1.bf16.msra.mxu1 %v6472_v28  ;;  %v8343_v61 = vld [vmem:[#allocation48_spill] sm:$0xff]  ;;  %v8344_v28 = vld [vmem:[#allocation49_spill] sm:$0xff] }
 0x30c   :  { %1914 = vmatprep.subr.bf16.mxu0 %v6476_v25  ;;  %1957 = vmatprep.subr.bf16.mxu1 %v6478_v30  ;;  %v8345_v25 = vld [vmem:[#allocation50_spill] sm:$0xff]  ;;  %v8346_v30 = vld [vmem:[#allocation51_spill] sm:$0xff] }
 0x30d   :  { %1944 = vmatprep.mubr.bf16.mxu0 %v8291_v52  ;;  %1987 = vmatprep.mubr.bf16.mxu1 %v8291_v52 }
 0x30f   :  { %1915 = vmatpush1.bf16.msra.mxu0 %v6484_v35  ;;  %1958 = vmatpush1.bf16.msra.mxu1 %v6486_v7  ;;  %v8349_v35 = vld [vmem:[#allocation54_spill] sm:$0xff]  ;;  %v8350_v7 = vld [vmem:[#allocation55_spill] sm:$0xff] }
 0x310   :  { %1916 = vmatprep.subr.bf16.mxu0 %v8340_v27  ;;  %1959 = vmatprep.subr.bf16.mxu1 %v8341_v60  ;;  %v6761_v27 = vld [vmem:[#allocation9 + $0x40] ss:$16 sps:$4 sm:$0xff]   ;;  %v6764_v60 = vld [vmem:[#allocation9 + $0x48] ss:$16 sps:$4 sm:$0xff]  }
 0x313   :  { %1917 = vmatpush1.bf16.msra.mxu0 %v8342_v53  ;;  %1960 = vmatpush1.bf16.msra.mxu1 %v8343_v61  ;;  %v6767_v53 = vld [vmem:[#allocation9 + $0x64] ss:$16 sps:$4 sm:$0xff]   ;;  %v6770_v61 = vld [vmem:[#allocation9 + $0x6c] ss:$16 sps:$4 sm:$0xff]  }
 0x314   :  { %1918 = vmatprep.subr.bf16.mxu0 %v8344_v28  ;;  %1961 = vmatprep.subr.bf16.mxu1 %v8345_v25  ;;  %v6773_v28 = vld [vmem:[#allocation9 + $0x60] ss:$16 sps:$4 sm:$0xff]   ;;  %v6776_v25 = vld [vmem:[#allocation9 + $0x68] ss:$16 sps:$4 sm:$0xff]  }
 0x317   :  { %1919 = vmatpush1.bf16.msra.mxu0 %v8346_v30  ;;  %1962 = vmatpush1.bf16.msra.mxu1 %v8347_v48  ;;  %v6779_v30 = vld [vmem:[#allocation9 + $0x84] ss:$16 sps:$4 sm:$0xff]   ;;  %v6782_v48 = vld [vmem:[#allocation9 + $0x8c] ss:$16 sps:$4 sm:$0xff]  }
 0x318   :  { %1920 = vmatprep.subr.bf16.mxu0 %v8348_v50  ;;  %1963 = vmatprep.subr.bf16.mxu1 %v8349_v35  ;;  %8356 = vst [vmem:[#allocation21_spill] sm:$0xff] %v6779_v30  ;;  %8357 = vst [vmem:[#allocation22_spill] sm:$0xff] %v6782_v48  ;;  %v6785_v50 = vld [vmem:[#allocation9 + $0x80] ss:$16 sps:$4 sm:$0xff]   ;;  %v6788_v35 = vld [vmem:[#allocation9 + $0x88] ss:$16 sps:$4 sm:$0xff]  }
 0x319   :  { %8358 = vst [vmem:[#allocation23_spill] sm:$0xff] %v6785_v50  ;;  %8359 = vst [vmem:[#allocation24_spill] sm:$0xff] %v6788_v35 }
 0x31b   :  { %1921 = vmatpush1.bf16.msra.mxu0 %v8350_v7  ;;  %1964 = vmatpush1.bf16.msra.mxu1 %v8351_v4  ;;  %v6791_v7 = vld [vmem:[#allocation9 + $0xa4] ss:$16 sps:$4 sm:$0xff]   ;;  %v6794_v4 = vld [vmem:[#allocation9 + $0xac] ss:$16 sps:$4 sm:$0xff]  }
 0x31c   :  { %1922 = vmatprep.subr.bf16.mxu0 %v8352_v1  ;;  %1965 = vmatprep.subr.bf16.mxu1 %v8353_v62  ;;  %8360 = vst [vmem:[#allocation25_spill] sm:$0xff] %v6791_v7  ;;  %8361 = vst [vmem:[#allocation26_spill] sm:$0xff] %v6794_v4 }
 0x31f   :  { %1923 = vmatpush1.bf16.msra.mxu0 %v8354_v8  ;;  %1966 = vmatpush1.bf16.msra.mxu1 %v6536_v21 }
 0x320   :  { %1924 = vmatprep.subr.bf16.mxu0 %v6540_v32  ;;  %1967 = vmatprep.subr.bf16.mxu1 %v8355_v58 }
 0x323   :  { %1925 = vmatpush1.bf16.msra.mxu0 %v6546_v26  ;;  %1968 = vmatpush1.bf16.msra.mxu1 %v6548_v24 }
 0x324   :  { %1926 = vmatprep.subr.bf16.mxu0 %v6552_v9  ;;  %1969 = vmatprep.subr.bf16.mxu1 %v6554_v22 }
 0x327   :  { %1927 = vmatpush1.bf16.msra.mxu0 %v6558_v31  ;;  %1970 = vmatpush1.bf16.msra.mxu1 %v6560_v0 }
 0x328   :  { %2065 = vmatprep.subr.bf16.mxu0 %v6727_v43  ;;  %2108 = vmatprep.subr.bf16.mxu1 %v6730_v49 }
 0x32a   :  { %1945 = vmatmul.mubr.bf16.vlgmr.msra.gmra.mrb[36].mxu0 %v6681_v6  ;;  %1988 = vmatmul.mubr.bf16.vlgmr.msra.gmra.mrb[36].mxu1 %v6681_v6  ;;  %v6749_v6 = vld [vmem:[#allocation9 + $0x20] ss:$16 sps:$4 sm:$0xff]  }
 0x32b   :  { %2066 = vmatpush1.bf16.msra.mxu0 %v6735_v59  ;;  %2109 = vmatpush1.bf16.msra.mxu1 %v6738_v56 }
 0x32c   :  { %2067 = vmatprep.subr.bf16.mxu0 %v6741_v55  ;;  %2110 = vmatprep.subr.bf16.mxu1 %v6744_v10 }
 0x32d   :  { %2097 = vmatprep.mubr.bf16.mxu0 %v8291_v52  ;;  %2140 = vmatprep.mubr.bf16.mxu1 %v8291_v52 }
 0x32f   :  { %2068 = vmatpush1.bf16.msra.mxu0 %v6749_v6  ;;  %2111 = vmatpush1.bf16.msra.mxu1 %v6752_v47 }
 0x330   :  { %2069 = vmatprep.subr.bf16.mxu0 %v6755_v63  ;;  %2112 = vmatprep.subr.bf16.mxu1 %v6758_v3 }
 0x333   :  { %2070 = vmatpush1.bf16.msra.mxu0 %v6761_v27  ;;  %2113 = vmatpush1.bf16.msra.mxu1 %v6764_v60 }
 0x334   :  { %2071 = vmatprep.subr.bf16.mxu0 %v6767_v53  ;;  %2114 = vmatprep.subr.bf16.mxu1 %v6770_v61 }
 0x337   :  { %2072 = vmatpush1.bf16.msra.mxu0 %v6773_v28  ;;  %2115 = vmatpush1.bf16.msra.mxu1 %v6776_v25 }
 0x338   :  { %2073 = vmatprep.subr.bf16.mxu0 %v6779_v30  ;;  %2116 = vmatprep.subr.bf16.mxu1 %v6782_v48  ;;  %v6797_v30 = vld [vmem:[#allocation9 + $0xa0] ss:$16 sps:$4 sm:$0xff]   ;;  %v6800_v48 = vld [vmem:[#allocation9 + $0xa8] ss:$16 sps:$4 sm:$0xff]  }
 0x339   :  { %8362 = vst [vmem:[#allocation27_spill] sm:$0xff] %v6797_v30  ;;  %8363 = vst [vmem:[#allocation28_spill] sm:$0xff] %v6800_v48 }
 0x33b   :  { %2074 = vmatpush1.bf16.msra.mxu0 %v6785_v50  ;;  %2117 = vmatpush1.bf16.msra.mxu1 %v6788_v35  ;;  %v6803_v50 = vld [vmem:[#allocation9 + $0xc4] ss:$16 sps:$4 sm:$0xff]   ;;  %v6806_v35 = vld [vmem:[#allocation9 + $0xcc] ss:$16 sps:$4 sm:$0xff]  }
 0x33c   :  { %2075 = vmatprep.subr.bf16.mxu0 %v6791_v7  ;;  %2118 = vmatprep.subr.bf16.mxu1 %v6794_v4  ;;  %8364 = vst [vmem:[#allocation29_spill] sm:$0xff] %v6803_v50  ;;  %8365 = vst [vmem:[#allocation45_spill] sm:$0xff] %v6806_v35  ;;  %v6809_v7 = vld [vmem:[#allocation9 + $0xc0] ss:$16 sps:$4 sm:$0xff]   ;;  %v6812_v4 = vld [vmem:[#allocation9 + $0xc8] ss:$16 sps:$4 sm:$0xff]  }
 0x33d   :  { %8366 = vst [vmem:[#allocation46_spill] sm:$0xff] %v6809_v7  ;;  %8367 = vst [vmem:[#allocation47_spill] sm:$0xff] %v6812_v4 }
 0x33f   :  { %2076 = vmatpush1.bf16.msra.mxu0 %v6797_v30  ;;  %2119 = vmatpush1.bf16.msra.mxu1 %v6800_v48  ;;  %v6815_v30 = vld [vmem:[#allocation9 + $0xe4] ss:$16 sps:$4 sm:$0xff]   ;;  %v6818_v48 = vld [vmem:[#allocation9 + $0xec] ss:$16 sps:$4 sm:$0xff]  }
 0x340   :  { %2077 = vmatprep.subr.bf16.mxu0 %v6803_v50  ;;  %2120 = vmatprep.subr.bf16.mxu1 %v6806_v35  ;;  %8368 = vst [vmem:[#allocation48_spill] sm:$0xff] %v6815_v30  ;;  %8369 = vst [vmem:[#allocation49_spill] sm:$0xff] %v6818_v48  ;;  %v6821_v50 = vld [vmem:[#allocation9 + $0xe0] ss:$16 sps:$4 sm:$0xff]   ;;  %v6824_v35 = vld [vmem:[#allocation9 + $0xe8] ss:$16 sps:$4 sm:$0xff]  }
 0x341   :  { %8370 = vst [vmem:[#allocation50_spill] sm:$0xff] %v6821_v50  ;;  %8371 = vst [vmem:[#allocation51_spill] sm:$0xff] %v6824_v35 }
 0x343   :  { %2078 = vmatpush1.bf16.msra.mxu0 %v6809_v7  ;;  %2121 = vmatpush1.bf16.msra.mxu1 %v6812_v4 }
 0x344   :  { %2079 = vmatprep.subr.bf16.mxu0 %v6815_v30  ;;  %2122 = vmatprep.subr.bf16.mxu1 %v6818_v48 }
 0x347   :  { %2080 = vmatpush1.bf16.msra.mxu0 %v6821_v50  ;;  %2123 = vmatpush1.bf16.msra.mxu1 %v6824_v35 }
 0x348   :  { %2209 = vmatprep.subr.bf16.mxu0 %v6329_v11  ;;  %2252 = vmatprep.subr.bf16.mxu1 %v6331_v12  ;;  %v8372_v11 = vld [vmem:[#allocation30_spill] sm:$0xff]  ;;  %v8373_v12 = vld [vmem:[#allocation31_spill] sm:$0xff] }
 0x34a   :  { %2098 = vmatmul.mubr.bf16.vlgmr.msra.gmra.mrb[8].mxu0 %v6691_v54  ;;  %2141 = vmatmul.mubr.bf16.vlgmr.msra.gmra.mrb[8].mxu1 %v6691_v54 }
 0x34b   :  { %2210 = vmatpush1.bf16.msra.mxu0 %v6333_v13  ;;  %2253 = vmatpush1.bf16.msra.mxu1 %v6335_v14  ;;  %v8374_v13 = vld [vmem:[#allocation32_spill] sm:$0xff]  ;;  %v8375_v14 = vld [vmem:[#allocation33_spill] sm:$0xff] }
 0x34c   :  { %2211 = vmatprep.subr.bf16.mxu0 %v6341_v15  ;;  %2254 = vmatprep.subr.bf16.mxu1 %v6343_v16  ;;  %v8376_v15 = vld [vmem:[#allocation34_spill] sm:$0xff]  ;;  %v8377_v16 = vld [vmem:[#allocation35_spill] sm:$0xff] }
 0x34d   :  { %2241 = vmatprep.mubr.bf16.mxu0 %v8291_v52  ;;  %2284 = vmatprep.mubr.bf16.mxu1 %v8291_v52 }
 0x34f   :  { %2212 = vmatpush1.bf16.msra.mxu0 %v6345_v17  ;;  %2255 = vmatpush1.bf16.msra.mxu1 %v6347_v18  ;;  %v8378_v17 = vld [vmem:[#allocation36_spill] sm:$0xff]  ;;  %v8379_v18 = vld [vmem:[#allocation37_spill] sm:$0xff] }
 0x350   :  { %2213 = vmatprep.subr.bf16.mxu0 %v6353_v19  ;;  %2256 = vmatprep.subr.bf16.mxu1 %v6355_v20  ;;  %v8380_v19 = vld [vmem:[#allocation38_spill] sm:$0xff]  ;;  %v8381_v20 = vld [vmem:[#allocation39_spill] sm:$0xff] }
 0x353   :  { %2214 = vmatpush1.bf16.msra.mxu0 %v8307_v33  ;;  %2257 = vmatpush1.bf16.msra.mxu1 %v8308_v34  ;;  %v8382_v33 = vld [vmem:[#allocation40_spill] sm:$0xff]  ;;  %v8383_v34 = vld [vmem:[#allocation41_spill] sm:$0xff] }
 0x354   :  { %2215 = vmatprep.subr.bf16.mxu0 %v8309_v36  ;;  %2258 = vmatprep.subr.bf16.mxu1 %v8310_v37 }
 0x357   :  { %2216 = vmatpush1.bf16.msra.mxu0 %v8311_v38  ;;  %2259 = vmatpush1.bf16.msra.mxu1 %v8312_v39  ;;  %v8384_v38 = vld [vmem:[#allocation18_spill] sm:$0xff] }
 0x358   :  { %2217 = vmatprep.subr.bf16.mxu0 %v8313_v40  ;;  %2260 = vmatprep.subr.bf16.mxu1 %v8314_v41 }
 0x35b   :  { %2218 = vmatpush1.bf16.msra.mxu0 %v8315_v42  ;;  %2261 = vmatpush1.bf16.msra.mxu1 %v8316_v44 }
 0x35c   :  { %2219 = vmatprep.subr.bf16.mxu0 %v8317_v45  ;;  %2262 = vmatprep.subr.bf16.mxu1 %v8318_v46 }
 0x35f   :  { %2220 = vmatpush1.bf16.msra.mxu0 %v8372_v11  ;;  %2263 = vmatpush1.bf16.msra.mxu1 %v8373_v12 }
 0x360   :  { %2221 = vmatprep.subr.bf16.mxu0 %v8374_v13  ;;  %2264 = vmatprep.subr.bf16.mxu1 %v8375_v14 }
 0x363   :  { %2222 = vmatpush1.bf16.msra.mxu0 %v8376_v15  ;;  %2265 = vmatpush1.bf16.msra.mxu1 %v8377_v16 }
 0x364   :  { %2223 = vmatprep.subr.bf16.mxu0 %v8378_v17  ;;  %2266 = vmatprep.subr.bf16.mxu1 %v8379_v18  ;;  %v8385_v17 = vld [vmem:[#allocation19_spill] sm:$0xff] }
 0x367   :  { %2224 = vmatpush1.bf16.msra.mxu0 %v8380_v19  ;;  %2267 = vmatpush1.bf16.msra.mxu1 %v8381_v20  ;;  %v8386_v20 = vld [vmem:[#allocation20_spill] sm:$0xff] }
 0x368   :  { %2295 = vmatprep.subr.bf16.mxu0 %v8382_v33  ;;  %2338 = vmatprep.subr.bf16.mxu1 %v8383_v34 }
 0x3fd   :  { %v1946_v36 = vpop.f32.mrb[36].mxu0  ;;  %v1989_v37 = vpop.f32.mrb[36].mxu1 }
 0x3fe   :  { %v1998_v39 = vadd.f32 %v1946_v36, %v8384_v38  ;;  %v1948_v40 = vpop.f32.mrb[37].mxu0  ;;  %v1991_v41 = vpop.f32.mrb[37].mxu1  ;;  %v2000_v33 = vadd.f32 %v1989_v37, %v8386_v20 }
 0x3ff   :  { %v1999_v42 = vadd.f32 %v1948_v40, %v6649_v2  ;;  %v1950_v44 = vpop.f32.mrb[38].mxu0  ;;  %v1993_v45 = vpop.f32.mrb[38].mxu1  ;;  %v2001_v18 = vadd.f32 %v1991_v41, %v8385_v17 }
 0x400   :  { %v4643_v46 = vmul.f32 -1.442695, %v1998_v39  ;;  %v2002_v54 = vadd.f32 %v1950_v44, %v8384_v38  ;;  %v1952_v11 = vpop.f32.mrb[39].mxu0  ;;  %v1995_v12 = vpop.f32.mrb[39].mxu1  ;;  %v2004_v44 = vadd.f32 %v1993_v45, %v8386_v20 }
 0x401   :  { %v4645_v13 = vmul.f32 -1.442695, %v1999_v42  ;;  %v2003_v14 = vadd.f32 %v1952_v11, %v6649_v2  ;;  %v2005_v19 = vadd.f32 %v1995_v12, %v8385_v17  ;;  %v4647_v34 = vmul.f32 -1.442695, %v2001_v18 }
 0x402   :  { %5308 = vpow2.f32 %v4643_v46  ;;  %v4644_v15 = vmul.f32 -1.442695, %v2002_v54 }
 0x403   :  { %5310 = vpow2.f32 %v4645_v13  ;;  %v4646_v16 = vmul.f32 -1.442695, %v2003_v14  ;;  %v4648_v36 = vmul.f32 -1.442695, %v2005_v19 }
 0x404   :  { %5312 = vpow2.f32 %v4644_v15 }
 0x405   :  { %5314 = vpow2.f32 %v4646_v16 }
 0x406   :  { %5316 = vtanh.f32 %v2000_v33 }
 0x407   :  { %5318 = vpow2.f32 %v4647_v34 }
 0x408   :  { %5320 = vpow2.f32 %v4648_v36 }
 0x40c   :  { %v5309_v39 = vpop.eup %5308 }
 0x40d   :  { %v5311_v40 = vpop.eup %5310  ;;  %v2012_v42 = vadd.f32 1.0, %v5309_v39 }
 0x40e   :  { %v2024_v46 = vadd.f32 1.0, %v5311_v40  ;;  %v5313_v54 = vpop.eup %5312 }
 0x40f   :  { %5322 = vrcp.f32 %v2012_v42  ;;  %v2013_v41 = vadd.f32 1.0, %v5313_v54  ;;  %v5315_v11 = vpop.eup %5314  ;;  %v8387_v54 = vld [vmem:[#allocation42_spill] sm:$0xff] }
 0x410   :  { %5324 = vrcp.f32 %v2024_v46  ;;  %v2025_v12 = vadd.f32 1.0, %v5315_v11  ;;  %v5317_v37 = vpop.eup %5316 }
 0x411   :  { %5326 = vtanh.f32 %v2004_v44  ;;  %v5319_v13 = vpop.eup %5318 }
 0x412   :  { %5328 = vrcp.f32 %v2013_v41  ;;  %v5321_v14 = vpop.eup %5320  ;;  %v2038_v33 = vadd.f32 1.0, %v5319_v13 }
 0x413   :  { %5330 = vrcp.f32 %v2025_v12  ;;  %v2039_v36 = vadd.f32 1.0, %v5321_v14 }
 0x414   :  { %5332 = vrcp.f32 %v2038_v33 }
 0x415   :  { %5334 = vrcp.f32 %v2039_v36 }
 0x419   :  { %v5323_v15 = vpop.eup %5322 }
 0x41a   :  { %v5325_v16 = vpop.eup %5324  ;;  %v2046_v18 = vmul.f32 %v5323_v15, %v5317_v37  ;;  %v8388_v37 = vld [vmem:[#allocation43_spill] sm:$0xff] }
 0x41b   :  { %v5327_v19 = vpop.eup %5326  ;;  %v2044_v45 = vmul.f32 %v5325_v16, %v6667_v51 }
 0x41c   :  { %v5329_v34 = vpop.eup %5328 }
 0x41d   :  { %v6874_v39 = vadd.f32 %v2046_v18, %v2044_v45  ;;  %v2047_v40 = vmul.f32 %v5329_v34, %v5327_v19  ;;  %v2099_v42 = vpop.f32.mrb[8].mxu0  ;;  %v2142_v44 = vpop.f32.mrb[8].mxu1 }
 0x41e   :  { %v5331_v46 = vpop.eup %5330  ;;  %v4817_v41 = vadd.f32 %v2099_v42, %v8387_v54  ;;  %v2101_v11 = vpop.f32.mrb[9].mxu0  ;;  %v8389_v42 = vld [vmem:[#allocation44_spill] sm:$0xff] }
 0x41f   :  { %v2144_v12 = vpop.f32.mrb[9].mxu1  ;;  %v2045_v20 = vmul.f32 %v5331_v46, %v6673_v5  ;;  %v4818_v15 = vadd.f32 %v2101_v11, %v8388_v37  ;;  %v2103_v17 = vpop.f32.mrb[10].mxu0  ;;  %5336 = vtanh.f32 %v6874_v39  ;;  %v4849_v46 = vadd.f32 %v2142_v44, %v8389_v42 }
 0x420   :  { %v2146_v51 = vpop.f32.mrb[10].mxu1  ;;  %v4649_v13 = vmul.f32 -1.442695, %v4817_v41  ;;  %v4819_v14 = vadd.f32 %v2103_v17, %v8387_v54  ;;  %v2105_v16 = vpop.f32.mrb[11].mxu0  ;;  %v4850_v36 = vadd.f32 %v2144_v12, %v6453_v23 }
 0x421   :  { %v2148_v18 = vpop.f32.mrb[11].mxu1  ;;  %v6881_v19 = vadd.f32 %v2047_v40, %v2045_v20  ;;  %v4651_v45 = vmul.f32 -1.442695, %v4818_v15  ;;  %v4820_v34 = vadd.f32 %v2105_v16, %v8388_v37  ;;  %v5333_v17 = vpop.eup %5332 }
 0x422   :  { %5338 = vpow2.f32 %v4649_v13  ;;  %v4650_v33 = vmul.f32 -1.442695, %v4819_v14  ;;  %v5335_v41 = vpop.eup %5334  ;;  %v4653_v11 = vmul.f32 -1.442695, %v4850_v36  ;;  %v4852_v20 = vadd.f32 %v2148_v18, %v6453_v23 }
 0x423   :  { %5340 = vtanh.f32 %v6881_v19  ;;  %v4652_v5 = vmul.f32 -1.442695, %v4820_v34  ;;  %v4851_v13 = vadd.f32 %v2146_v51, %v8389_v42 }
 0x424   :  { %5342 = vpow2.f32 %v4651_v45  ;;  %v4654_v34 = vmul.f32 -1.442695, %v4852_v20 }
 0x425   :  { %5344 = vpow2.f32 %v4650_v33 }
 0x426   :  { %5346 = vpow2.f32 %v4652_v5 }
 0x427   :  { %5348 = vtanh.f32 %v4849_v46 }
 0x428   :  { %5350 = vpow2.f32 %v4653_v11 }
 0x429   :  { %v5337_v40 = vpop.eup %5336 }
 0x42a   :  { %v2052_v12 = vmul.f32 %v5337_v40, %v5333_v17 }
 0x42c   :  { %v5339_v15 = vpop.eup %5338 }
 0x42d   :  { %v5341_v14 = vpop.eup %5340  ;;  %v2166_v16 = vadd.f32 1.0, %v5339_v15 }
 0x42e   :  { %v5343_v45 = vpop.eup %5342  ;;  %v2053_v33 = vmul.f32 %v5341_v14, %v5335_v41 }
 0x42f   :  { %5352 = vrcp.f32 %v2166_v16  ;;  %v2178_v5 = vadd.f32 1.0, %v5343_v45  ;;  %v5345_v37 = vpop.eup %5344 }
 0x430   :  { %5354 = vtanh.f32 %v4851_v13  ;;  %v6889_v44 = vpack.c.bf16 %v2053_v33, %v2052_v12  ;;  %v2167_v18 = vadd.f32 1.0, %v5345_v37  ;;  %v5347_v36 = vpop.eup %5346 }
 0x431   :  { %5356 = vrcp.f32 %v2178_v5  ;;  %v2179_v51 = vadd.f32 1.0, %v5347_v36  ;;  %v5349_v15 = vpop.eup %5348 }
 0x432   :  { %5358 = vpow2.f32 %v4654_v34  ;;  %v5351_v46 = vpop.eup %5350 }
 0x433   :  { %5360 = vrcp.f32 %v2167_v18  ;;  %v2192_v13 = vadd.f32 1.0, %v5351_v46  ;;  %v6906_v46 = vld [vmem:[#allocation12 + $0x8] ss:$16 sps:$4 sm:$0xff]  }
 0x434   :  { %5362 = vrcp.f32 %v2179_v51 }
 0x435   :  { %5364 = vrcp.f32 %v2192_v13  ;;  %v6929_v13 = vld [vmem:[#allocation12 + $0x40] ss:$16 sps:$4 sm:$0xff]  }
 0x439   :  { %v5353_v42 = vpop.eup %5352 }
 0x43a   :  { %v5355_v11 = vpop.eup %5354  ;;  %v2200_v20 = vmul.f32 %v5353_v42, %v5349_v15 }
 0x43b   :  { %v5357_v17 = vpop.eup %5356 }
 0x43c   :  { %v5359_v41 = vpop.eup %5358  ;;  %v2198_v40 = vmul.f32 %v5357_v17, %v6684_v29  ;;  %v6917_v17 = vld [vmem:[#allocation12 + $0x20] ss:$16 sps:$4 sm:$0xff]  }
 0x43d   :  { %v5361_v14 = vpop.eup %5360  ;;  %v2193_v12 = vadd.f32 1.0, %v5359_v41  ;;  %v6920_v41 = vld [vmem:[#allocation12 + $0x28] ss:$16 sps:$4 sm:$0xff]  }
 0x43e   :  { %v6892_v16 = vadd.f32 %v2200_v20, %v2198_v40  ;;  %v2201_v45 = vmul.f32 %v5361_v14, %v5355_v11  ;;  %v5363_v37 = vpop.eup %5362  ;;  %v6909_v11 = vld [vmem:[#allocation12 + $0x24] ss:$16 sps:$4 sm:$0xff]   ;;  %v6912_v20 = vld [vmem:[#allocation12 + $0x2c] ss:$16 sps:$4 sm:$0xff]  }
 0x43f   :  { %v2199_v34 = vmul.f32 %v5363_v37, %v6688_v57  ;;  %v5365_v42 = vpop.eup %5364  ;;  %v6903_v57 = vld [vmem:[#allocation12] ss:$16 sps:$4 sm:$0xff]   ;;  %v6923_v40 = vld [vmem:[#allocation12 + $0x44] ss:$16 sps:$4 sm:$0xff]   ;;  %v6926_v14 = vld [vmem:[#allocation12 + $0x4c] ss:$16 sps:$4 sm:$0xff]  }
 0x440   :  { %5366 = vtanh.f32 %v6892_v16  ;;  %v6935_v37 = vld [vmem:[#allocation12 + $0x64] ss:$16 sps:$4 sm:$0xff]  }
 0x441   :  { %v6896_v33 = vadd.f32 %v2201_v45, %v2199_v34  ;;  %5368 = vrcp.f32 %v2193_v12  ;;  %v6932_v45 = vld [vmem:[#allocation12 + $0x48] ss:$16 sps:$4 sm:$0xff]   ;;  %v6938_v12 = vld [vmem:[#allocation12 + $0x6c] ss:$16 sps:$4 sm:$0xff]   ;;  %v6941_v34 = vld [vmem:[#allocation12 + $0x60] ss:$16 sps:$4 sm:$0xff]  }
 0x443   :  { %5370 = vtanh.f32 %v6896_v33 }
 0x44a   :  { %v5367_v5 = vpop.eup %5366 }
 0x44b   :  { %v5369_v29 = vpop.eup %5368  ;;  %v2206_v36 = vmul.f32 %v5367_v5, %v5365_v42  ;;  %v6944_v42 = vld [vmem:[#allocation12 + $0x68] ss:$16 sps:$4 sm:$0xff]   ;;  %v6947_v5 = vld [vmem:[#allocation12 + $0x84] ss:$16 sps:$4 sm:$0xff]  }
 0x44d   :  { %v5371_v18 = vpop.eup %5370 }
 0x44e   :  { %v2207_v51 = vmul.f32 %v5371_v18, %v5369_v29  ;;  %v6950_v29 = vld [vmem:[#allocation12 + $0x8c] ss:$16 sps:$4 sm:$0xff]   ;;  %v6953_v18 = vld [vmem:[#allocation12 + $0x80] ss:$16 sps:$4 sm:$0xff]  }
 0x450   :  { %v6899_v15 = vpack.c.bf16 %v2207_v51, %v2206_v36  ;;  %v6956_v36 = vld [vmem:[#allocation12 + $0x88] ss:$16 sps:$4 sm:$0xff]  }
 0x451   :  { %v7018_v51 = vld [vmem:[#allocation11 + $0x8] ss:$16 sps:$4 sm:$0xff]  }
 0x452   :  { %2242 = vmatmul.mubr.bf16.vlgmr.msra.gmra.mrb[40].mxu0 %v6899_v15  ;;  %2285 = vmatmul.mubr.bf16.vlgmr.msra.gmra.mrb[40].mxu1 %v6899_v15  ;;  %8403 = vst [vmem:[#allocation55_spill] sm:$0xff] %v7018_v51 }
 0x453   :  { %2296 = vmatpush1.bf16.msra.mxu0 %v6903_v57  ;;  %2339 = vmatpush1.bf16.msra.mxu1 %v6906_v46 }
 0x454   :  { %2297 = vmatprep.subr.bf16.mxu0 %v6909_v11  ;;  %2340 = vmatprep.subr.bf16.mxu1 %v6912_v20 }
 0x455   :  { %2327 = vmatprep.mubr.bf16.mxu0 %v8291_v52  ;;  %2370 = vmatprep.mubr.bf16.mxu1 %v8291_v52 }
 0x457   :  { %2298 = vmatpush1.bf16.msra.mxu0 %v6917_v17  ;;  %2341 = vmatpush1.bf16.msra.mxu1 %v6920_v41 }
 0x458   :  { %2299 = vmatprep.subr.bf16.mxu0 %v6923_v40  ;;  %2342 = vmatprep.subr.bf16.mxu1 %v6926_v14 }
 0x45b   :  { %2300 = vmatpush1.bf16.msra.mxu0 %v6929_v13  ;;  %2343 = vmatpush1.bf16.msra.mxu1 %v6932_v45 }
 0x45c   :  { %2301 = vmatprep.subr.bf16.mxu0 %v6935_v37  ;;  %2344 = vmatprep.subr.bf16.mxu1 %v6938_v12 }
 0x45f   :  { %2302 = vmatpush1.bf16.msra.mxu0 %v6941_v34  ;;  %2345 = vmatpush1.bf16.msra.mxu1 %v6944_v42 }
 0x460   :  { %2303 = vmatprep.subr.bf16.mxu0 %v6947_v5  ;;  %2346 = vmatprep.subr.bf16.mxu1 %v6950_v29 }
 0x463   :  { %2304 = vmatpush1.bf16.msra.mxu0 %v6953_v18  ;;  %2347 = vmatpush1.bf16.msra.mxu1 %v6956_v36 }
 0x464   :  { %2305 = vmatprep.subr.bf16.mxu0 %v8352_v1  ;;  %2348 = vmatprep.subr.bf16.mxu1 %v8353_v62  ;;  %v8398_v1 = vld [vmem:[#allocation29_spill] sm:$0xff] }
 0x465   :  { %v8399_v62 = vld [vmem:[#allocation45_spill] sm:$0xff] }
 0x467   :  { %2306 = vmatpush1.bf16.msra.mxu0 %v8354_v8  ;;  %2349 = vmatpush1.bf16.msra.mxu1 %v6536_v21  ;;  %v8396_v21 = vld [vmem:[#allocation27_spill] sm:$0xff]  ;;  %v7007_v8 = vld [vmem:[#allocation11 + $0x4] ss:$16 sps:$4 sm:$0xff]  }
 0x468   :  { %2307 = vmatprep.subr.bf16.mxu0 %v6540_v32  ;;  %2350 = vmatprep.subr.bf16.mxu1 %v8355_v58  ;;  %v8397_v32 = vld [vmem:[#allocation28_spill] sm:$0xff]  ;;  %8400 = vst [vmem:[#allocation52_spill] sm:$0xff] %v7007_v8  ;;  %v7010_v58 = vld [vmem:[#allocation11 + $0xc] ss:$16 sps:$4 sm:$0xff]  }
 0x469   :  { %8401 = vst [vmem:[#allocation53_spill] sm:$0xff] %v7010_v58 }
 0x46b   :  { %2308 = vmatpush1.bf16.msra.mxu0 %v6546_v26  ;;  %2351 = vmatpush1.bf16.msra.mxu1 %v6548_v24  ;;  %v8390_v26 = vld [vmem:[#allocation21_spill] sm:$0xff]  ;;  %v8391_v24 = vld [vmem:[#allocation22_spill] sm:$0xff] }
 0x46c   :  { %2309 = vmatprep.subr.bf16.mxu0 %v6552_v9  ;;  %2352 = vmatprep.subr.bf16.mxu1 %v6554_v22  ;;  %v8392_v9 = vld [vmem:[#allocation23_spill] sm:$0xff]  ;;  %v8393_v22 = vld [vmem:[#allocation24_spill] sm:$0xff] }
 0x46f   :  { %2310 = vmatpush1.bf16.msra.mxu0 %v6558_v31  ;;  %2353 = vmatpush1.bf16.msra.mxu1 %v6560_v0  ;;  %v8394_v31 = vld [vmem:[#allocation25_spill] sm:$0xff]  ;;  %v8395_v0 = vld [vmem:[#allocation26_spill] sm:$0xff] }
 0x470   :  { %2448 = vmatprep.subr.bf16.mxu0 %v6727_v43  ;;  %2491 = vmatprep.subr.bf16.mxu1 %v6730_v49 }
 0x472   :  { %2328 = vmatmul.mubr.bf16.vlgmr.msra.gmra.mrb[40].mxu0 %v6889_v44  ;;  %2371 = vmatmul.mubr.bf16.vlgmr.msra.gmra.mrb[40].mxu1 %v6889_v44  ;;  %v7015_v44 = vld [vmem:[#allocation11] ss:$16 sps:$4 sm:$0xff]  }
 0x473   :  { %2449 = vmatpush1.bf16.msra.mxu0 %v6735_v59  ;;  %2492 = vmatpush1.bf16.msra.mxu1 %v6738_v56  ;;  %8402 = vst [vmem:[#allocation54_spill] sm:$0xff] %v7015_v44 }
 0x474   :  { %2450 = vmatprep.subr.bf16.mxu0 %v6741_v55  ;;  %2493 = vmatprep.subr.bf16.mxu1 %v6744_v10 }
 0x475   :  { %2480 = vmatprep.mubr.bf16.mxu0 %v8291_v52  ;;  %2523 = vmatprep.mubr.bf16.mxu1 %v8291_v52 }
 0x477   :  { %2451 = vmatpush1.bf16.msra.mxu0 %v6749_v6  ;;  %2494 = vmatpush1.bf16.msra.mxu1 %v6752_v47 }
 0x478   :  { %2452 = vmatprep.subr.bf16.mxu0 %v6755_v63  ;;  %2495 = vmatprep.subr.bf16.mxu1 %v6758_v3 }
 0x47b   :  { %2453 = vmatpush1.bf16.msra.mxu0 %v6761_v27  ;;  %2496 = vmatpush1.bf16.msra.mxu1 %v6764_v60 }
 0x47c   :  { %2454 = vmatprep.subr.bf16.mxu0 %v6767_v53  ;;  %2497 = vmatprep.subr.bf16.mxu1 %v6770_v61 }
 0x47f   :  { %2455 = vmatpush1.bf16.msra.mxu0 %v6773_v28  ;;  %2498 = vmatpush1.bf16.msra.mxu1 %v6776_v25 }
 0x480   :  { %2456 = vmatprep.subr.bf16.mxu0 %v8390_v26  ;;  %2499 = vmatprep.subr.bf16.mxu1 %v8391_v24 }
 0x483   :  { %2457 = vmatpush1.bf16.msra.mxu0 %v8392_v9  ;;  %2500 = vmatpush1.bf16.msra.mxu1 %v8393_v22 }
 0x484   :  { %2458 = vmatprep.subr.bf16.mxu0 %v8394_v31  ;;  %2501 = vmatprep.subr.bf16.mxu1 %v8395_v0  ;;  %v8434_v31 = vld [vmem:[#allocation19_spill] sm:$0xff] }
 0x487   :  { %2459 = vmatpush1.bf16.msra.mxu0 %v8396_v21  ;;  %2502 = vmatpush1.bf16.msra.mxu1 %v8397_v32 }
 0x488   :  { %2460 = vmatprep.subr.bf16.mxu0 %v8398_v1  ;;  %2503 = vmatprep.subr.bf16.mxu1 %v8399_v62 }
 0x48b   :  { %2461 = vmatpush1.bf16.msra.mxu0 %v6809_v7  ;;  %2504 = vmatpush1.bf16.msra.mxu1 %v6812_v4 }
 0x48c   :  { %2462 = vmatprep.subr.bf16.mxu0 %v6815_v30  ;;  %2505 = vmatprep.subr.bf16.mxu1 %v6818_v48 }
 0x48f   :  { %2463 = vmatpush1.bf16.msra.mxu0 %v6821_v50  ;;  %2506 = vmatpush1.bf16.msra.mxu1 %v6824_v35  ;;  %v7021_v35 = vld [vmem:[#allocation11 + $0x24] ss:$16 sps:$4 sm:$0xff]  }
 0x490   :  { %2592 = vmatprep.subr.bf16.mxu0 %v7007_v8  ;;  %2635 = vmatprep.subr.bf16.mxu1 %v7010_v58  ;;  %8404 = vst [vmem:[#allocation56_spill] sm:$0xff] %v7021_v35  ;;  %v7024_v8 = vld [vmem:[#allocation11 + $0x2c] ss:$16 sps:$4 sm:$0xff]   ;;  %v7044_v58 = vld [vmem:[#allocation11 + $0x48] ss:$16 sps:$4 sm:$0xff]  }
 0x491   :  { %8405 = vst [vmem:[#allocation57_spill] sm:$0xff] %v7024_v8  ;;  %8411 = vst [vmem:[#allocation32_spill] sm:$0xff] %v7044_v58 }
 0x492   :  { %2481 = vmatmul.mubr.bf16.vlgmr.msra.gmra.mrb[12].mxu0 %v6899_v15  ;;  %2524 = vmatmul.mubr.bf16.vlgmr.msra.gmra.mrb[12].mxu1 %v6899_v15  ;;  %v7029_v15 = vld [vmem:[#allocation11 + $0x20] ss:$16 sps:$4 sm:$0xff]  }
 0x493   :  { %2593 = vmatpush1.bf16.msra.mxu0 %v7015_v44  ;;  %2636 = vmatpush1.bf16.msra.mxu1 %v7018_v51  ;;  %8406 = vst [vmem:[#allocation58_spill] sm:$0xff] %v7029_v15  ;;  %v7032_v44 = vld [vmem:[#allocation11 + $0x28] ss:$16 sps:$4 sm:$0xff]   ;;  %v7035_v51 = vld [vmem:[#allocation11 + $0x44] ss:$16 sps:$4 sm:$0xff]  }
 0x494   :  { %2594 = vmatprep.subr.bf16.mxu0 %v7021_v35  ;;  %2637 = vmatprep.subr.bf16.mxu1 %v7024_v8  ;;  %8407 = vst [vmem:[#allocation59_spill] sm:$0xff] %v7032_v44  ;;  %8408 = vst [vmem:[#allocation60_spill] sm:$0xff] %v7035_v51  ;;  %v7038_v35 = vld [vmem:[#allocation11 + $0x4c] ss:$16 sps:$4 sm:$0xff]   ;;  %v7041_v8 = vld [vmem:[#allocation11 + $0x40] ss:$16 sps:$4 sm:$0xff]  }
 0x495   :  { %2624 = vmatprep.mubr.bf16.mxu0 %v8291_v52  ;;  %2667 = vmatprep.mubr.bf16.mxu1 %v8291_v52  ;;  %8409 = vst [vmem:[#allocation30_spill] sm:$0xff] %v7038_v35  ;;  %8410 = vst [vmem:[#allocation31_spill] sm:$0xff] %v7041_v8 }
 0x497   :  { %2595 = vmatpush1.bf16.msra.mxu0 %v7029_v15  ;;  %2638 = vmatpush1.bf16.msra.mxu1 %v7032_v44  ;;  %v7047_v15 = vld [vmem:[#allocation11 + $0x64] ss:$16 sps:$4 sm:$0xff]   ;;  %v7050_v44 = vld [vmem:[#allocation11 + $0x6c] ss:$16 sps:$4 sm:$0xff]  }
 0x498   :  { %2596 = vmatprep.subr.bf16.mxu0 %v7035_v51  ;;  %2639 = vmatprep.subr.bf16.mxu1 %v7038_v35  ;;  %8412 = vst [vmem:[#allocation33_spill] sm:$0xff] %v7047_v15  ;;  %8413 = vst [vmem:[#allocation34_spill] sm:$0xff] %v7050_v44  ;;  %v7053_v51 = vld [vmem:[#allocation11 + $0x60] ss:$16 sps:$4 sm:$0xff]   ;;  %v7056_v35 = vld [vmem:[#allocation11 + $0x68] ss:$16 sps:$4 sm:$0xff]  }
 0x499   :  { %8414 = vst [vmem:[#allocation35_spill] sm:$0xff] %v7053_v51  ;;  %8415 = vst [vmem:[#allocation36_spill] sm:$0xff] %v7056_v35 }
 0x49b   :  { %2597 = vmatpush1.bf16.msra.mxu0 %v7041_v8  ;;  %2640 = vmatpush1.bf16.msra.mxu1 %v7044_v58  ;;  %v7059_v8 = vld [vmem:[#allocation11 + $0x84] ss:$16 sps:$4 sm:$0xff]   ;;  %v7062_v58 = vld [vmem:[#allocation11 + $0x8c] ss:$16 sps:$4 sm:$0xff]  }
 0x49c   :  { %2598 = vmatprep.subr.bf16.mxu0 %v7047_v15  ;;  %2641 = vmatprep.subr.bf16.mxu1 %v7050_v44  ;;  %8416 = vst [vmem:[#allocation37_spill] sm:$0xff] %v7059_v8  ;;  %8417 = vst [vmem:[#allocation38_spill] sm:$0xff] %v7062_v58  ;;  %v7065_v15 = vld [vmem:[#allocation11 + $0x80] ss:$16 sps:$4 sm:$0xff]   ;;  %v7068_v44 = vld [vmem:[#allocation11 + $0x88] ss:$16 sps:$4 sm:$0xff]  }
 0x49d   :  { %8418 = vst [vmem:[#allocation39_spill] sm:$0xff] %v7065_v15  ;;  %8419 = vst [vmem:[#allocation40_spill] sm:$0xff] %v7068_v44 }
 0x49f   :  { %2599 = vmatpush1.bf16.msra.mxu0 %v7053_v51  ;;  %2642 = vmatpush1.bf16.msra.mxu1 %v7056_v35  ;;  %v7071_v51 = vld [vmem:[#allocation11 + $0xa4] ss:$16 sps:$4 sm:$0xff]   ;;  %v7074_v35 = vld [vmem:[#allocation11 + $0xac] ss:$16 sps:$4 sm:$0xff]  }
 0x4a0   :  { %2600 = vmatprep.subr.bf16.mxu0 %v7059_v8  ;;  %2643 = vmatprep.subr.bf16.mxu1 %v7062_v58  ;;  %8420 = vst [vmem:[#allocation41_spill] sm:$0xff] %v7071_v51  ;;  %8421 = vst [vmem:[#allocation42_spill] sm:$0xff] %v7074_v35  ;;  %v7077_v8 = vld [vmem:[#allocation11 + $0xa0] ss:$16 sps:$4 sm:$0xff]   ;;  %v7080_v58 = vld [vmem:[#allocation11 + $0xa8] ss:$16 sps:$4 sm:$0xff]  }
 0x4a1   :  { %8422 = vst [vmem:[#allocation21_spill] sm:$0xff] %v7077_v8  ;;  %8423 = vst [vmem:[#allocation61_spill] sm:$0xff] %v7080_v58 }
 0x4a3   :  { %2601 = vmatpush1.bf16.msra.mxu0 %v7065_v15  ;;  %2644 = vmatpush1.bf16.msra.mxu1 %v7068_v44  ;;  %v7083_v15 = vld [vmem:[#allocation11 + $0xc4] ss:$16 sps:$4 sm:$0xff]   ;;  %v7086_v44 = vld [vmem:[#allocation11 + $0xcc] ss:$16 sps:$4 sm:$0xff]  }
 0x4a4   :  { %2602 = vmatprep.subr.bf16.mxu0 %v7071_v51  ;;  %2645 = vmatprep.subr.bf16.mxu1 %v7074_v35  ;;  %8424 = vst [vmem:[#allocation62_spill] sm:$0xff] %v7083_v15  ;;  %8425 = vst [vmem:[#allocation63_spill] sm:$0xff] %v7086_v44  ;;  %v7089_v51 = vld [vmem:[#allocation11 + $0xc0] ss:$16 sps:$4 sm:$0xff]   ;;  %v7092_v35 = vld [vmem:[#allocation11 + $0xc8] ss:$16 sps:$4 sm:$0xff]  }
 0x4a5   :  { %8426 = vst [vmem:[#allocation64_spill] sm:$0xff] %v7089_v51  ;;  %8427 = vst [vmem:[#allocation65_spill] sm:$0xff] %v7092_v35 }
 0x4a7   :  { %2603 = vmatpush1.bf16.msra.mxu0 %v7077_v8  ;;  %2646 = vmatpush1.bf16.msra.mxu1 %v7080_v58  ;;  %v7095_v8 = vld [vmem:[#allocation11 + $0xe4] ss:$16 sps:$4 sm:$0xff]   ;;  %v7098_v58 = vld [vmem:[#allocation11 + $0xec] ss:$16 sps:$4 sm:$0xff]  }
 0x4a8   :  { %2604 = vmatprep.subr.bf16.mxu0 %v7083_v15  ;;  %2647 = vmatprep.subr.bf16.mxu1 %v7086_v44  ;;  %8428 = vst [vmem:[#allocation66_spill] sm:$0xff] %v7095_v8  ;;  %8429 = vst [vmem:[#allocation67_spill] sm:$0xff] %v7098_v58  ;;  %v7101_v15 = vld [vmem:[#allocation11 + $0xe0] ss:$16 sps:$4 sm:$0xff]   ;;  %v7104_v44 = vld [vmem:[#allocation11 + $0xe8] ss:$16 sps:$4 sm:$0xff]  }
 0x4a9   :  { %8430 = vst [vmem:[#allocation68_spill] sm:$0xff] %v7101_v15  ;;  %8431 = vst [vmem:[#allocation69_spill] sm:$0xff] %v7104_v44 }
 0x4ab   :  { %2605 = vmatpush1.bf16.msra.mxu0 %v7089_v51  ;;  %2648 = vmatpush1.bf16.msra.mxu1 %v7092_v35  ;;  %v7107_v51 = vld [vmem:[#allocation12 + $0x4] ss:$16 sps:$4 sm:$0xff]   ;;  %v7110_v35 = vld [vmem:[#allocation12 + $0xc] ss:$16 sps:$4 sm:$0xff]  }
 0x4ac   :  { %2606 = vmatprep.subr.bf16.mxu0 %v7095_v8  ;;  %2649 = vmatprep.subr.bf16.mxu1 %v7098_v58  ;;  %8432 = vst [vmem:[#allocation70_spill] sm:$0xff] %v7107_v51  ;;  %8433 = vst [vmem:[#allocation71_spill] sm:$0xff] %v7110_v35 }
 0x4af   :  { %2607 = vmatpush1.bf16.msra.mxu0 %v7101_v15  ;;  %2650 = vmatpush1.bf16.msra.mxu1 %v7104_v44 }
 0x4b0   :  { %2678 = vmatprep.subr.bf16.mxu0 %v7107_v51  ;;  %2721 = vmatprep.subr.bf16.mxu1 %v7110_v35 }
 0x545   :  { %v2329_v8 = vpop.f32.mrb[40].mxu0  ;;  %v2372_v50 = vpop.f32.mrb[40].mxu1 }
 0x546   :  { %v2381_v58 = vadd.f32 %v2329_v8, %v8384_v38  ;;  %v2331_v48 = vpop.f32.mrb[41].mxu0  ;;  %v2374_v30 = vpop.f32.mrb[41].mxu1 }
 0x547   :  { %v2382_v15 = vadd.f32 %v2331_v48, %v6649_v2  ;;  %v2333_v4 = vpop.f32.mrb[42].mxu0  ;;  %v2376_v7 = vpop.f32.mrb[42].mxu1  ;;  %v2384_v8 = vadd.f32 %v2374_v30, %v8434_v31  ;;  %v8435_v48 = vld [vmem:[#allocation20_spill] sm:$0xff] }
 0x548   :  { %v4655_v62 = vmul.f32 -1.442695, %v2381_v58  ;;  %v2385_v44 = vadd.f32 %v2333_v4, %v8384_v38  ;;  %v2335_v1 = vpop.f32.mrb[43].mxu0  ;;  %v2378_v32 = vpop.f32.mrb[43].mxu1  ;;  %v2383_v9 = vadd.f32 %v2372_v50, %v8435_v48 }
 0x549   :  { %v4657_v51 = vmul.f32 -1.442695, %v2382_v15  ;;  %v2386_v21 = vadd.f32 %v2335_v1, %v6649_v2  ;;  %v2388_v22 = vadd.f32 %v2378_v32, %v8434_v31  ;;  %v4659_v58 = vmul.f32 -1.442695, %v2384_v8 }
 0x54a   :  { %5372 = vpow2.f32 %v4655_v62  ;;  %v4656_v35 = vmul.f32 -1.442695, %v2385_v44  ;;  %v2387_v1 = vadd.f32 %v2376_v7, %v8435_v48 }
 0x54b   :  { %5374 = vpow2.f32 %v4657_v51  ;;  %v4658_v0 = vmul.f32 -1.442695, %v2386_v21  ;;  %v4660_v24 = vmul.f32 -1.442695, %v2388_v22 }
 0x54c   :  { %5376 = vpow2.f32 %v4656_v35 }
 0x54d   :  { %5378 = vpow2.f32 %v4658_v0 }
 0x54e   :  { %5380 = vtanh.f32 %v2383_v9 }
 0x54f   :  { %5382 = vpow2.f32 %v4659_v58 }
 0x550   :  { %5384 = vpow2.f32 %v4660_v24 }
 0x554   :  { %v5373_v4 = vpop.eup %5372 }
 0x555   :  { %v5375_v38 = vpop.eup %5374  ;;  %v2395_v15 = vadd.f32 1.0, %v5373_v4 }
 0x556   :  { %v2407_v62 = vadd.f32 1.0, %v5375_v38  ;;  %v5377_v21 = vpop.eup %5376 }
 0x557   :  { %5386 = vrcp.f32 %v2395_v15  ;;  %v2396_v30 = vadd.f32 1.0, %v5377_v21  ;;  %v5379_v35 = vpop.eup %5378 }
 0x558   :  { %5388 = vrcp.f32 %v2407_v62  ;;  %v2408_v0 = vadd.f32 1.0, %v5379_v35  ;;  %v5381_v50 = vpop.eup %5380 }
 0x559   :  { %5390 = vtanh.f32 %v2387_v1  ;;  %v5383_v22 = vpop.eup %5382 }
 0x55a   :  { %5392 = vrcp.f32 %v2396_v30  ;;  %v5385_v32 = vpop.eup %5384  ;;  %v2421_v38 = vadd.f32 1.0, %v5383_v22 }
 0x55b   :  { %5394 = vrcp.f32 %v2408_v0  ;;  %v2422_v58 = vadd.f32 1.0, %v5385_v32 }
 0x55c   :  { %5396 = vrcp.f32 %v2421_v38 }
 0x55d   :  { %5398 = vrcp.f32 %v2422_v58 }
 0x561   :  { %v5387_v9 = vpop.eup %5386 }
 0x562   :  { %v5389_v44 = vpop.eup %5388  ;;  %v2429_v51 = vmul.f32 %v5387_v9, %v5381_v50  ;;  %v8436_v50 = vld [vmem:[#allocation43_spill] sm:$0xff] }
 0x563   :  { %v5391_v8 = vpop.eup %5390  ;;  %v2427_v7 = vmul.f32 %v5389_v44, %v6874_v39 }
 0x564   :  { %v5393_v24 = vpop.eup %5392 }
 0x565   :  { %v7122_v4 = vadd.f32 %v2429_v51, %v2427_v7  ;;  %v2430_v15 = vmul.f32 %v5393_v24, %v5391_v8  ;;  %v2482_v62 = vpop.f32.mrb[12].mxu0  ;;  %v2525_v1 = vpop.f32.mrb[12].mxu1 }
 0x566   :  { %v5395_v21 = vpop.eup %5394  ;;  %v4821_v30 = vadd.f32 %v2482_v62, %v8387_v54  ;;  %v2484_v35 = vpop.f32.mrb[13].mxu0  ;;  %v8437_v62 = vld [vmem:[#allocation44_spill] sm:$0xff] }
 0x567   :  { %v2527_v0 = vpop.f32.mrb[13].mxu1  ;;  %v2428_v48 = vmul.f32 %v5395_v21, %v6881_v19  ;;  %v4822_v9 = vadd.f32 %v2484_v35, %v8436_v50  ;;  %v2486_v31 = vpop.f32.mrb[14].mxu0  ;;  %5400 = vtanh.f32 %v7122_v4  ;;  %v4853_v21 = vadd.f32 %v2525_v1, %v8437_v62 }
 0x568   :  { %v2529_v39 = vpop.f32.mrb[14].mxu1  ;;  %v4661_v22 = vmul.f32 -1.442695, %v4821_v30  ;;  %v4823_v32 = vadd.f32 %v2486_v31, %v8387_v54  ;;  %v2488_v44 = vpop.f32.mrb[15].mxu0  ;;  %v4854_v58 = vadd.f32 %v2527_v0, %v6453_v23 }
 0x569   :  { %v2531_v51 = vpop.f32.mrb[15].mxu1  ;;  %v7129_v8 = vadd.f32 %v2430_v15, %v2428_v48  ;;  %v4663_v7 = vmul.f32 -1.442695, %v4822_v9  ;;  %v4824_v24 = vadd.f32 %v2488_v44, %v8436_v50  ;;  %v5397_v31 = vpop.eup %5396 }
 0x56a   :  { %5402 = vpow2.f32 %v4661_v22  ;;  %v4662_v38 = vmul.f32 -1.442695, %v4823_v32  ;;  %v5399_v30 = vpop.eup %5398  ;;  %v4665_v35 = vmul.f32 -1.442695, %v4854_v58  ;;  %v4856_v48 = vadd.f32 %v2531_v51, %v6453_v23 }
 0x56b   :  { %5404 = vtanh.f32 %v7129_v8  ;;  %v4664_v19 = vmul.f32 -1.442695, %v4824_v24  ;;  %v4855_v22 = vadd.f32 %v2529_v39, %v8437_v62 }
 0x56c   :  { %5406 = vpow2.f32 %v4663_v7  ;;  %v4666_v24 = vmul.f32 -1.442695, %v4856_v48 }
 0x56d   :  { %5408 = vpow2.f32 %v4662_v38 }
 0x56e   :  { %5410 = vpow2.f32 %v4664_v19 }
 0x56f   :  { %5412 = vtanh.f32 %v4853_v21 }
 0x570   :  { %5414 = vpow2.f32 %v4665_v35 }
 0x571   :  { %v5401_v15 = vpop.eup %5400 }
 0x572   :  { %v2435_v0 = vmul.f32 %v5401_v15, %v5397_v31 }
 0x574   :  { %v5403_v9 = vpop.eup %5402 }
 0x575   :  { %v5405_v32 = vpop.eup %5404  ;;  %v2549_v44 = vadd.f32 1.0, %v5403_v9 }
 0x576   :  { %v5407_v7 = vpop.eup %5406  ;;  %v2436_v38 = vmul.f32 %v5405_v32, %v5399_v30 }
 0x577   :  { %5416 = vrcp.f32 %v2549_v44  ;;  %v2561_v19 = vadd.f32 1.0, %v5407_v7  ;;  %v5409_v50 = vpop.eup %5408 }
 0x578   :  { %5418 = vtanh.f32 %v4855_v22  ;;  %v7137_v1 = vpack.c.bf16 %v2436_v38, %v2435_v0  ;;  %v2550_v51 = vadd.f32 1.0, %v5409_v50  ;;  %v5411_v58 = vpop.eup %5410 }
 0x579   :  { %5420 = vrcp.f32 %v2561_v19  ;;  %v2562_v39 = vadd.f32 1.0, %v5411_v58  ;;  %v5413_v9 = vpop.eup %5412 }
 0x57a   :  { %5422 = vpow2.f32 %v4666_v24  ;;  %v5415_v21 = vpop.eup %5414 }
 0x57b   :  { %5424 = vrcp.f32 %v2550_v51  ;;  %v2575_v22 = vadd.f32 1.0, %v5415_v21  ;;  %v7174_v21 = vld [vmem:[#allocation12 + $0xac] ss:$16 sps:$4 sm:$0xff]  }
 0x57c   :  { %5426 = vrcp.f32 %v2562_v39 }
 0x57d   :  { %5428 = vrcp.f32 %v2575_v22  ;;  %v7195_v22 = vld [vmem:[#allocation12 + $0xe4] ss:$16 sps:$4 sm:$0xff]  }
 0x581   :  { %v5417_v62 = vpop.eup %5416 }
 0x582   :  { %v5419_v35 = vpop.eup %5418  ;;  %v2583_v48 = vmul.f32 %v5417_v62, %v5413_v9 }
 0x583   :  { %v5421_v31 = vpop.eup %5420 }
 0x584   :  { %v5423_v30 = vpop.eup %5422  ;;  %v2581_v15 = vmul.f32 %v5421_v31, %v6892_v16  ;;  %v7183_v31 = vld [vmem:[#allocation12 + $0xc4] ss:$16 sps:$4 sm:$0xff]  }
 0x585   :  { %v5425_v32 = vpop.eup %5424  ;;  %v2576_v0 = vadd.f32 1.0, %v5423_v30  ;;  %v7186_v30 = vld [vmem:[#allocation12 + $0xcc] ss:$16 sps:$4 sm:$0xff]  }
 0x586   :  { %v7140_v44 = vadd.f32 %v2583_v48, %v2581_v15  ;;  %v2584_v7 = vmul.f32 %v5425_v32, %v5419_v35  ;;  %v5427_v50 = vpop.eup %5426  ;;  %v7177_v35 = vld [vmem:[#allocation12 + $0xa0] ss:$16 sps:$4 sm:$0xff]   ;;  %v7180_v48 = vld [vmem:[#allocation12 + $0xa8] ss:$16 sps:$4 sm:$0xff]  }
 0x587   :  { %v2582_v24 = vmul.f32 %v5427_v50, %v6896_v33  ;;  %v5429_v62 = vpop.eup %5428  ;;  %v7171_v33 = vld [vmem:[#allocation12 + $0xa4] ss:$16 sps:$4 sm:$0xff]   ;;  %v7189_v15 = vld [vmem:[#allocation12 + $0xc0] ss:$16 sps:$4 sm:$0xff]   ;;  %v7192_v32 = vld [vmem:[#allocation12 + $0xc8] ss:$16 sps:$4 sm:$0xff]  }
 0x588   :  { %5430 = vtanh.f32 %v7140_v44  ;;  %v7201_v50 = vld [vmem:[#allocation12 + $0xe0] ss:$16 sps:$4 sm:$0xff]  }
 0x589   :  { %v7144_v38 = vadd.f32 %v2584_v7, %v2582_v24  ;;  %5432 = vrcp.f32 %v2576_v0  ;;  %v7198_v7 = vld [vmem:[#allocation12 + $0xec] ss:$16 sps:$4 sm:$0xff]   ;;  %v7204_v0 = vld [vmem:[#allocation12 + $0xe8] ss:$16 sps:$4 sm:$0xff]  }
 0x58a   :  { %v8456_v24 = vld [vmem:[#allocation55_spill] sm:$0xff] }
 0x58b   :  { %5434 = vtanh.f32 %v7144_v38 }
 0x592   :  { %v5431_v19 = vpop.eup %5430 }
 0x593   :  { %v5433_v16 = vpop.eup %5432  ;;  %v2589_v58 = vmul.f32 %v5431_v19, %v5429_v62  ;;  %v8457_v62 = vld [vmem:[#allocation56_spill] sm:$0xff]  ;;  %v8458_v19 = vld [vmem:[#allocation57_spill] sm:$0xff] }
 0x595   :  { %v5435_v51 = vpop.eup %5434 }
 0x596   :  { %v2590_v39 = vmul.f32 %v5435_v51, %v5433_v16  ;;  %v8459_v16 = vld [vmem:[#allocation58_spill] sm:$0xff]  ;;  %v8460_v51 = vld [vmem:[#allocation59_spill] sm:$0xff] }
 0x598   :  { %v7147_v9 = vpack.c.bf16 %v2590_v39, %v2589_v58  ;;  %v8461_v58 = vld [vmem:[#allocation60_spill] sm:$0xff]  ;;  %v8462_v39 = vld [vmem:[#allocation30_spill] sm:$0xff] }
 0x59a   :  { %2625 = vmatmul.mubr.bf16.vlgmr.msra.gmra.mrb[44].mxu0 %v7147_v9  ;;  %2668 = vmatmul.mubr.bf16.vlgmr.msra.gmra.mrb[44].mxu1 %v7147_v9 }
 0x59b   :  { %2679 = vmatpush1.bf16.msra.mxu0 %v6903_v57  ;;  %2722 = vmatpush1.bf16.msra.mxu1 %v6906_v46 }
 0x59c   :  { %2680 = vmatprep.subr.bf16.mxu0 %v6909_v11  ;;  %2723 = vmatprep.subr.bf16.mxu1 %v6912_v20 }
 0x59d   :  { %2710 = vmatprep.mubr.bf16.mxu0 %v8291_v52  ;;  %2753 = vmatprep.mubr.bf16.mxu1 %v8291_v52 }
 0x59f   :  { %2681 = vmatpush1.bf16.msra.mxu0 %v6917_v17  ;;  %2724 = vmatpush1.bf16.msra.mxu1 %v6920_v41 }
 0x5a0   :  { %2682 = vmatprep.subr.bf16.mxu0 %v6923_v40  ;;  %2725 = vmatprep.subr.bf16.mxu1 %v6926_v14 }
 0x5a3   :  { %2683 = vmatpush1.bf16.msra.mxu0 %v6929_v13  ;;  %2726 = vmatpush1.bf16.msra.mxu1 %v6932_v45 }
 0x5a4   :  { %2684 = vmatprep.subr.bf16.mxu0 %v6935_v37  ;;  %2727 = vmatprep.subr.bf16.mxu1 %v6938_v12 }
 0x5a7   :  { %2685 = vmatpush1.bf16.msra.mxu0 %v6941_v34  ;;  %2728 = vmatpush1.bf16.msra.mxu1 %v6944_v42 }
 0x5a8   :  { %2686 = vmatprep.subr.bf16.mxu0 %v6947_v5  ;;  %2729 = vmatprep.subr.bf16.mxu1 %v6950_v29 }
 0x5ab   :  { %2687 = vmatpush1.bf16.msra.mxu0 %v6953_v18  ;;  %2730 = vmatpush1.bf16.msra.mxu1 %v6956_v36 }
 0x5ac   :  { %2688 = vmatprep.subr.bf16.mxu0 %v7171_v33  ;;  %2731 = vmatprep.subr.bf16.mxu1 %v7174_v21 }
 0x5af   :  { %2689 = vmatpush1.bf16.msra.mxu0 %v7177_v35  ;;  %2732 = vmatpush1.bf16.msra.mxu1 %v7180_v48 }
 0x5b0   :  { %2690 = vmatprep.subr.bf16.mxu0 %v7183_v31  ;;  %2733 = vmatprep.subr.bf16.mxu1 %v7186_v30 }
 0x5b3   :  { %2691 = vmatpush1.bf16.msra.mxu0 %v7189_v15  ;;  %2734 = vmatpush1.bf16.msra.mxu1 %v7192_v32 }
 0x5b4   :  { %2692 = vmatprep.subr.bf16.mxu0 %v7195_v22  ;;  %2735 = vmatprep.subr.bf16.mxu1 %v7198_v7 }
 0x5b7   :  { %2693 = vmatpush1.bf16.msra.mxu0 %v7201_v50  ;;  %2736 = vmatpush1.bf16.msra.mxu1 %v7204_v0 }
 0x5b8   :  { %2831 = vmatprep.subr.bf16.mxu0 %v6727_v43  ;;  %2874 = vmatprep.subr.bf16.mxu1 %v6730_v49  ;;  %v8438_v43 = vld [vmem:[#allocation22_spill] sm:$0xff]  ;;  %v8439_v49 = vld [vmem:[#allocation23_spill] sm:$0xff] }
 0x5ba   :  { %2711 = vmatmul.mubr.bf16.vlgmr.msra.gmra.mrb[44].mxu0 %v7137_v1  ;;  %2754 = vmatmul.mubr.bf16.vlgmr.msra.gmra.mrb[44].mxu1 %v7137_v1  ;;  %v8455_v1 = vld [vmem:[#allocation54_spill] sm:$0xff] }
 0x5bb   :  { %2832 = vmatpush1.bf16.msra.mxu0 %v6735_v59  ;;  %2875 = vmatpush1.bf16.msra.mxu1 %v6738_v56  ;;  %v8440_v59 = vld [vmem:[#allocation24_spill] sm:$0xff]  ;;  %v8441_v56 = vld [vmem:[#allocation25_spill] sm:$0xff] }
 0x5bc   :  { %2833 = vmatprep.subr.bf16.mxu0 %v6741_v55  ;;  %2876 = vmatprep.subr.bf16.mxu1 %v6744_v10  ;;  %v8442_v55 = vld [vmem:[#allocation26_spill] sm:$0xff]  ;;  %v8443_v10 = vld [vmem:[#allocation27_spill] sm:$0xff] }
 0x5bd   :  { %2863 = vmatprep.mubr.bf16.mxu0 %v8291_v52  ;;  %2906 = vmatprep.mubr.bf16.mxu1 %v8291_v52 }
 0x5bf   :  { %2834 = vmatpush1.bf16.msra.mxu0 %v6749_v6  ;;  %2877 = vmatpush1.bf16.msra.mxu1 %v6752_v47  ;;  %v8444_v6 = vld [vmem:[#allocation28_spill] sm:$0xff]  ;;  %v8445_v47 = vld [vmem:[#allocation29_spill] sm:$0xff] }
 0x5c0   :  { %2835 = vmatprep.subr.bf16.mxu0 %v6755_v63  ;;  %2878 = vmatprep.subr.bf16.mxu1 %v6758_v3  ;;  %v8446_v63 = vld [vmem:[#allocation45_spill] sm:$0xff]  ;;  %v8447_v3 = vld [vmem:[#allocation46_spill] sm:$0xff] }
 0x5c3   :  { %2836 = vmatpush1.bf16.msra.mxu0 %v6761_v27  ;;  %2879 = vmatpush1.bf16.msra.mxu1 %v6764_v60  ;;  %v8448_v27 = vld [vmem:[#allocation47_spill] sm:$0xff]  ;;  %v8449_v60 = vld [vmem:[#allocation48_spill] sm:$0xff] }
 0x5c4   :  { %2837 = vmatprep.subr.bf16.mxu0 %v6767_v53  ;;  %2880 = vmatprep.subr.bf16.mxu1 %v6770_v61  ;;  %v8450_v53 = vld [vmem:[#allocation49_spill] sm:$0xff]  ;;  %v8451_v61 = vld [vmem:[#allocation50_spill] sm:$0xff] }
 0x5c7   :  { %2838 = vmatpush1.bf16.msra.mxu0 %v6773_v28  ;;  %2881 = vmatpush1.bf16.msra.mxu1 %v6776_v25  ;;  %v8452_v28 = vld [vmem:[#allocation51_spill] sm:$0xff]  ;;  %v8453_v25 = vld [vmem:[#allocation52_spill] sm:$0xff] }
 0x5c8   :  { %2839 = vmatprep.subr.bf16.mxu0 %v8390_v26  ;;  %2882 = vmatprep.subr.bf16.mxu1 %v8438_v43  ;;  %v8454_v26 = vld [vmem:[#allocation53_spill] sm:$0xff]  ;;  %v8464_v43 = vld [vmem:[#allocation32_spill] sm:$0xff] }
 0x5cb   :  { %2840 = vmatpush1.bf16.msra.mxu0 %v8439_v49  ;;  %2883 = vmatpush1.bf16.msra.mxu1 %v8440_v59  ;;  %v8465_v49 = vld [vmem:[#allocation33_spill] sm:$0xff]  ;;  %v8466_v59 = vld [vmem:[#allocation34_spill] sm:$0xff] }
 0x5cc   :  { %2841 = vmatprep.subr.bf16.mxu0 %v8441_v56  ;;  %2884 = vmatprep.subr.bf16.mxu1 %v8442_v55  ;;  %v8467_v56 = vld [vmem:[#allocation35_spill] sm:$0xff]  ;;  %v8468_v55 = vld [vmem:[#allocation36_spill] sm:$0xff] }
 0x5cf   :  { %2842 = vmatpush1.bf16.msra.mxu0 %v8443_v10  ;;  %2885 = vmatpush1.bf16.msra.mxu1 %v8444_v6  ;;  %v8469_v10 = vld [vmem:[#allocation37_spill] sm:$0xff]  ;;  %v8470_v6 = vld [vmem:[#allocation38_spill] sm:$0xff] }
 0x5d0   :  { %2843 = vmatprep.subr.bf16.mxu0 %v8445_v47  ;;  %2886 = vmatprep.subr.bf16.mxu1 %v8446_v63  ;;  %v8471_v47 = vld [vmem:[#allocation39_spill] sm:$0xff]  ;;  %v8472_v63 = vld [vmem:[#allocation40_spill] sm:$0xff] }
 0x5d3   :  { %2844 = vmatpush1.bf16.msra.mxu0 %v8447_v3  ;;  %2887 = vmatpush1.bf16.msra.mxu1 %v8448_v27  ;;  %v8473_v3 = vld [vmem:[#allocation41_spill] sm:$0xff]  ;;  %v8474_v27 = vld [vmem:[#allocation42_spill] sm:$0xff] }
 0x5d4   :  { %2845 = vmatprep.subr.bf16.mxu0 %v8449_v60  ;;  %2888 = vmatprep.subr.bf16.mxu1 %v8450_v53  ;;  %v8475_v60 = vld [vmem:[#allocation21_spill] sm:$0xff] }
 0x5d5   :  { %v8476_v53 = vld [vmem:[#allocation61_spill] sm:$0xff] }
 0x5d7   :  { %2846 = vmatpush1.bf16.msra.mxu0 %v8451_v61  ;;  %2889 = vmatpush1.bf16.msra.mxu1 %v8452_v28  ;;  %v8477_v61 = vld [vmem:[#allocation62_spill] sm:$0xff]  ;;  %v8478_v28 = vld [vmem:[#allocation63_spill] sm:$0xff] }
 0x5d8   :  { %2975 = vmatprep.subr.bf16.mxu0 %v8453_v25  ;;  %3018 = vmatprep.subr.bf16.mxu1 %v8454_v26 }
 0x5da   :  { %2864 = vmatmul.mubr.bf16.vlgmr.msra.gmra.mrb[16].mxu0 %v7147_v9  ;;  %2907 = vmatmul.mubr.bf16.vlgmr.msra.gmra.mrb[16].mxu1 %v7147_v9  ;;  %v8463_v9 = vld [vmem:[#allocation31_spill] sm:$0xff] }
 0x5db   :  { %2976 = vmatpush1.bf16.msra.mxu0 %v8455_v1  ;;  %3019 = vmatpush1.bf16.msra.mxu1 %v8456_v24 }
 0x5dc   :  { %2977 = vmatprep.subr.bf16.mxu0 %v8457_v62  ;;  %3020 = vmatprep.subr.bf16.mxu1 %v8458_v19 }
 0x5dd   :  { %3007 = vmatprep.mubr.bf16.mxu0 %v8291_v52  ;;  %3050 = vmatprep.mubr.bf16.mxu1 %v8291_v52 }
 0x5df   :  { %2978 = vmatpush1.bf16.msra.mxu0 %v8459_v16  ;;  %3021 = vmatpush1.bf16.msra.mxu1 %v8460_v51 }
 0x5e0   :  { %2979 = vmatprep.subr.bf16.mxu0 %v8461_v58  ;;  %3022 = vmatprep.subr.bf16.mxu1 %v8462_v39  ;;  %v8488_v58 = vld [vmem:[#allocation19_spill] sm:$0xff] }
 0x5e3   :  { %2980 = vmatpush1.bf16.msra.mxu0 %v8463_v9  ;;  %3023 = vmatpush1.bf16.msra.mxu1 %v8464_v43 }
 0x5e4   :  { %2981 = vmatprep.subr.bf16.mxu0 %v8465_v49  ;;  %3024 = vmatprep.subr.bf16.mxu1 %v8466_v59 }
 0x5e7   :  { %2982 = vmatpush1.bf16.msra.mxu0 %v8467_v56  ;;  %3025 = vmatpush1.bf16.msra.mxu1 %v8468_v55  ;;  %v8479_v55 = vld [vmem:[#allocation64_spill] sm:$0xff]  ;;  %v8487_v56 = vld [vmem:[#allocation18_spill] sm:$0xff] }
 0x5e8   :  { %2983 = vmatprep.subr.bf16.mxu0 %v8469_v10  ;;  %3026 = vmatprep.subr.bf16.mxu1 %v8470_v6  ;;  %v8480_v10 = vld [vmem:[#allocation65_spill] sm:$0xff]  ;;  %v8481_v6 = vld [vmem:[#allocation66_spill] sm:$0xff] }
 0x5eb   :  { %2984 = vmatpush1.bf16.msra.mxu0 %v8471_v47  ;;  %3027 = vmatpush1.bf16.msra.mxu1 %v8472_v63  ;;  %v8482_v47 = vld [vmem:[#allocation67_spill] sm:$0xff]  ;;  %v8483_v63 = vld [vmem:[#allocation68_spill] sm:$0xff] }
 0x5ec   :  { %2985 = vmatprep.subr.bf16.mxu0 %v8473_v3  ;;  %3028 = vmatprep.subr.bf16.mxu1 %v8474_v27  ;;  %v8484_v3 = vld [vmem:[#allocation69_spill] sm:$0xff]  ;;  %v8485_v27 = vld [vmem:[#allocation70_spill] sm:$0xff] }
 0x5ef   :  { %2986 = vmatpush1.bf16.msra.mxu0 %v8475_v60  ;;  %3029 = vmatpush1.bf16.msra.mxu1 %v8476_v53  ;;  %v8486_v60 = vld [vmem:[#allocation71_spill] sm:$0xff] }
 0x5f0   :  { %2987 = vmatprep.subr.bf16.mxu0 %v8477_v61  ;;  %3030 = vmatprep.subr.bf16.mxu1 %v8478_v28 }
 0x5f3   :  { %2988 = vmatpush1.bf16.msra.mxu0 %v8479_v55  ;;  %3031 = vmatpush1.bf16.msra.mxu1 %v8480_v10 }
 0x5f4   :  { %2989 = vmatprep.subr.bf16.mxu0 %v8481_v6  ;;  %3032 = vmatprep.subr.bf16.mxu1 %v8482_v47 }
 0x5f7   :  { %2990 = vmatpush1.bf16.msra.mxu0 %v8483_v63  ;;  %3033 = vmatpush1.bf16.msra.mxu1 %v8484_v3 }
 0x5f8   :  { %3061 = vmatprep.subr.bf16.mxu0 %v8485_v27  ;;  %3104 = vmatprep.subr.bf16.mxu1 %v8486_v60 }
 0x68d   :  { %v2712_v53 = vpop.f32.mrb[44].mxu0  ;;  %v2755_v61 = vpop.f32.mrb[44].mxu1 }
 0x68e   :  { %v2764_v28 = vadd.f32 %v2712_v53, %v8487_v56  ;;  %v2714_v59 = vpop.f32.mrb[45].mxu0  ;;  %v2757_v55 = vpop.f32.mrb[45].mxu1 }
 0x68f   :  { %v2765_v10 = vadd.f32 %v2714_v59, %v6649_v2  ;;  %v2716_v49 = vpop.f32.mrb[46].mxu0  ;;  %v2759_v6 = vpop.f32.mrb[46].mxu1  ;;  %v2767_v53 = vadd.f32 %v2757_v55, %v8488_v58  ;;  %v8489_v59 = vld [vmem:[#allocation20_spill] sm:$0xff] }
 0x690   :  { %v4667_v43 = vmul.f32 -1.442695, %v2764_v28  ;;  %v2768_v47 = vadd.f32 %v2716_v49, %v8487_v56  ;;  %v2718_v63 = vpop.f32.mrb[47].mxu0  ;;  %v2761_v9 = vpop.f32.mrb[47].mxu1  ;;  %v2766_v16 = vadd.f32 %v2755_v61, %v8489_v59 }
 0x691   :  { %v4669_v3 = vmul.f32 -1.442695, %v2765_v10  ;;  %v2769_v27 = vadd.f32 %v2718_v63, %v6649_v2  ;;  %v2771_v51 = vadd.f32 %v2761_v9, %v8488_v58  ;;  %v4671_v28 = vmul.f32 -1.442695, %v2767_v53 }
 0x692   :  { %5436 = vpow2.f32 %v4667_v43  ;;  %v4668_v60 = vmul.f32 -1.442695, %v2768_v47  ;;  %v2770_v43 = vadd.f32 %v2759_v6, %v8489_v59 }
 0x693   :  { %5438 = vpow2.f32 %v4669_v3  ;;  %v4670_v39 = vmul.f32 -1.442695, %v2769_v27  ;;  %v4672_v19 = vmul.f32 -1.442695, %v2771_v51 }
 0x694   :  { %5440 = vpow2.f32 %v4668_v60 }
 0x695   :  { %5442 = vpow2.f32 %v4670_v39 }
 0x696   :  { %5444 = vtanh.f32 %v2766_v16 }
 0x697   :  { %5446 = vpow2.f32 %v4671_v28 }
 0x698   :  { %5448 = vpow2.f32 %v4672_v19 }
 0x69c   :  { %v5437_v49 = vpop.eup %5436 }
 0x69d   :  { %v5439_v56 = vpop.eup %5438  ;;  %v2778_v10 = vadd.f32 1.0, %v5437_v49 }
 0x69e   :  { %v2790_v47 = vadd.f32 1.0, %v5439_v56  ;;  %v5441_v63 = vpop.eup %5440 }
 0x69f   :  { %5450 = vrcp.f32 %v2778_v10  ;;  %v2779_v55 = vadd.f32 1.0, %v5441_v63  ;;  %v5443_v3 = vpop.eup %5442 }
 0x6a0   :  { %5452 = vrcp.f32 %v2790_v47  ;;  %v2791_v39 = vadd.f32 1.0, %v5443_v3  ;;  %v5445_v9 = vpop.eup %5444 }
 0x6a1   :  { %5454 = vtanh.f32 %v2770_v43  ;;  %v5447_v51 = vpop.eup %5446 }
 0x6a2   :  { %5456 = vrcp.f32 %v2779_v55  ;;  %v5449_v27 = vpop.eup %5448  ;;  %v2804_v56 = vadd.f32 1.0, %v5447_v51 }
 0x6a3   :  { %5458 = vrcp.f32 %v2791_v39  ;;  %v2805_v28 = vadd.f32 1.0, %v5449_v27 }
 0x6a4   :  { %5460 = vrcp.f32 %v2804_v56 }
 0x6a5   :  { %5462 = vrcp.f32 %v2805_v28 }
 0x6a9   :  { %v5451_v16 = vpop.eup %5450 }
 0x6aa   :  { %v5453_v60 = vpop.eup %5452  ;;  %v2812_v61 = vmul.f32 %v5451_v16, %v5445_v9  ;;  %v8490_v9 = vld [vmem:[#allocation43_spill] sm:$0xff] }
 0x6ab   :  { %v5455_v53 = vpop.eup %5454  ;;  %v2810_v6 = vmul.f32 %v5453_v60, %v7122_v4 }
 0x6ac   :  { %v5457_v19 = vpop.eup %5456 }
 0x6ad   :  { %v7290_v49 = vadd.f32 %v2812_v61, %v2810_v6  ;;  %v2813_v10 = vmul.f32 %v5457_v19, %v5455_v53  ;;  %v2865_v47 = vpop.f32.mrb[16].mxu0  ;;  %v2908_v43 = vpop.f32.mrb[16].mxu1 }
 0x6ae   :  { %v5459_v63 = vpop.eup %5458  ;;  %v4825_v55 = vadd.f32 %v2865_v47, %v8387_v54  ;;  %v2867_v3 = vpop.f32.mrb[17].mxu0  ;;  %v8491_v47 = vld [vmem:[#allocation44_spill] sm:$0xff] }
 0x6af   :  { %v2910_v39 = vpop.f32.mrb[17].mxu1  ;;  %v2811_v59 = vmul.f32 %v5459_v63, %v7129_v8  ;;  %v4826_v16 = vadd.f32 %v2867_v3, %v8490_v9  ;;  %v2869_v58 = vpop.f32.mrb[18].mxu0  ;;  %5464 = vtanh.f32 %v7290_v49  ;;  %v4857_v63 = vadd.f32 %v2908_v43, %v8491_v47 }
 0x6b0   :  { %v2912_v4 = vpop.f32.mrb[18].mxu1  ;;  %v4673_v51 = vmul.f32 -1.442695, %v4825_v55  ;;  %v4827_v27 = vadd.f32 %v2869_v58, %v8387_v54  ;;  %v2871_v60 = vpop.f32.mrb[19].mxu0  ;;  %v4858_v28 = vadd.f32 %v2910_v39, %v6453_v23 }
 0x6b1   :  { %v2914_v61 = vpop.f32.mrb[19].mxu1  ;;  %v7297_v53 = vadd.f32 %v2813_v10, %v2811_v59  ;;  %v4675_v6 = vmul.f32 -1.442695, %v4826_v16  ;;  %v4828_v19 = vadd.f32 %v2871_v60, %v8490_v9  ;;  %v5461_v58 = vpop.eup %5460 }
 0x6b2   :  { %5466 = vpow2.f32 %v4673_v51  ;;  %v4674_v56 = vmul.f32 -1.442695, %v4827_v27  ;;  %v5463_v55 = vpop.eup %5462  ;;  %v4677_v3 = vmul.f32 -1.442695, %v4858_v28  ;;  %v4860_v59 = vadd.f32 %v2914_v61, %v6453_v23 }
 0x6b3   :  { %5468 = vtanh.f32 %v7297_v53  ;;  %v4676_v8 = vmul.f32 -1.442695, %v4828_v19  ;;  %v4859_v51 = vadd.f32 %v2912_v4, %v8491_v47 }
 0x6b4   :  { %5470 = vpow2.f32 %v4675_v6  ;;  %v4678_v19 = vmul.f32 -1.442695, %v4860_v59 }
 0x6b5   :  { %5472 = vpow2.f32 %v4674_v56 }
 0x6b6   :  { %5474 = vpow2.f32 %v4676_v8 }
 0x6b7   :  { %5476 = vtanh.f32 %v4857_v63 }
 0x6b8   :  { %5478 = vpow2.f32 %v4677_v3 }
 0x6b9   :  { %v5465_v10 = vpop.eup %5464 }
 0x6ba   :  { %v2818_v39 = vmul.f32 %v5465_v10, %v5461_v58 }
 0x6bc   :  { %v5467_v16 = vpop.eup %5466 }
 0x6bd   :  { %v5469_v27 = vpop.eup %5468  ;;  %v2932_v60 = vadd.f32 1.0, %v5467_v16 }
 0x6be   :  { %v5471_v6 = vpop.eup %5470  ;;  %v2819_v56 = vmul.f32 %v5469_v27, %v5463_v55 }
 0x6bf   :  { %5480 = vrcp.f32 %v2932_v60  ;;  %v2944_v8 = vadd.f32 1.0, %v5471_v6  ;;  %v5473_v9 = vpop.eup %5472 }
 0x6c0   :  { %5482 = vtanh.f32 %v4859_v51  ;;  %v7305_v43 = vpack.c.bf16 %v2819_v56, %v2818_v39  ;;  %v2933_v61 = vadd.f32 1.0, %v5473_v9  ;;  %v5475_v28 = vpop.eup %5474 }
 0x6c1   :  { %5484 = vrcp.f32 %v2944_v8  ;;  %v2945_v4 = vadd.f32 1.0, %v5475_v28  ;;  %v5477_v16 = vpop.eup %5476 }
 0x6c2   :  { %5486 = vpow2.f32 %v4678_v19  ;;  %v5479_v63 = vpop.eup %5478 }
 0x6c3   :  { %5488 = vrcp.f32 %v2933_v61  ;;  %v2958_v51 = vadd.f32 1.0, %v5479_v63  ;;  %v7415_v63 = vld [vmem:[#allocation9 + $0xa4] ss:$16 sps:$4 sm:$0xff]  }
 0x6c4   :  { %5490 = vrcp.f32 %v2945_v4  ;;  %8495 = vst [vmem:[#allocation25_spill] sm:$0xff] %v7415_v63 }
 0x6c5   :  { %5492 = vrcp.f32 %v2958_v51  ;;  %v7436_v51 = vld [vmem:[#allocation9 + $0xc8] ss:$16 sps:$4 sm:$0xff]  }
 0x6c6   :  { %8502 = vst [vmem:[#allocation47_spill] sm:$0xff] %v7436_v51 }
 0x6c9   :  { %v5481_v47 = vpop.eup %5480 }
 0x6ca   :  { %v5483_v3 = vpop.eup %5482  ;;  %v2966_v59 = vmul.f32 %v5481_v47, %v5477_v16 }
 0x6cb   :  { %v5485_v58 = vpop.eup %5484 }
 0x6cc   :  { %v5487_v55 = vpop.eup %5486  ;;  %v2964_v10 = vmul.f32 %v5485_v58, %v7140_v44  ;;  %v7424_v58 = vld [vmem:[#allocation9 + $0xa8] ss:$16 sps:$4 sm:$0xff]  }
 0x6cd   :  { %v5489_v27 = vpop.eup %5488  ;;  %v2959_v39 = vadd.f32 1.0, %v5487_v55  ;;  %8498 = vst [vmem:[#allocation28_spill] sm:$0xff] %v7424_v58  ;;  %v7427_v55 = vld [vmem:[#allocation9 + $0xc4] ss:$16 sps:$4 sm:$0xff]  }
 0x6ce   :  { %v7308_v60 = vadd.f32 %v2966_v59, %v2964_v10  ;;  %v2967_v6 = vmul.f32 %v5489_v27, %v5483_v3  ;;  %v5491_v9 = vpop.eup %5490  ;;  %v7418_v3 = vld [vmem:[#allocation9 + $0xac] ss:$16 sps:$4 sm:$0xff]   ;;  %v7421_v59 = vld [vmem:[#allocation9 + $0xa0] ss:$16 sps:$4 sm:$0xff]   ;;  %8499 = vst [vmem:[#allocation29_spill] sm:$0xff] %v7427_v55 }
 0x6cf   :  { %v2965_v19 = vmul.f32 %v5491_v9, %v7144_v38  ;;  %v5493_v47 = vpop.eup %5492  ;;  %v7409_v38 = vld [vmem:[#allocation9 + $0x80] ss:$16 sps:$4 sm:$0xff]   ;;  %8496 = vst [vmem:[#allocation26_spill] sm:$0xff] %v7418_v3  ;;  %8497 = vst [vmem:[#allocation27_spill] sm:$0xff] %v7421_v59  ;;  %v7430_v10 = vld [vmem:[#allocation9 + $0xcc] ss:$16 sps:$4 sm:$0xff]  }
 0x6d0   :  { %5494 = vtanh.f32 %v7308_v60  ;;  %8493 = vst [vmem:[#allocation23_spill] sm:$0xff] %v7409_v38  ;;  %8500 = vst [vmem:[#allocation45_spill] sm:$0xff] %v7430_v10  ;;  %v7433_v27 = vld [vmem:[#allocation9 + $0xc0] ss:$16 sps:$4 sm:$0xff]   ;;  %v7442_v9 = vld [vmem:[#allocation9 + $0xec] ss:$16 sps:$4 sm:$0xff]  }
 0x6d1   :  { %v7312_v56 = vadd.f32 %v2967_v6, %v2965_v19  ;;  %5496 = vrcp.f32 %v2959_v39  ;;  %8501 = vst [vmem:[#allocation46_spill] sm:$0xff] %v7433_v27  ;;  %v7439_v6 = vld [vmem:[#allocation9 + $0xe4] ss:$16 sps:$4 sm:$0xff]   ;;  %8504 = vst [vmem:[#allocation49_spill] sm:$0xff] %v7442_v9  ;;  %v7445_v39 = vld [vmem:[#allocation9 + $0xe0] ss:$16 sps:$4 sm:$0xff]  }
 0x6d2   :  { %8503 = vst [vmem:[#allocation48_spill] sm:$0xff] %v7439_v6  ;;  %8505 = vst [vmem:[#allocation50_spill] sm:$0xff] %v7445_v39  ;;  %v7448_v19 = vld [vmem:[#allocation9 + $0xe8] ss:$16 sps:$4 sm:$0xff]  }
 0x6d3   :  { %5498 = vtanh.f32 %v7312_v56  ;;  %8506 = vst [vmem:[#allocation51_spill] sm:$0xff] %v7448_v19 }
 0x6da   :  { %v5495_v8 = vpop.eup %5494 }
 0x6db   :  { %v5497_v44 = vpop.eup %5496  ;;  %v2972_v28 = vmul.f32 %v5495_v8, %v5493_v47  ;;  %v8507_v47 = vld [vmem:[#allocation57_spill] sm:$0xff]  ;;  %v8508_v8 = vld [vmem:[#allocation58_spill] sm:$0xff] }
 0x6dd   :  { %v5499_v61 = vpop.eup %5498 }
 0x6de   :  { %v2973_v4 = vmul.f32 %v5499_v61, %v5497_v44  ;;  %v8511_v44 = vld [vmem:[#allocation30_spill] sm:$0xff]  ;;  %v8512_v61 = vld [vmem:[#allocation31_spill] sm:$0xff] }
 0x6e0   :  { %v7315_v16 = vpack.c.bf16 %v2973_v4, %v2972_v28  ;;  %v8516_v28 = vld [vmem:[#allocation35_spill] sm:$0xff]  ;;  %v8517_v4 = vld [vmem:[#allocation36_spill] sm:$0xff] }
 0x6e2   :  { %3008 = vmatmul.mubr.bf16.vlgmr.msra.gmra.mrb[48].mxu0 %v7315_v16  ;;  %3051 = vmatmul.mubr.bf16.vlgmr.msra.gmra.mrb[48].mxu1 %v7315_v16 }
 0x6e3   :  { %3062 = vmatpush1.bf16.msra.mxu0 %v6903_v57  ;;  %3105 = vmatpush1.bf16.msra.mxu1 %v6906_v46  ;;  %v7351_v57 = vld [vmem:[#allocation9 + $0x4] ss:$16 sps:$4 sm:$0xff]   ;;  %v7354_v46 = vld [vmem:[#allocation9 + $0xc] ss:$16 sps:$4 sm:$0xff]  }
 0x6e4   :  { %3063 = vmatprep.subr.bf16.mxu0 %v6909_v11  ;;  %3106 = vmatprep.subr.bf16.mxu1 %v6912_v20  ;;  %v7359_v11 = vld [vmem:[#allocation9] ss:$16 sps:$4 sm:$0xff]   ;;  %v7362_v20 = vld [vmem:[#allocation9 + $0x8] ss:$16 sps:$4 sm:$0xff]  }
 0x6e5   :  { %3093 = vmatprep.mubr.bf16.mxu0 %v8291_v52  ;;  %3136 = vmatprep.mubr.bf16.mxu1 %v8291_v52 }
 0x6e7   :  { %3064 = vmatpush1.bf16.msra.mxu0 %v6917_v17  ;;  %3107 = vmatpush1.bf16.msra.mxu1 %v6920_v41  ;;  %v7365_v17 = vld [vmem:[#allocation9 + $0x24] ss:$16 sps:$4 sm:$0xff]   ;;  %v7368_v41 = vld [vmem:[#allocation9 + $0x2c] ss:$16 sps:$4 sm:$0xff]  }
 0x6e8   :  { %3065 = vmatprep.subr.bf16.mxu0 %v6923_v40  ;;  %3108 = vmatprep.subr.bf16.mxu1 %v6926_v14  ;;  %v7373_v40 = vld [vmem:[#allocation9 + $0x20] ss:$16 sps:$4 sm:$0xff]   ;;  %v7376_v14 = vld [vmem:[#allocation9 + $0x28] ss:$16 sps:$4 sm:$0xff]  }
 0x6eb   :  { %3066 = vmatpush1.bf16.msra.mxu0 %v6929_v13  ;;  %3109 = vmatpush1.bf16.msra.mxu1 %v6932_v45  ;;  %v7379_v13 = vld [vmem:[#allocation9 + $0x44] ss:$16 sps:$4 sm:$0xff]   ;;  %v7382_v45 = vld [vmem:[#allocation9 + $0x4c] ss:$16 sps:$4 sm:$0xff]  }
 0x6ec   :  { %3067 = vmatprep.subr.bf16.mxu0 %v6935_v37  ;;  %3110 = vmatprep.subr.bf16.mxu1 %v6938_v12  ;;  %v7385_v37 = vld [vmem:[#allocation9 + $0x40] ss:$16 sps:$4 sm:$0xff]   ;;  %v7388_v12 = vld [vmem:[#allocation9 + $0x48] ss:$16 sps:$4 sm:$0xff]  }
 0x6ef   :  { %3068 = vmatpush1.bf16.msra.mxu0 %v6941_v34  ;;  %3111 = vmatpush1.bf16.msra.mxu1 %v6944_v42  ;;  %v7391_v34 = vld [vmem:[#allocation9 + $0x64] ss:$16 sps:$4 sm:$0xff]   ;;  %v7394_v42 = vld [vmem:[#allocation9 + $0x6c] ss:$16 sps:$4 sm:$0xff]  }
 0x6f0   :  { %3069 = vmatprep.subr.bf16.mxu0 %v6947_v5  ;;  %3112 = vmatprep.subr.bf16.mxu1 %v6950_v29  ;;  %v7397_v5 = vld [vmem:[#allocation9 + $0x60] ss:$16 sps:$4 sm:$0xff]   ;;  %v7400_v29 = vld [vmem:[#allocation9 + $0x68] ss:$16 sps:$4 sm:$0xff]  }
 0x6f3   :  { %3070 = vmatpush1.bf16.msra.mxu0 %v6953_v18  ;;  %3113 = vmatpush1.bf16.msra.mxu1 %v6956_v36  ;;  %v7403_v18 = vld [vmem:[#allocation9 + $0x84] ss:$16 sps:$4 sm:$0xff]   ;;  %v7406_v36 = vld [vmem:[#allocation9 + $0x8c] ss:$16 sps:$4 sm:$0xff]  }
 0x6f4   :  { %3071 = vmatprep.subr.bf16.mxu0 %v7171_v33  ;;  %3114 = vmatprep.subr.bf16.mxu1 %v7174_v21  ;;  %8492 = vst [vmem:[#allocation22_spill] sm:$0xff] %v7406_v36 }
 0x6f7   :  { %3072 = vmatpush1.bf16.msra.mxu0 %v7177_v35  ;;  %3115 = vmatpush1.bf16.msra.mxu1 %v7180_v48 }
 0x6f8   :  { %3073 = vmatprep.subr.bf16.mxu0 %v7183_v31  ;;  %3116 = vmatprep.subr.bf16.mxu1 %v7186_v30 }
 0x6fb   :  { %3074 = vmatpush1.bf16.msra.mxu0 %v7189_v15  ;;  %3117 = vmatpush1.bf16.msra.mxu1 %v7192_v32 }
 0x6fc   :  { %3075 = vmatprep.subr.bf16.mxu0 %v7195_v22  ;;  %3118 = vmatprep.subr.bf16.mxu1 %v7198_v7 }
 0x6ff   :  { %3076 = vmatpush1.bf16.msra.mxu0 %v7201_v50  ;;  %3119 = vmatpush1.bf16.msra.mxu1 %v7204_v0 }
 0x700   :  { %3214 = vmatprep.subr.bf16.mxu0 %v7351_v57  ;;  %3257 = vmatprep.subr.bf16.mxu1 %v7354_v46 }
 0x702   :  { %3094 = vmatmul.mubr.bf16.vlgmr.msra.gmra.mrb[48].mxu0 %v7305_v43  ;;  %3137 = vmatmul.mubr.bf16.vlgmr.msra.gmra.mrb[48].mxu1 %v7305_v43  ;;  %v7412_v43 = vld [vmem:[#allocation9 + $0x88] ss:$16 sps:$4 sm:$0xff]  }
 0x703   :  { %3215 = vmatpush1.bf16.msra.mxu0 %v7359_v11  ;;  %3258 = vmatpush1.bf16.msra.mxu1 %v7362_v20  ;;  %8494 = vst [vmem:[#allocation24_spill] sm:$0xff] %v7412_v43 }
 0x704   :  { %3216 = vmatprep.subr.bf16.mxu0 %v7365_v17  ;;  %3259 = vmatprep.subr.bf16.mxu1 %v7368_v41 }
 0x705   :  { %3246 = vmatprep.mubr.bf16.mxu0 %v8291_v52  ;;  %3289 = vmatprep.mubr.bf16.mxu1 %v8291_v52 }
 0x707   :  { %3217 = vmatpush1.bf16.msra.mxu0 %v7373_v40  ;;  %3260 = vmatpush1.bf16.msra.mxu1 %v7376_v14 }
 0x708   :  { %3218 = vmatprep.subr.bf16.mxu0 %v7379_v13  ;;  %3261 = vmatprep.subr.bf16.mxu1 %v7382_v45 }
 0x70b   :  { %3219 = vmatpush1.bf16.msra.mxu0 %v7385_v37  ;;  %3262 = vmatpush1.bf16.msra.mxu1 %v7388_v12 }
 0x70c   :  { %3220 = vmatprep.subr.bf16.mxu0 %v7391_v34  ;;  %3263 = vmatprep.subr.bf16.mxu1 %v7394_v42 }
 0x70f   :  { %3221 = vmatpush1.bf16.msra.mxu0 %v7397_v5  ;;  %3264 = vmatpush1.bf16.msra.mxu1 %v7400_v29 }
 0x710   :  { %3222 = vmatprep.subr.bf16.mxu0 %v7403_v18  ;;  %3265 = vmatprep.subr.bf16.mxu1 %v7406_v36 }
 0x713   :  { %3223 = vmatpush1.bf16.msra.mxu0 %v7409_v38  ;;  %3266 = vmatpush1.bf16.msra.mxu1 %v7412_v43 }
 0x714   :  { %3224 = vmatprep.subr.bf16.mxu0 %v7415_v63  ;;  %3267 = vmatprep.subr.bf16.mxu1 %v7418_v3 }
 0x717   :  { %3225 = vmatpush1.bf16.msra.mxu0 %v7421_v59  ;;  %3268 = vmatpush1.bf16.msra.mxu1 %v7424_v58 }
 0x718   :  { %3226 = vmatprep.subr.bf16.mxu0 %v7427_v55  ;;  %3269 = vmatprep.subr.bf16.mxu1 %v7430_v10 }
 0x71b   :  { %3227 = vmatpush1.bf16.msra.mxu0 %v7433_v27  ;;  %3270 = vmatpush1.bf16.msra.mxu1 %v7436_v51  ;;  %v8537_v27 = vld [vmem:[#allocation19_spill] sm:$0xff] }
 0x71c   :  { %3228 = vmatprep.subr.bf16.mxu0 %v7439_v6  ;;  %3271 = vmatprep.subr.bf16.mxu1 %v7442_v9 }
 0x71f   :  { %3229 = vmatpush1.bf16.msra.mxu0 %v7445_v39  ;;  %3272 = vmatpush1.bf16.msra.mxu1 %v7448_v19 }
 0x720   :  { %3358 = vmatprep.subr.bf16.mxu0 %v8453_v25  ;;  %3401 = vmatprep.subr.bf16.mxu1 %v8454_v26  ;;  %v8509_v25 = vld [vmem:[#allocation59_spill] sm:$0xff]  ;;  %v8510_v26 = vld [vmem:[#allocation60_spill] sm:$0xff] }
 0x722   :  { %3247 = vmatmul.mubr.bf16.vlgmr.msra.gmra.mrb[20].mxu0 %v7315_v16  ;;  %3290 = vmatmul.mubr.bf16.vlgmr.msra.gmra.mrb[20].mxu1 %v7315_v16  ;;  %v8518_v16 = vld [vmem:[#allocation37_spill] sm:$0xff] }
 0x723   :  { %3359 = vmatpush1.bf16.msra.mxu0 %v8455_v1  ;;  %3402 = vmatpush1.bf16.msra.mxu1 %v8456_v24  ;;  %v8513_v1 = vld [vmem:[#allocation32_spill] sm:$0xff]  ;;  %v8514_v24 = vld [vmem:[#allocation33_spill] sm:$0xff] }
 0x724   :  { %3360 = vmatprep.subr.bf16.mxu0 %v8457_v62  ;;  %3403 = vmatprep.subr.bf16.mxu1 %v8507_v47  ;;  %v8515_v62 = vld [vmem:[#allocation34_spill] sm:$0xff] }
 0x725   :  { %3390 = vmatprep.mubr.bf16.mxu0 %v8291_v52  ;;  %3433 = vmatprep.mubr.bf16.mxu1 %v8291_v52  ;;  %v8519_v47 = vld [vmem:[#allocation38_spill] sm:$0xff] }
 0x727   :  { %3361 = vmatpush1.bf16.msra.mxu0 %v8508_v8  ;;  %3404 = vmatpush1.bf16.msra.mxu1 %v8509_v25  ;;  %v8520_v8 = vld [vmem:[#allocation39_spill] sm:$0xff]  ;;  %v8521_v25 = vld [vmem:[#allocation40_spill] sm:$0xff] }
 0x728   :  { %3362 = vmatprep.subr.bf16.mxu0 %v8510_v26  ;;  %3405 = vmatprep.subr.bf16.mxu1 %v8511_v44  ;;  %v8522_v26 = vld [vmem:[#allocation41_spill] sm:$0xff]  ;;  %v8523_v44 = vld [vmem:[#allocation42_spill] sm:$0xff] }
 0x72b   :  { %3363 = vmatpush1.bf16.msra.mxu0 %v8512_v61  ;;  %3406 = vmatpush1.bf16.msra.mxu1 %v8513_v1  ;;  %v8524_v61 = vld [vmem:[#allocation21_spill] sm:$0xff] }
 0x72c   :  { %3364 = vmatprep.subr.bf16.mxu0 %v8514_v24  ;;  %3407 = vmatprep.subr.bf16.mxu1 %v8515_v62  ;;  %v8525_v1 = vld [vmem:[#allocation61_spill] sm:$0xff]  ;;  %v8526_v24 = vld [vmem:[#allocation62_spill] sm:$0xff]  ;;  %v8527_v62 = vld [vmem:[#allocation63_spill] sm:$0xff] }
 0x72f   :  { %3365 = vmatpush1.bf16.msra.mxu0 %v8516_v28  ;;  %3408 = vmatpush1.bf16.msra.mxu1 %v8517_v4  ;;  %v8528_v28 = vld [vmem:[#allocation64_spill] sm:$0xff]  ;;  %v8529_v4 = vld [vmem:[#allocation65_spill] sm:$0xff] }
 0x730   :  { %3366 = vmatprep.subr.bf16.mxu0 %v8518_v16  ;;  %3409 = vmatprep.subr.bf16.mxu1 %v8519_v47  ;;  %v8530_v16 = vld [vmem:[#allocation66_spill] sm:$0xff]  ;;  %v8531_v47 = vld [vmem:[#allocation67_spill] sm:$0xff] }
 0x733   :  { %3367 = vmatpush1.bf16.msra.mxu0 %v8520_v8  ;;  %3410 = vmatpush1.bf16.msra.mxu1 %v8521_v25  ;;  %v8532_v8 = vld [vmem:[#allocation68_spill] sm:$0xff]  ;;  %v8533_v25 = vld [vmem:[#allocation69_spill] sm:$0xff] }
 0x734   :  { %3368 = vmatprep.subr.bf16.mxu0 %v8522_v26  ;;  %3411 = vmatprep.subr.bf16.mxu1 %v8523_v44  ;;  %v8534_v26 = vld [vmem:[#allocation70_spill] sm:$0xff]  ;;  %v8535_v44 = vld [vmem:[#allocation71_spill] sm:$0xff] }
 0x737   :  { %3369 = vmatpush1.bf16.msra.mxu0 %v8524_v61  ;;  %3412 = vmatpush1.bf16.msra.mxu1 %v8525_v1 }
 0x738   :  { %3370 = vmatprep.subr.bf16.mxu0 %v8526_v24  ;;  %3413 = vmatprep.subr.bf16.mxu1 %v8527_v62  ;;  %v8536_v24 = vld [vmem:[#allocation18_spill] sm:$0xff] }
 0x73b   :  { %3371 = vmatpush1.bf16.msra.mxu0 %v8528_v28  ;;  %3414 = vmatpush1.bf16.msra.mxu1 %v8529_v4 }
 0x73c   :  { %3372 = vmatprep.subr.bf16.mxu0 %v8530_v16  ;;  %3415 = vmatprep.subr.bf16.mxu1 %v8531_v47 }
 0x73f   :  { %3373 = vmatpush1.bf16.msra.mxu0 %v8532_v8  ;;  %3416 = vmatpush1.bf16.msra.mxu1 %v8533_v25 }
 0x740   :  { %3444 = vmatprep.subr.bf16.mxu0 %v8534_v26  ;;  %3487 = vmatprep.subr.bf16.mxu1 %v8535_v44 }
 0x7d5   :  { %v3095_v61 = vpop.f32.mrb[48].mxu0  ;;  %v3138_v1 = vpop.f32.mrb[48].mxu1 }
 0x7d6   :  { %v3147_v62 = vadd.f32 %v3095_v61, %v8536_v24  ;;  %v3097_v19 = vpop.f32.mrb[49].mxu0  ;;  %v3140_v28 = vpop.f32.mrb[49].mxu1 }
 0x7d7   :  { %v3148_v4 = vadd.f32 %v3097_v19, %v6649_v2  ;;  %v3099_v39 = vpop.f32.mrb[50].mxu0  ;;  %v3142_v16 = vpop.f32.mrb[50].mxu1  ;;  %v3150_v61 = vadd.f32 %v3140_v28, %v8537_v27  ;;  %v8538_v19 = vld [vmem:[#allocation20_spill] sm:$0xff] }
 0x7d8   :  { %v4679_v9 = vmul.f32 -1.442695, %v3147_v62  ;;  %v3151_v47 = vadd.f32 %v3099_v39, %v8536_v24  ;;  %v3101_v8 = vpop.f32.mrb[51].mxu0  ;;  %v3144_v6 = vpop.f32.mrb[51].mxu1  ;;  %v3149_v55 = vadd.f32 %v3138_v1, %v8538_v19 }
 0x7d9   :  { %v4681_v25 = vmul.f32 -1.442695, %v3148_v4  ;;  %v3152_v26 = vadd.f32 %v3101_v8, %v6649_v2  ;;  %v3154_v10 = vadd.f32 %v3144_v6, %v8537_v27  ;;  %v4683_v62 = vmul.f32 -1.442695, %v3150_v61 }
 0x7da   :  { %5500 = vpow2.f32 %v4679_v9  ;;  %v4680_v44 = vmul.f32 -1.442695, %v3151_v47  ;;  %v3153_v9 = vadd.f32 %v3142_v16, %v8538_v19 }
 0x7db   :  { %5502 = vpow2.f32 %v4681_v25  ;;  %v4682_v51 = vmul.f32 -1.442695, %v3152_v26  ;;  %v4684_v58 = vmul.f32 -1.442695, %v3154_v10 }
 0x7dc   :  { %5504 = vpow2.f32 %v4680_v44 }
 0x7dd   :  { %5506 = vpow2.f32 %v4682_v51 }
 0x7de   :  { %5508 = vtanh.f32 %v3149_v55 }
 0x7df   :  { %5510 = vpow2.f32 %v4683_v62 }
 0x7e0   :  { %5512 = vpow2.f32 %v4684_v58 }
 0x7e4   :  { %v5501_v39 = vpop.eup %5500 }
 0x7e5   :  { %v5503_v24 = vpop.eup %5502  ;;  %v3161_v4 = vadd.f32 1.0, %v5501_v39 }
 0x7e6   :  { %v3173_v47 = vadd.f32 1.0, %v5503_v24  ;;  %v5505_v8 = vpop.eup %5504 }
 0x7e7   :  { %5514 = vrcp.f32 %v3161_v4  ;;  %v3162_v28 = vadd.f32 1.0, %v5505_v8  ;;  %v5507_v25 = vpop.eup %5506 }
 0x7e8   :  { %5516 = vrcp.f32 %v3173_v47  ;;  %v3174_v51 = vadd.f32 1.0, %v5507_v25  ;;  %v5509_v6 = vpop.eup %5508 }
 0x7e9   :  { %5518 = vtanh.f32 %v3153_v9  ;;  %v5511_v10 = vpop.eup %5510 }
 0x7ea   :  { %5520 = vrcp.f32 %v3162_v28  ;;  %v5513_v1 = vpop.eup %5512  ;;  %v3187_v24 = vadd.f32 1.0, %v5511_v10 }
 0x7eb   :  { %5522 = vrcp.f32 %v3174_v51  ;;  %v3188_v62 = vadd.f32 1.0, %v5513_v1 }
 0x7ec   :  { %5524 = vrcp.f32 %v3187_v24 }
 0x7ed   :  { %5526 = vrcp.f32 %v3188_v62 }
 0x7f1   :  { %v5515_v55 = vpop.eup %5514 }
 0x7f2   :  { %v5517_v26 = vpop.eup %5516  ;;  %v3195_v44 = vmul.f32 %v5515_v55, %v5509_v6  ;;  %v8539_v6 = vld [vmem:[#allocation43_spill] sm:$0xff] }
 0x7f3   :  { %v5519_v61 = vpop.eup %5518  ;;  %v3193_v16 = vmul.f32 %v5517_v26, %v7290_v49 }
 0x7f4   :  { %v5521_v58 = vpop.eup %5520 }
 0x7f5   :  { %v7498_v39 = vadd.f32 %v3195_v44, %v3193_v16  ;;  %v3196_v4 = vmul.f32 %v5521_v58, %v5519_v61  ;;  %v3248_v47 = vpop.f32.mrb[20].mxu0  ;;  %v3291_v9 = vpop.f32.mrb[20].mxu1 }
 0x7f6   :  { %v5523_v8 = vpop.eup %5522  ;;  %v4829_v28 = vadd.f32 %v3248_v47, %v8387_v54  ;;  %v3250_v25 = vpop.f32.mrb[21].mxu0  ;;  %v8540_v47 = vld [vmem:[#allocation44_spill] sm:$0xff] }
 0x7f7   :  { %v3293_v51 = vpop.f32.mrb[21].mxu1  ;;  %v3194_v19 = vmul.f32 %v5523_v8, %v7297_v53  ;;  %v4830_v55 = vadd.f32 %v3250_v25, %v8539_v6  ;;  %v3252_v27 = vpop.f32.mrb[22].mxu0  ;;  %5528 = vtanh.f32 %v7498_v39  ;;  %v4861_v8 = vadd.f32 %v3291_v9, %v8540_v47 }
 0x7f8   :  { %v3295_v49 = vpop.f32.mrb[22].mxu1  ;;  %v4685_v10 = vmul.f32 -1.442695, %v4829_v28  ;;  %v4831_v1 = vadd.f32 %v3252_v27, %v8387_v54  ;;  %v3254_v26 = vpop.f32.mrb[23].mxu0  ;;  %v4862_v62 = vadd.f32 %v3293_v51, %v6453_v23 }
 0x7f9   :  { %v3297_v44 = vpop.f32.mrb[23].mxu1  ;;  %v7505_v61 = vadd.f32 %v3196_v4, %v3194_v19  ;;  %v4687_v16 = vmul.f32 -1.442695, %v4830_v55  ;;  %v4832_v58 = vadd.f32 %v3254_v26, %v8539_v6  ;;  %v5525_v27 = vpop.eup %5524 }
 0x7fa   :  { %5530 = vpow2.f32 %v4685_v10  ;;  %v4686_v24 = vmul.f32 -1.442695, %v4831_v1  ;;  %v5527_v28 = vpop.eup %5526  ;;  %v4689_v25 = vmul.f32 -1.442695, %v4862_v62  ;;  %v4864_v19 = vadd.f32 %v3297_v44, %v6453_v23 }
 0x7fb   :  { %5532 = vtanh.f32 %v7505_v61  ;;  %v4688_v53 = vmul.f32 -1.442695, %v4832_v58  ;;  %v4863_v10 = vadd.f32 %v3295_v49, %v8540_v47 }
 0x7fc   :  { %5534 = vpow2.f32 %v4687_v16  ;;  %v4690_v58 = vmul.f32 -1.442695, %v4864_v19 }
 0x7fd   :  { %5536 = vpow2.f32 %v4686_v24 }
 0x7fe   :  { %5538 = vpow2.f32 %v4688_v53 }
 0x7ff   :  { %5540 = vtanh.f32 %v4861_v8 }
 0x800   :  { %5542 = vpow2.f32 %v4689_v25 }
 0x801   :  { %v5529_v4 = vpop.eup %5528 }
 0x802   :  { %v3201_v51 = vmul.f32 %v5529_v4, %v5525_v27 }
 0x804   :  { %v5531_v55 = vpop.eup %5530 }
 0x805   :  { %v5533_v1 = vpop.eup %5532  ;;  %v3315_v26 = vadd.f32 1.0, %v5531_v55 }
 0x806   :  { %v5535_v16 = vpop.eup %5534  ;;  %v3202_v24 = vmul.f32 %v5533_v1, %v5527_v28 }
 0x807   :  { %5544 = vrcp.f32 %v3315_v26  ;;  %v3327_v53 = vadd.f32 1.0, %v5535_v16  ;;  %v5537_v6 = vpop.eup %5536 }
 0x808   :  { %5546 = vtanh.f32 %v4863_v10  ;;  %v7513_v9 = vpack.c.bf16 %v3202_v24, %v3201_v51  ;;  %v3316_v44 = vadd.f32 1.0, %v5537_v6  ;;  %v5539_v62 = vpop.eup %5538 }
 0x809   :  { %5548 = vrcp.f32 %v3327_v53  ;;  %v3328_v49 = vadd.f32 1.0, %v5539_v62  ;;  %v5541_v55 = vpop.eup %5540 }
 0x80a   :  { %5550 = vpow2.f32 %v4690_v58  ;;  %v5543_v8 = vpop.eup %5542 }
 0x80b   :  { %5552 = vrcp.f32 %v3316_v44  ;;  %v3341_v10 = vadd.f32 1.0, %v5543_v8  ;;  %v7530_v8 = vld [vmem:[#allocation12 + $0x8] ss:$16 sps:$4 sm:$0xff]  }
 0x80c   :  { %5554 = vrcp.f32 %v3328_v49 }
 0x80d   :  { %5556 = vrcp.f32 %v3341_v10  ;;  %v7553_v10 = vld [vmem:[#allocation12 + $0x40] ss:$16 sps:$4 sm:$0xff]  }
 0x811   :  { %v5545_v47 = vpop.eup %5544 }
 0x812   :  { %v5547_v25 = vpop.eup %5546  ;;  %v3349_v19 = vmul.f32 %v5545_v47, %v5541_v55 }
 0x813   :  { %v5549_v27 = vpop.eup %5548 }
 0x814   :  { %v5551_v28 = vpop.eup %5550  ;;  %v3347_v4 = vmul.f32 %v5549_v27, %v7308_v60  ;;  %v7541_v27 = vld [vmem:[#allocation12 + $0x20] ss:$16 sps:$4 sm:$0xff]  }
 0x815   :  { %v5553_v1 = vpop.eup %5552  ;;  %v3342_v51 = vadd.f32 1.0, %v5551_v28  ;;  %v7544_v28 = vld [vmem:[#allocation12 + $0x28] ss:$16 sps:$4 sm:$0xff]  }
 0x816   :  { %v7516_v26 = vadd.f32 %v3349_v19, %v3347_v4  ;;  %v3350_v16 = vmul.f32 %v5553_v1, %v5547_v25  ;;  %v5555_v6 = vpop.eup %5554  ;;  %v7533_v25 = vld [vmem:[#allocation12 + $0x24] ss:$16 sps:$4 sm:$0xff]   ;;  %v7536_v19 = vld [vmem:[#allocation12 + $0x2c] ss:$16 sps:$4 sm:$0xff]  }
 0x817   :  { %v3348_v58 = vmul.f32 %v5555_v6, %v7312_v56  ;;  %v5557_v47 = vpop.eup %5556  ;;  %v7527_v56 = vld [vmem:[#allocation12] ss:$16 sps:$4 sm:$0xff]   ;;  %v7547_v4 = vld [vmem:[#allocation12 + $0x44] ss:$16 sps:$4 sm:$0xff]   ;;  %v7550_v1 = vld [vmem:[#allocation12 + $0x4c] ss:$16 sps:$4 sm:$0xff]  }
 0x818   :  { %5558 = vtanh.f32 %v7516_v26  ;;  %v7559_v6 = vld [vmem:[#allocation12 + $0x64] ss:$16 sps:$4 sm:$0xff]  }
 0x819   :  { %v7520_v24 = vadd.f32 %v3350_v16, %v3348_v58  ;;  %5560 = vrcp.f32 %v3342_v51  ;;  %v7556_v16 = vld [vmem:[#allocation12 + $0x48] ss:$16 sps:$4 sm:$0xff]   ;;  %v7562_v51 = vld [vmem:[#allocation12 + $0x6c] ss:$16 sps:$4 sm:$0xff]   ;;  %v7565_v58 = vld [vmem:[#allocation12 + $0x60] ss:$16 sps:$4 sm:$0xff]  }
 0x81b   :  { %5562 = vtanh.f32 %v7520_v24 }
 0x822   :  { %v5559_v53 = vpop.eup %5558 }
 0x823   :  { %v5561_v60 = vpop.eup %5560  ;;  %v3355_v62 = vmul.f32 %v5559_v53, %v5557_v47  ;;  %v7568_v47 = vld [vmem:[#allocation12 + $0x68] ss:$16 sps:$4 sm:$0xff]   ;;  %v7571_v53 = vld [vmem:[#allocation12 + $0x84] ss:$16 sps:$4 sm:$0xff]  }
 0x825   :  { %v5563_v44 = vpop.eup %5562 }
 0x826   :  { %v3356_v49 = vmul.f32 %v5563_v44, %v5561_v60  ;;  %v7574_v60 = vld [vmem:[#allocation12 + $0x8c] ss:$16 sps:$4 sm:$0xff]   ;;  %v7577_v44 = vld [vmem:[#allocation12 + $0x80] ss:$16 sps:$4 sm:$0xff]  }
 0x828   :  { %v7523_v55 = vpack.c.bf16 %v3356_v49, %v3355_v62  ;;  %v7580_v62 = vld [vmem:[#allocation12 + $0x88] ss:$16 sps:$4 sm:$0xff]   ;;  %v7645_v49 = vld [vmem:[#allocation11 + $0x24] ss:$16 sps:$4 sm:$0xff]  }
 0x829   :  { %8554 = vst [vmem:[#allocation56_spill] sm:$0xff] %v7645_v49 }
 0x82a   :  { %3391 = vmatmul.mubr.bf16.vlgmr.msra.gmra.mrb[52].mxu0 %v7523_v55  ;;  %3434 = vmatmul.mubr.bf16.vlgmr.msra.gmra.mrb[52].mxu1 %v7523_v55 }
 0x82b   :  { %3445 = vmatpush1.bf16.msra.mxu0 %v7527_v56  ;;  %3488 = vmatpush1.bf16.msra.mxu1 %v7530_v8 }
 0x82c   :  { %3446 = vmatprep.subr.bf16.mxu0 %v7533_v25  ;;  %3489 = vmatprep.subr.bf16.mxu1 %v7536_v19 }
 0x82d   :  { %3476 = vmatprep.mubr.bf16.mxu0 %v8291_v52  ;;  %3519 = vmatprep.mubr.bf16.mxu1 %v8291_v52 }
 0x82f   :  { %3447 = vmatpush1.bf16.msra.mxu0 %v7541_v27  ;;  %3490 = vmatpush1.bf16.msra.mxu1 %v7544_v28 }
 0x830   :  { %3448 = vmatprep.subr.bf16.mxu0 %v7547_v4  ;;  %3491 = vmatprep.subr.bf16.mxu1 %v7550_v1 }
 0x833   :  { %3449 = vmatpush1.bf16.msra.mxu0 %v7553_v10  ;;  %3492 = vmatpush1.bf16.msra.mxu1 %v7556_v16 }
 0x834   :  { %3450 = vmatprep.subr.bf16.mxu0 %v7559_v6  ;;  %3493 = vmatprep.subr.bf16.mxu1 %v7562_v51 }
 0x837   :  { %3451 = vmatpush1.bf16.msra.mxu0 %v7565_v58  ;;  %3494 = vmatpush1.bf16.msra.mxu1 %v7568_v47 }
 0x838   :  { %3452 = vmatprep.subr.bf16.mxu0 %v7571_v53  ;;  %3495 = vmatprep.subr.bf16.mxu1 %v7574_v60 }
 0x83b   :  { %3453 = vmatpush1.bf16.msra.mxu0 %v7577_v44  ;;  %3496 = vmatpush1.bf16.msra.mxu1 %v7580_v62 }
 0x83c   :  { %3454 = vmatprep.subr.bf16.mxu0 %v7171_v33  ;;  %3497 = vmatprep.subr.bf16.mxu1 %v7174_v21  ;;  %v8541_v33 = vld [vmem:[#allocation28_spill] sm:$0xff]  ;;  %v8542_v21 = vld [vmem:[#allocation29_spill] sm:$0xff] }
 0x83f   :  { %3455 = vmatpush1.bf16.msra.mxu0 %v7177_v35  ;;  %3498 = vmatpush1.bf16.msra.mxu1 %v7180_v48  ;;  %v8543_v35 = vld [vmem:[#allocation45_spill] sm:$0xff]  ;;  %v8544_v48 = vld [vmem:[#allocation46_spill] sm:$0xff] }
 0x840   :  { %3456 = vmatprep.subr.bf16.mxu0 %v7183_v31  ;;  %3499 = vmatprep.subr.bf16.mxu1 %v7186_v30  ;;  %v8545_v31 = vld [vmem:[#allocation47_spill] sm:$0xff]  ;;  %v8546_v30 = vld [vmem:[#allocation48_spill] sm:$0xff] }
 0x843   :  { %3457 = vmatpush1.bf16.msra.mxu0 %v7189_v15  ;;  %3500 = vmatpush1.bf16.msra.mxu1 %v7192_v32  ;;  %v8547_v15 = vld [vmem:[#allocation49_spill] sm:$0xff]  ;;  %v8548_v32 = vld [vmem:[#allocation50_spill] sm:$0xff] }
 0x844   :  { %3458 = vmatprep.subr.bf16.mxu0 %v7195_v22  ;;  %3501 = vmatprep.subr.bf16.mxu1 %v7198_v7  ;;  %v8549_v22 = vld [vmem:[#allocation51_spill] sm:$0xff]  ;;  %v7631_v7 = vld [vmem:[#allocation11 + $0x4] ss:$16 sps:$4 sm:$0xff]  }
 0x845   :  { %8550 = vst [vmem:[#allocation52_spill] sm:$0xff] %v7631_v7 }
 0x847   :  { %3459 = vmatpush1.bf16.msra.mxu0 %v7201_v50  ;;  %3502 = vmatpush1.bf16.msra.mxu1 %v7204_v0  ;;  %v7634_v50 = vld [vmem:[#allocation11 + $0xc] ss:$16 sps:$4 sm:$0xff]   ;;  %v7639_v0 = vld [vmem:[#allocation11] ss:$16 sps:$4 sm:$0xff]  }
 0x848   :  { %3597 = vmatprep.subr.bf16.mxu0 %v7351_v57  ;;  %3640 = vmatprep.subr.bf16.mxu1 %v7354_v46  ;;  %8551 = vst [vmem:[#allocation53_spill] sm:$0xff] %v7634_v50  ;;  %8552 = vst [vmem:[#allocation54_spill] sm:$0xff] %v7639_v0 }
 0x84a   :  { %3477 = vmatmul.mubr.bf16.vlgmr.msra.gmra.mrb[52].mxu0 %v7513_v9  ;;  %3520 = vmatmul.mubr.bf16.vlgmr.msra.gmra.mrb[52].mxu1 %v7513_v9  ;;  %v7642_v9 = vld [vmem:[#allocation11 + $0x8] ss:$16 sps:$4 sm:$0xff]  }
 0x84b   :  { %3598 = vmatpush1.bf16.msra.mxu0 %v7359_v11  ;;  %3641 = vmatpush1.bf16.msra.mxu1 %v7362_v20  ;;  %8553 = vst [vmem:[#allocation55_spill] sm:$0xff] %v7642_v9 }
 0x84c   :  { %3599 = vmatprep.subr.bf16.mxu0 %v7365_v17  ;;  %3642 = vmatprep.subr.bf16.mxu1 %v7368_v41 }
 0x84d   :  { %3629 = vmatprep.mubr.bf16.mxu0 %v8291_v52  ;;  %3672 = vmatprep.mubr.bf16.mxu1 %v8291_v52 }
 0x84f   :  { %3600 = vmatpush1.bf16.msra.mxu0 %v7373_v40  ;;  %3643 = vmatpush1.bf16.msra.mxu1 %v7376_v14 }
 0x850   :  { %3601 = vmatprep.subr.bf16.mxu0 %v7379_v13  ;;  %3644 = vmatprep.subr.bf16.mxu1 %v7382_v45 }
 0x853   :  { %3602 = vmatpush1.bf16.msra.mxu0 %v7385_v37  ;;  %3645 = vmatpush1.bf16.msra.mxu1 %v7388_v12 }
 0x854   :  { %3603 = vmatprep.subr.bf16.mxu0 %v7391_v34  ;;  %3646 = vmatprep.subr.bf16.mxu1 %v7394_v42 }
 0x857   :  { %3604 = vmatpush1.bf16.msra.mxu0 %v7397_v5  ;;  %3647 = vmatpush1.bf16.msra.mxu1 %v7400_v29 }
 0x858   :  { %3605 = vmatprep.subr.bf16.mxu0 %v7403_v18  ;;  %3648 = vmatprep.subr.bf16.mxu1 %v7406_v36 }
 0x85b   :  { %3606 = vmatpush1.bf16.msra.mxu0 %v7409_v38  ;;  %3649 = vmatpush1.bf16.msra.mxu1 %v7412_v43 }
 0x85c   :  { %3607 = vmatprep.subr.bf16.mxu0 %v7415_v63  ;;  %3650 = vmatprep.subr.bf16.mxu1 %v7418_v3  ;;  %v8585_v63 = vld [vmem:[#allocation19_spill] sm:$0xff] }
 0x85f   :  { %3608 = vmatpush1.bf16.msra.mxu0 %v7421_v59  ;;  %3651 = vmatpush1.bf16.msra.mxu1 %v8541_v33 }
 0x860   :  { %3609 = vmatprep.subr.bf16.mxu0 %v8542_v21  ;;  %3652 = vmatprep.subr.bf16.mxu1 %v8543_v35 }
 0x863   :  { %3610 = vmatpush1.bf16.msra.mxu0 %v8544_v48  ;;  %3653 = vmatpush1.bf16.msra.mxu1 %v8545_v31 }
 0x864   :  { %3611 = vmatprep.subr.bf16.mxu0 %v8546_v30  ;;  %3654 = vmatprep.subr.bf16.mxu1 %v8547_v15 }
 0x867   :  { %3612 = vmatpush1.bf16.msra.mxu0 %v8548_v32  ;;  %3655 = vmatpush1.bf16.msra.mxu1 %v8549_v22  ;;  %v8584_v32 = vld [vmem:[#allocation18_spill] sm:$0xff] }
 0x868   :  { %3741 = vmatprep.subr.bf16.mxu0 %v7631_v7  ;;  %3784 = vmatprep.subr.bf16.mxu1 %v7634_v50  ;;  %v7648_v7 = vld [vmem:[#allocation11 + $0x2c] ss:$16 sps:$4 sm:$0xff]   ;;  %v7668_v50 = vld [vmem:[#allocation11 + $0x48] ss:$16 sps:$4 sm:$0xff]  }
 0x869   :  { %8555 = vst [vmem:[#allocation57_spill] sm:$0xff] %v7648_v7  ;;  %8561 = vst [vmem:[#allocation32_spill] sm:$0xff] %v7668_v50 }
 0x86a   :  { %3630 = vmatmul.mubr.bf16.vlgmr.msra.gmra.mrb[24].mxu0 %v7523_v55  ;;  %3673 = vmatmul.mubr.bf16.vlgmr.msra.gmra.mrb[24].mxu1 %v7523_v55  ;;  %v7653_v55 = vld [vmem:[#allocation11 + $0x20] ss:$16 sps:$4 sm:$0xff]  }
 0x86b   :  { %3742 = vmatpush1.bf16.msra.mxu0 %v7639_v0  ;;  %3785 = vmatpush1.bf16.msra.mxu1 %v7642_v9  ;;  %8556 = vst [vmem:[#allocation58_spill] sm:$0xff] %v7653_v55  ;;  %v7656_v0 = vld [vmem:[#allocation11 + $0x28] ss:$16 sps:$4 sm:$0xff]   ;;  %v7659_v9 = vld [vmem:[#allocation11 + $0x44] ss:$16 sps:$4 sm:$0xff]  }
 0x86c   :  { %3743 = vmatprep.subr.bf16.mxu0 %v7645_v49  ;;  %3786 = vmatprep.subr.bf16.mxu1 %v7648_v7  ;;  %8557 = vst [vmem:[#allocation59_spill] sm:$0xff] %v7656_v0  ;;  %8558 = vst [vmem:[#allocation60_spill] sm:$0xff] %v7659_v9  ;;  %v7662_v49 = vld [vmem:[#allocation11 + $0x4c] ss:$16 sps:$4 sm:$0xff]   ;;  %v7665_v7 = vld [vmem:[#allocation11 + $0x40] ss:$16 sps:$4 sm:$0xff]  }
 0x86d   :  { %3773 = vmatprep.mubr.bf16.mxu0 %v8291_v52  ;;  %3816 = vmatprep.mubr.bf16.mxu1 %v8291_v52  ;;  %8559 = vst [vmem:[#allocation30_spill] sm:$0xff] %v7662_v49  ;;  %8560 = vst [vmem:[#allocation31_spill] sm:$0xff] %v7665_v7 }
 0x86f   :  { %3744 = vmatpush1.bf16.msra.mxu0 %v7653_v55  ;;  %3787 = vmatpush1.bf16.msra.mxu1 %v7656_v0  ;;  %v7671_v55 = vld [vmem:[#allocation11 + $0x64] ss:$16 sps:$4 sm:$0xff]   ;;  %v7674_v0 = vld [vmem:[#allocation11 + $0x6c] ss:$16 sps:$4 sm:$0xff]  }
 0x870   :  { %3745 = vmatprep.subr.bf16.mxu0 %v7659_v9  ;;  %3788 = vmatprep.subr.bf16.mxu1 %v7662_v49  ;;  %8562 = vst [vmem:[#allocation33_spill] sm:$0xff] %v7671_v55  ;;  %8563 = vst [vmem:[#allocation34_spill] sm:$0xff] %v7674_v0  ;;  %v7677_v9 = vld [vmem:[#allocation11 + $0x60] ss:$16 sps:$4 sm:$0xff]   ;;  %v7680_v49 = vld [vmem:[#allocation11 + $0x68] ss:$16 sps:$4 sm:$0xff]  }
 0x871   :  { %8564 = vst [vmem:[#allocation35_spill] sm:$0xff] %v7677_v9  ;;  %8565 = vst [vmem:[#allocation36_spill] sm:$0xff] %v7680_v49 }
 0x873   :  { %3746 = vmatpush1.bf16.msra.mxu0 %v7665_v7  ;;  %3789 = vmatpush1.bf16.msra.mxu1 %v7668_v50  ;;  %v7683_v7 = vld [vmem:[#allocation11 + $0x84] ss:$16 sps:$4 sm:$0xff]   ;;  %v7686_v50 = vld [vmem:[#allocation11 + $0x8c] ss:$16 sps:$4 sm:$0xff]  }
 0x874   :  { %3747 = vmatprep.subr.bf16.mxu0 %v7671_v55  ;;  %3790 = vmatprep.subr.bf16.mxu1 %v7674_v0  ;;  %8566 = vst [vmem:[#allocation37_spill] sm:$0xff] %v7683_v7  ;;  %8567 = vst [vmem:[#allocation38_spill] sm:$0xff] %v7686_v50  ;;  %v7689_v55 = vld [vmem:[#allocation11 + $0x80] ss:$16 sps:$4 sm:$0xff]   ;;  %v7692_v0 = vld [vmem:[#allocation11 + $0x88] ss:$16 sps:$4 sm:$0xff]  }
 0x875   :  { %8568 = vst [vmem:[#allocation39_spill] sm:$0xff] %v7689_v55  ;;  %8569 = vst [vmem:[#allocation40_spill] sm:$0xff] %v7692_v0 }
 0x877   :  { %3748 = vmatpush1.bf16.msra.mxu0 %v7677_v9  ;;  %3791 = vmatpush1.bf16.msra.mxu1 %v7680_v49  ;;  %v7695_v9 = vld [vmem:[#allocation11 + $0xa4] ss:$16 sps:$4 sm:$0xff]   ;;  %v7698_v49 = vld [vmem:[#allocation11 + $0xac] ss:$16 sps:$4 sm:$0xff]  }
 0x878   :  { %3749 = vmatprep.subr.bf16.mxu0 %v7683_v7  ;;  %3792 = vmatprep.subr.bf16.mxu1 %v7686_v50  ;;  %8570 = vst [vmem:[#allocation41_spill] sm:$0xff] %v7695_v9  ;;  %8571 = vst [vmem:[#allocation42_spill] sm:$0xff] %v7698_v49  ;;  %v7701_v7 = vld [vmem:[#allocation11 + $0xa0] ss:$16 sps:$4 sm:$0xff]   ;;  %v7704_v50 = vld [vmem:[#allocation11 + $0xa8] ss:$16 sps:$4 sm:$0xff]  }
 0x879   :  { %8572 = vst [vmem:[#allocation21_spill] sm:$0xff] %v7701_v7  ;;  %8573 = vst [vmem:[#allocation61_spill] sm:$0xff] %v7704_v50 }
 0x87b   :  { %3750 = vmatpush1.bf16.msra.mxu0 %v7689_v55  ;;  %3793 = vmatpush1.bf16.msra.mxu1 %v7692_v0  ;;  %v7707_v55 = vld [vmem:[#allocation11 + $0xc4] ss:$16 sps:$4 sm:$0xff]   ;;  %v7710_v0 = vld [vmem:[#allocation11 + $0xcc] ss:$16 sps:$4 sm:$0xff]  }
 0x87c   :  { %3751 = vmatprep.subr.bf16.mxu0 %v7695_v9  ;;  %3794 = vmatprep.subr.bf16.mxu1 %v7698_v49  ;;  %8574 = vst [vmem:[#allocation62_spill] sm:$0xff] %v7707_v55  ;;  %8575 = vst [vmem:[#allocation63_spill] sm:$0xff] %v7710_v0  ;;  %v7713_v9 = vld [vmem:[#allocation11 + $0xc0] ss:$16 sps:$4 sm:$0xff]   ;;  %v7716_v49 = vld [vmem:[#allocation11 + $0xc8] ss:$16 sps:$4 sm:$0xff]  }
 0x87d   :  { %8576 = vst [vmem:[#allocation64_spill] sm:$0xff] %v7713_v9  ;;  %8577 = vst [vmem:[#allocation65_spill] sm:$0xff] %v7716_v49 }
 0x87f   :  { %3752 = vmatpush1.bf16.msra.mxu0 %v7701_v7  ;;  %3795 = vmatpush1.bf16.msra.mxu1 %v7704_v50  ;;  %v7719_v7 = vld [vmem:[#allocation11 + $0xe4] ss:$16 sps:$4 sm:$0xff]   ;;  %v7722_v50 = vld [vmem:[#allocation11 + $0xec] ss:$16 sps:$4 sm:$0xff]  }
 0x880   :  { %3753 = vmatprep.subr.bf16.mxu0 %v7707_v55  ;;  %3796 = vmatprep.subr.bf16.mxu1 %v7710_v0  ;;  %8578 = vst [vmem:[#allocation66_spill] sm:$0xff] %v7719_v7  ;;  %8579 = vst [vmem:[#allocation67_spill] sm:$0xff] %v7722_v50  ;;  %v7725_v55 = vld [vmem:[#allocation11 + $0xe0] ss:$16 sps:$4 sm:$0xff]   ;;  %v7728_v0 = vld [vmem:[#allocation11 + $0xe8] ss:$16 sps:$4 sm:$0xff]  }
 0x881   :  { %8580 = vst [vmem:[#allocation68_spill] sm:$0xff] %v7725_v55  ;;  %8581 = vst [vmem:[#allocation69_spill] sm:$0xff] %v7728_v0 }
 0x883   :  { %3754 = vmatpush1.bf16.msra.mxu0 %v7713_v9  ;;  %3797 = vmatpush1.bf16.msra.mxu1 %v7716_v49  ;;  %v7731_v9 = vld [vmem:[#allocation12 + $0x4] ss:$16 sps:$4 sm:$0xff]   ;;  %v7734_v49 = vld [vmem:[#allocation12 + $0xc] ss:$16 sps:$4 sm:$0xff]  }
 0x884   :  { %3755 = vmatprep.subr.bf16.mxu0 %v7719_v7  ;;  %3798 = vmatprep.subr.bf16.mxu1 %v7722_v50  ;;  %8582 = vst [vmem:[#allocation70_spill] sm:$0xff] %v7731_v9  ;;  %8583 = vst [vmem:[#allocation71_spill] sm:$0xff] %v7734_v49 }
 0x887   :  { %3756 = vmatpush1.bf16.msra.mxu0 %v7725_v55  ;;  %3799 = vmatpush1.bf16.msra.mxu1 %v7728_v0 }
 0x888   :  { %3827 = vmatprep.subr.bf16.mxu0 %v7731_v9  ;;  %3870 = vmatprep.subr.bf16.mxu1 %v7734_v49 }
 0x91d   :  { %v3478_v7 = vpop.f32.mrb[52].mxu0  ;;  %v3521_v22 = vpop.f32.mrb[52].mxu1 }
 0x91e   :  { %v3530_v50 = vadd.f32 %v3478_v7, %v8584_v32  ;;  %v3480_v15 = vpop.f32.mrb[53].mxu0  ;;  %v3523_v30 = vpop.f32.mrb[53].mxu1 }
 0x91f   :  { %v3531_v55 = vadd.f32 %v3480_v15, %v6649_v2  ;;  %v3482_v31 = vpop.f32.mrb[54].mxu0  ;;  %v3525_v48 = vpop.f32.mrb[54].mxu1  ;;  %v3533_v7 = vadd.f32 %v3523_v30, %v8585_v63  ;;  %v8586_v15 = vld [vmem:[#allocation20_spill] sm:$0xff] }
 0x920   :  { %v4691_v35 = vmul.f32 -1.442695, %v3530_v50  ;;  %v3534_v0 = vadd.f32 %v3482_v31, %v8584_v32  ;;  %v3484_v21 = vpop.f32.mrb[55].mxu0  ;;  %v3527_v33 = vpop.f32.mrb[55].mxu1  ;;  %v3532_v38 = vadd.f32 %v3521_v22, %v8586_v15 }
 0x921   :  { %v4693_v9 = vmul.f32 -1.442695, %v3531_v55  ;;  %v3535_v59 = vadd.f32 %v3484_v21, %v6649_v2  ;;  %v3537_v43 = vadd.f32 %v3527_v33, %v8585_v63  ;;  %v4695_v50 = vmul.f32 -1.442695, %v3533_v7 }
 0x922   :  { %5564 = vpow2.f32 %v4691_v35  ;;  %v4692_v49 = vmul.f32 -1.442695, %v3534_v0  ;;  %v3536_v21 = vadd.f32 %v3525_v48, %v8586_v15 }
 0x923   :  { %5566 = vpow2.f32 %v4693_v9  ;;  %v4694_v3 = vmul.f32 -1.442695, %v3535_v59  ;;  %v4696_v36 = vmul.f32 -1.442695, %v3537_v43 }
 0x924   :  { %5568 = vpow2.f32 %v4692_v49 }
 0x925   :  { %5570 = vpow2.f32 %v4694_v3 }
 0x926   :  { %5572 = vtanh.f32 %v3532_v38 }
 0x927   :  { %5574 = vpow2.f32 %v4695_v50 }
 0x928   :  { %5576 = vpow2.f32 %v4696_v36 }
 0x92c   :  { %v5565_v31 = vpop.eup %5564 }
 0x92d   :  { %v5567_v32 = vpop.eup %5566  ;;  %v3544_v55 = vadd.f32 1.0, %v5565_v31 }
 0x92e   :  { %v3556_v35 = vadd.f32 1.0, %v5567_v32  ;;  %v5569_v59 = vpop.eup %5568 }
 0x92f   :  { %5578 = vrcp.f32 %v3544_v55  ;;  %v3545_v30 = vadd.f32 1.0, %v5569_v59  ;;  %v5571_v0 = vpop.eup %5570 }
 0x930   :  { %5580 = vrcp.f32 %v3556_v35  ;;  %v3557_v3 = vadd.f32 1.0, %v5571_v0  ;;  %v5573_v33 = vpop.eup %5572 }
 0x931   :  { %5582 = vtanh.f32 %v3536_v21  ;;  %v5575_v43 = vpop.eup %5574 }
 0x932   :  { %5584 = vrcp.f32 %v3545_v30  ;;  %v5577_v22 = vpop.eup %5576  ;;  %v3570_v32 = vadd.f32 1.0, %v5575_v43 }
 0x933   :  { %5586 = vrcp.f32 %v3557_v3  ;;  %v3571_v50 = vadd.f32 1.0, %v5577_v22 }
 0x934   :  { %5588 = vrcp.f32 %v3570_v32 }
 0x935   :  { %5590 = vrcp.f32 %v3571_v50 }
 0x939   :  { %v5579_v38 = vpop.eup %5578 }
 0x93a   :  { %v5581_v9 = vpop.eup %5580  ;;  %v3578_v49 = vmul.f32 %v5579_v38, %v5573_v33  ;;  %v8587_v33 = vld [vmem:[#allocation43_spill] sm:$0xff] }
 0x93b   :  { %v5583_v7 = vpop.eup %5582  ;;  %v3576_v48 = vmul.f32 %v5581_v9, %v7498_v39 }
 0x93c   :  { %v5585_v36 = vpop.eup %5584 }
 0x93d   :  { %v7746_v31 = vadd.f32 %v3578_v49, %v3576_v48  ;;  %v3579_v55 = vmul.f32 %v5585_v36, %v5583_v7  ;;  %v3631_v35 = vpop.f32.mrb[24].mxu0  ;;  %v3674_v21 = vpop.f32.mrb[24].mxu1 }
 0x93e   :  { %v5587_v59 = vpop.eup %5586  ;;  %v4833_v30 = vadd.f32 %v3631_v35, %v8387_v54  ;;  %v3633_v0 = vpop.f32.mrb[25].mxu0  ;;  %v8588_v35 = vld [vmem:[#allocation44_spill] sm:$0xff] }
 0x93f   :  { %v3676_v3 = vpop.f32.mrb[25].mxu1  ;;  %v3577_v15 = vmul.f32 %v5587_v59, %v7505_v61  ;;  %v4834_v38 = vadd.f32 %v3633_v0, %v8587_v33  ;;  %v3635_v63 = vpop.f32.mrb[26].mxu0  ;;  %5592 = vtanh.f32 %v7746_v31  ;;  %v4865_v59 = vadd.f32 %v3674_v21, %v8588_v35 }
 0x940   :  { %v3678_v39 = vpop.f32.mrb[26].mxu1  ;;  %v4697_v43 = vmul.f32 -1.442695, %v4833_v30  ;;  %v4835_v22 = vadd.f32 %v3635_v63, %v8387_v54  ;;  %v3637_v9 = vpop.f32.mrb[27].mxu0  ;;  %v4866_v50 = vadd.f32 %v3676_v3, %v6453_v23 }
 0x941   :  { %v3680_v49 = vpop.f32.mrb[27].mxu1  ;;  %v7753_v7 = vadd.f32 %v3579_v55, %v3577_v15  ;;  %v4699_v48 = vmul.f32 -1.442695, %v4834_v38  ;;  %v4836_v36 = vadd.f32 %v3637_v9, %v8587_v33  ;;  %v5589_v63 = vpop.eup %5588 }
 0x942   :  { %5594 = vpow2.f32 %v4697_v43  ;;  %v4698_v32 = vmul.f32 -1.442695, %v4835_v22  ;;  %v5591_v30 = vpop.eup %5590  ;;  %v4701_v0 = vmul.f32 -1.442695, %v4866_v50  ;;  %v4868_v15 = vadd.f32 %v3680_v49, %v6453_v23 }
 0x943   :  { %5596 = vtanh.f32 %v7753_v7  ;;  %v4700_v61 = vmul.f32 -1.442695, %v4836_v36  ;;  %v4867_v43 = vadd.f32 %v3678_v39, %v8588_v35 }
 0x944   :  { %5598 = vpow2.f32 %v4699_v48  ;;  %v4702_v36 = vmul.f32 -1.442695, %v4868_v15 }
 0x945   :  { %5600 = vpow2.f32 %v4698_v32 }
 0x946   :  { %5602 = vpow2.f32 %v4700_v61 }
 0x947   :  { %5604 = vtanh.f32 %v4865_v59 }
 0x948   :  { %5606 = vpow2.f32 %v4701_v0 }
 0x949   :  { %v5593_v55 = vpop.eup %5592 }
 0x94a   :  { %v3584_v3 = vmul.f32 %v5593_v55, %v5589_v63 }
 0x94c   :  { %v5595_v38 = vpop.eup %5594 }
 0x94d   :  { %v5597_v22 = vpop.eup %5596  ;;  %v3698_v9 = vadd.f32 1.0, %v5595_v38 }
 0x94e   :  { %v5599_v48 = vpop.eup %5598  ;;  %v3585_v32 = vmul.f32 %v5597_v22, %v5591_v30 }
 0x94f   :  { %5608 = vrcp.f32 %v3698_v9  ;;  %v3710_v61 = vadd.f32 1.0, %v5599_v48  ;;  %v5601_v33 = vpop.eup %5600 }
 0x950   :  { %5610 = vtanh.f32 %v4867_v43  ;;  %v7761_v21 = vpack.c.bf16 %v3585_v32, %v3584_v3  ;;  %v3699_v49 = vadd.f32 1.0, %v5601_v33  ;;  %v5603_v50 = vpop.eup %5602 }
 0x951   :  { %5612 = vrcp.f32 %v3710_v61  ;;  %v3711_v39 = vadd.f32 1.0, %v5603_v50  ;;  %v5605_v38 = vpop.eup %5604 }
 0x952   :  { %5614 = vpow2.f32 %v4702_v36  ;;  %v5607_v59 = vpop.eup %5606 }
 0x953   :  { %5616 = vrcp.f32 %v3699_v49  ;;  %v3724_v43 = vadd.f32 1.0, %v5607_v59  ;;  %v7798_v59 = vld [vmem:[#allocation12 + $0xac] ss:$16 sps:$4 sm:$0xff]  }
 0x954   :  { %5618 = vrcp.f32 %v3711_v39 }
 0x955   :  { %5620 = vrcp.f32 %v3724_v43  ;;  %v7819_v43 = vld [vmem:[#allocation12 + $0xe4] ss:$16 sps:$4 sm:$0xff]  }
 0x959   :  { %v5609_v35 = vpop.eup %5608 }
 0x95a   :  { %v5611_v0 = vpop.eup %5610  ;;  %v3732_v15 = vmul.f32 %v5609_v35, %v5605_v38 }
 0x95b   :  { %v5613_v63 = vpop.eup %5612 }
 0x95c   :  { %v5615_v30 = vpop.eup %5614  ;;  %v3730_v55 = vmul.f32 %v5613_v63, %v7516_v26  ;;  %v7807_v63 = vld [vmem:[#allocation12 + $0xc4] ss:$16 sps:$4 sm:$0xff]  }
 0x95d   :  { %v5617_v22 = vpop.eup %5616  ;;  %v3725_v3 = vadd.f32 1.0, %v5615_v30  ;;  %v7810_v30 = vld [vmem:[#allocation12 + $0xcc] ss:$16 sps:$4 sm:$0xff]  }
 0x95e   :  { %v7764_v9 = vadd.f32 %v3732_v15, %v3730_v55  ;;  %v3733_v48 = vmul.f32 %v5617_v22, %v5611_v0  ;;  %v5619_v33 = vpop.eup %5618  ;;  %v7801_v0 = vld [vmem:[#allocation12 + $0xa0] ss:$16 sps:$4 sm:$0xff]   ;;  %v7804_v15 = vld [vmem:[#allocation12 + $0xa8] ss:$16 sps:$4 sm:$0xff]  }
 0x95f   :  { %v3731_v36 = vmul.f32 %v5619_v33, %v7520_v24  ;;  %v5621_v35 = vpop.eup %5620  ;;  %v7795_v24 = vld [vmem:[#allocation12 + $0xa4] ss:$16 sps:$4 sm:$0xff]   ;;  %v7813_v55 = vld [vmem:[#allocation12 + $0xc0] ss:$16 sps:$4 sm:$0xff]   ;;  %v7816_v22 = vld [vmem:[#allocation12 + $0xc8] ss:$16 sps:$4 sm:$0xff]  }
 0x960   :  { %5622 = vtanh.f32 %v7764_v9  ;;  %v7825_v33 = vld [vmem:[#allocation12 + $0xe0] ss:$16 sps:$4 sm:$0xff]  }
 0x961   :  { %v7768_v32 = vadd.f32 %v3733_v48, %v3731_v36  ;;  %5624 = vrcp.f32 %v3725_v3  ;;  %v7822_v48 = vld [vmem:[#allocation12 + $0xec] ss:$16 sps:$4 sm:$0xff]   ;;  %v7828_v3 = vld [vmem:[#allocation12 + $0xe8] ss:$16 sps:$4 sm:$0xff]  }
 0x962   :  { %v8607_v36 = vld [vmem:[#allocation55_spill] sm:$0xff] }
 0x963   :  { %5626 = vtanh.f32 %v7768_v32 }
 0x96a   :  { %v5623_v61 = vpop.eup %5622 }
 0x96b   :  { %v5625_v26 = vpop.eup %5624  ;;  %v3738_v50 = vmul.f32 %v5623_v61, %v5621_v35  ;;  %v8608_v35 = vld [vmem:[#allocation56_spill] sm:$0xff]  ;;  %v8609_v61 = vld [vmem:[#allocation57_spill] sm:$0xff] }
 0x96d   :  { %v5627_v49 = vpop.eup %5626 }
 0x96e   :  { %v3739_v39 = vmul.f32 %v5627_v49, %v5625_v26  ;;  %v8610_v26 = vld [vmem:[#allocation58_spill] sm:$0xff]  ;;  %v8611_v49 = vld [vmem:[#allocation59_spill] sm:$0xff] }
 0x970   :  { %v7771_v38 = vpack.c.bf16 %v3739_v39, %v3738_v50  ;;  %v8612_v50 = vld [vmem:[#allocation60_spill] sm:$0xff]  ;;  %v8613_v39 = vld [vmem:[#allocation30_spill] sm:$0xff] }
 0x972   :  { %3774 = vmatmul.mubr.bf16.vlgmr.msra.gmra.mrb[56].mxu0 %v7771_v38  ;;  %3817 = vmatmul.mubr.bf16.vlgmr.msra.gmra.mrb[56].mxu1 %v7771_v38 }
 0x973   :  { %3828 = vmatpush1.bf16.msra.mxu0 %v7527_v56  ;;  %3871 = vmatpush1.bf16.msra.mxu1 %v7530_v8 }
 0x974   :  { %3829 = vmatprep.subr.bf16.mxu0 %v7533_v25  ;;  %3872 = vmatprep.subr.bf16.mxu1 %v7536_v19 }
 0x975   :  { %3859 = vmatprep.mubr.bf16.mxu0 %v8291_v52  ;;  %3902 = vmatprep.mubr.bf16.mxu1 %v8291_v52 }
 0x977   :  { %3830 = vmatpush1.bf16.msra.mxu0 %v7541_v27  ;;  %3873 = vmatpush1.bf16.msra.mxu1 %v7544_v28 }
 0x978   :  { %3831 = vmatprep.subr.bf16.mxu0 %v7547_v4  ;;  %3874 = vmatprep.subr.bf16.mxu1 %v7550_v1 }
 0x97b   :  { %3832 = vmatpush1.bf16.msra.mxu0 %v7553_v10  ;;  %3875 = vmatpush1.bf16.msra.mxu1 %v7556_v16 }
 0x97c   :  { %3833 = vmatprep.subr.bf16.mxu0 %v7559_v6  ;;  %3876 = vmatprep.subr.bf16.mxu1 %v7562_v51 }
 0x97f   :  { %3834 = vmatpush1.bf16.msra.mxu0 %v7565_v58  ;;  %3877 = vmatpush1.bf16.msra.mxu1 %v7568_v47 }
 0x980   :  { %3835 = vmatprep.subr.bf16.mxu0 %v7571_v53  ;;  %3878 = vmatprep.subr.bf16.mxu1 %v7574_v60 }
 0x983   :  { %3836 = vmatpush1.bf16.msra.mxu0 %v7577_v44  ;;  %3879 = vmatpush1.bf16.msra.mxu1 %v7580_v62 }
 0x984   :  { %3837 = vmatprep.subr.bf16.mxu0 %v7795_v24  ;;  %3880 = vmatprep.subr.bf16.mxu1 %v7798_v59 }
 0x987   :  { %3838 = vmatpush1.bf16.msra.mxu0 %v7801_v0  ;;  %3881 = vmatpush1.bf16.msra.mxu1 %v7804_v15 }
 0x988   :  { %3839 = vmatprep.subr.bf16.mxu0 %v7807_v63  ;;  %3882 = vmatprep.subr.bf16.mxu1 %v7810_v30 }
 0x98b   :  { %3840 = vmatpush1.bf16.msra.mxu0 %v7813_v55  ;;  %3883 = vmatpush1.bf16.msra.mxu1 %v7816_v22 }
 0x98c   :  { %3841 = vmatprep.subr.bf16.mxu0 %v7819_v43  ;;  %3884 = vmatprep.subr.bf16.mxu1 %v7822_v48 }
 0x98f   :  { %3842 = vmatpush1.bf16.msra.mxu0 %v7825_v33  ;;  %3885 = vmatpush1.bf16.msra.mxu1 %v7828_v3 }
 0x990   :  { %3980 = vmatprep.subr.bf16.mxu0 %v7351_v57  ;;  %4023 = vmatprep.subr.bf16.mxu1 %v7354_v46  ;;  %v8589_v57 = vld [vmem:[#allocation22_spill] sm:$0xff]  ;;  %v8590_v46 = vld [vmem:[#allocation23_spill] sm:$0xff] }
 0x992   :  { %3860 = vmatmul.mubr.bf16.vlgmr.msra.gmra.mrb[56].mxu0 %v7761_v21  ;;  %3903 = vmatmul.mubr.bf16.vlgmr.msra.gmra.mrb[56].mxu1 %v7761_v21  ;;  %v8606_v21 = vld [vmem:[#allocation54_spill] sm:$0xff] }
 0x993   :  { %3981 = vmatpush1.bf16.msra.mxu0 %v7359_v11  ;;  %4024 = vmatpush1.bf16.msra.mxu1 %v7362_v20  ;;  %v8591_v11 = vld [vmem:[#allocation24_spill] sm:$0xff]  ;;  %v8592_v20 = vld [vmem:[#allocation25_spill] sm:$0xff] }
 0x994   :  { %3982 = vmatprep.subr.bf16.mxu0 %v7365_v17  ;;  %4025 = vmatprep.subr.bf16.mxu1 %v7368_v41  ;;  %v8593_v17 = vld [vmem:[#allocation26_spill] sm:$0xff]  ;;  %v8594_v41 = vld [vmem:[#allocation27_spill] sm:$0xff] }
 0x995   :  { %4012 = vmatprep.mubr.bf16.mxu0 %v8291_v52  ;;  %4055 = vmatprep.mubr.bf16.mxu1 %v8291_v52 }
 0x997   :  { %3983 = vmatpush1.bf16.msra.mxu0 %v7373_v40  ;;  %4026 = vmatpush1.bf16.msra.mxu1 %v7376_v14  ;;  %v8595_v40 = vld [vmem:[#allocation28_spill] sm:$0xff]  ;;  %v8596_v14 = vld [vmem:[#allocation29_spill] sm:$0xff] }
 0x998   :  { %3984 = vmatprep.subr.bf16.mxu0 %v7379_v13  ;;  %4027 = vmatprep.subr.bf16.mxu1 %v7382_v45  ;;  %v8597_v13 = vld [vmem:[#allocation45_spill] sm:$0xff]  ;;  %v8598_v45 = vld [vmem:[#allocation46_spill] sm:$0xff] }
 0x99b   :  { %3985 = vmatpush1.bf16.msra.mxu0 %v7385_v37  ;;  %4028 = vmatpush1.bf16.msra.mxu1 %v7388_v12  ;;  %v8599_v37 = vld [vmem:[#allocation47_spill] sm:$0xff]  ;;  %v8600_v12 = vld [vmem:[#allocation48_spill] sm:$0xff] }
 0x99c   :  { %3986 = vmatprep.subr.bf16.mxu0 %v7391_v34  ;;  %4029 = vmatprep.subr.bf16.mxu1 %v7394_v42  ;;  %v8601_v34 = vld [vmem:[#allocation49_spill] sm:$0xff]  ;;  %v8602_v42 = vld [vmem:[#allocation50_spill] sm:$0xff] }
 0x99f   :  { %3987 = vmatpush1.bf16.msra.mxu0 %v7397_v5  ;;  %4030 = vmatpush1.bf16.msra.mxu1 %v7400_v29  ;;  %v8603_v5 = vld [vmem:[#allocation51_spill] sm:$0xff]  ;;  %v8604_v29 = vld [vmem:[#allocation52_spill] sm:$0xff] }
 0x9a0   :  { %3988 = vmatprep.subr.bf16.mxu0 %v7403_v18  ;;  %4031 = vmatprep.subr.bf16.mxu1 %v8589_v57  ;;  %v8605_v18 = vld [vmem:[#allocation53_spill] sm:$0xff]  ;;  %v8615_v57 = vld [vmem:[#allocation32_spill] sm:$0xff] }
 0x9a3   :  { %3989 = vmatpush1.bf16.msra.mxu0 %v8590_v46  ;;  %4032 = vmatpush1.bf16.msra.mxu1 %v8591_v11  ;;  %v8616_v46 = vld [vmem:[#allocation33_spill] sm:$0xff]  ;;  %v8617_v11 = vld [vmem:[#allocation34_spill] sm:$0xff] }
 0x9a4   :  { %3990 = vmatprep.subr.bf16.mxu0 %v8592_v20  ;;  %4033 = vmatprep.subr.bf16.mxu1 %v8593_v17  ;;  %v8618_v20 = vld [vmem:[#allocation35_spill] sm:$0xff]  ;;  %v8619_v17 = vld [vmem:[#allocation36_spill] sm:$0xff] }
 0x9a7   :  { %3991 = vmatpush1.bf16.msra.mxu0 %v8594_v41  ;;  %4034 = vmatpush1.bf16.msra.mxu1 %v8595_v40  ;;  %v8620_v41 = vld [vmem:[#allocation37_spill] sm:$0xff]  ;;  %v8621_v40 = vld [vmem:[#allocation38_spill] sm:$0xff] }
 0x9a8   :  { %3992 = vmatprep.subr.bf16.mxu0 %v8596_v14  ;;  %4035 = vmatprep.subr.bf16.mxu1 %v8597_v13  ;;  %v8622_v14 = vld [vmem:[#allocation39_spill] sm:$0xff]  ;;  %v8623_v13 = vld [vmem:[#allocation40_spill] sm:$0xff] }
 0x9ab   :  { %3993 = vmatpush1.bf16.msra.mxu0 %v8598_v45  ;;  %4036 = vmatpush1.bf16.msra.mxu1 %v8599_v37  ;;  %v8624_v45 = vld [vmem:[#allocation41_spill] sm:$0xff]  ;;  %v8625_v37 = vld [vmem:[#allocation42_spill] sm:$0xff] }
 0x9ac   :  { %3994 = vmatprep.subr.bf16.mxu0 %v8600_v12  ;;  %4037 = vmatprep.subr.bf16.mxu1 %v8601_v34  ;;  %v8626_v12 = vld [vmem:[#allocation21_spill] sm:$0xff] }
 0x9ad   :  { %v8627_v34 = vld [vmem:[#allocation61_spill] sm:$0xff] }
 0x9af   :  { %3995 = vmatpush1.bf16.msra.mxu0 %v8602_v42  ;;  %4038 = vmatpush1.bf16.msra.mxu1 %v8603_v5  ;;  %v8628_v42 = vld [vmem:[#allocation62_spill] sm:$0xff]  ;;  %v8629_v5 = vld [vmem:[#allocation63_spill] sm:$0xff] }
 0x9b0   :  { %4124 = vmatprep.subr.bf16.mxu0 %v8604_v29  ;;  %4167 = vmatprep.subr.bf16.mxu1 %v8605_v18  ;;  %v8630_v29 = vld [vmem:[#allocation64_spill] sm:$0xff]  ;;  %v8631_v18 = vld [vmem:[#allocation65_spill] sm:$0xff] }
 0x9b2   :  { %4013 = vmatmul.mubr.bf16.vlgmr.msra.gmra.mrb[28].mxu0 %v7771_v38  ;;  %4056 = vmatmul.mubr.bf16.vlgmr.msra.gmra.mrb[28].mxu1 %v7771_v38  ;;  %v8614_v38 = vld [vmem:[#allocation31_spill] sm:$0xff] }
 0x9b3   :  { %4125 = vmatpush1.bf16.msra.mxu0 %v8606_v21  ;;  %4168 = vmatpush1.bf16.msra.mxu1 %v8607_v36  ;;  %v8632_v21 = vld [vmem:[#allocation66_spill] sm:$0xff]  ;;  %v8633_v36 = vld [vmem:[#allocation67_spill] sm:$0xff] }
 0x9b4   :  { %4126 = vmatprep.subr.bf16.mxu0 %v8608_v35  ;;  %4169 = vmatprep.subr.bf16.mxu1 %v8609_v61  ;;  %v8634_v35 = vld [vmem:[#allocation68_spill] sm:$0xff]  ;;  %v8635_v61 = vld [vmem:[#allocation69_spill] sm:$0xff] }
 0x9b5   :  { %4156 = vmatprep.mubr.bf16.mxu0 %v8291_v52  ;;  %4199 = vmatprep.mubr.bf16.mxu1 %v8291_v52 }
 0x9b7   :  { %4127 = vmatpush1.bf16.msra.mxu0 %v8610_v26  ;;  %4170 = vmatpush1.bf16.msra.mxu1 %v8611_v49  ;;  %v8636_v26 = vld [vmem:[#allocation70_spill] sm:$0xff]  ;;  %v8637_v49 = vld [vmem:[#allocation71_spill] sm:$0xff] }
 0x9b8   :  { %4128 = vmatprep.subr.bf16.mxu0 %v8612_v50  ;;  %4171 = vmatprep.subr.bf16.mxu1 %v8613_v39 }
 0x9bb   :  { %4129 = vmatpush1.bf16.msra.mxu0 %v8614_v38  ;;  %4172 = vmatpush1.bf16.msra.mxu1 %v8615_v57  ;;  %v8638_v38 = vld [vmem:[#allocation18_spill] sm:$0xff] }
 0x9bc   :  { %4130 = vmatprep.subr.bf16.mxu0 %v8616_v46  ;;  %4173 = vmatprep.subr.bf16.mxu1 %v8617_v11 }
 0x9bf   :  { %4131 = vmatpush1.bf16.msra.mxu0 %v8618_v20  ;;  %4174 = vmatpush1.bf16.msra.mxu1 %v8619_v17 }
 0x9c0   :  { %4132 = vmatprep.subr.bf16.mxu0 %v8620_v41  ;;  %4175 = vmatprep.subr.bf16.mxu1 %v8621_v40 }
 0x9c3   :  { %4133 = vmatpush1.bf16.msra.mxu0 %v8622_v14  ;;  %4176 = vmatpush1.bf16.msra.mxu1 %v8623_v13 }
 0x9c4   :  { %4134 = vmatprep.subr.bf16.mxu0 %v8624_v45  ;;  %4177 = vmatprep.subr.bf16.mxu1 %v8625_v37 }
 0x9c7   :  { %4135 = vmatpush1.bf16.msra.mxu0 %v8626_v12  ;;  %4178 = vmatpush1.bf16.msra.mxu1 %v8627_v34 }
 0x9c8   :  { %4136 = vmatprep.subr.bf16.mxu0 %v8628_v42  ;;  %4179 = vmatprep.subr.bf16.mxu1 %v8629_v5  ;;  %v8639_v5 = vld [vmem:[#allocation19_spill] sm:$0xff] }
 0x9cb   :  { %4137 = vmatpush1.bf16.msra.mxu0 %v8630_v29  ;;  %4180 = vmatpush1.bf16.msra.mxu1 %v8631_v18 }
 0x9cc   :  { %4138 = vmatprep.subr.bf16.mxu0 %v8632_v21  ;;  %4181 = vmatprep.subr.bf16.mxu1 %v8633_v36  ;;  %v8640_v21 = vld [vmem:[#allocation20_spill] sm:$0xff] }
 0x9cf   :  { %4139 = vmatpush1.bf16.msra.mxu0 %v8634_v35  ;;  %4182 = vmatpush1.bf16.msra.mxu1 %v8635_v61 }
 0x9d0   :  { %4210 = vmatprep.subr.bf16.mxu0 %v8636_v26  ;;  %4253 = vmatprep.subr.bf16.mxu1 %v8637_v49 }
 0xa65   :  { %v3861_v50 = vpop.f32.mrb[56].mxu0  ;;  %v3904_v39 = vpop.f32.mrb[56].mxu1 }
 0xa66   :  { %v3913_v57 = vadd.f32 %v3861_v50, %v8638_v38  ;;  %v3863_v46 = vpop.f32.mrb[57].mxu0  ;;  %v3906_v11 = vpop.f32.mrb[57].mxu1  ;;  %v3915_v36 = vadd.f32 %v3904_v39, %v8640_v21 }
 0xa67   :  { %v3914_v20 = vadd.f32 %v3863_v46, %v6649_v2  ;;  %v3865_v17 = vpop.f32.mrb[58].mxu0  ;;  %v3908_v41 = vpop.f32.mrb[58].mxu1  ;;  %v3916_v29 = vadd.f32 %v3906_v11, %v8639_v5 }
 0xa68   :  { %v4703_v40 = vmul.f32 -1.442695, %v3913_v57  ;;  %v3917_v14 = vadd.f32 %v3865_v17, %v8638_v38  ;;  %v3867_v13 = vpop.f32.mrb[59].mxu0  ;;  %v3910_v45 = vpop.f32.mrb[59].mxu1  ;;  %v3919_v57 = vadd.f32 %v3908_v41, %v8640_v21 }
 0xa69   :  { %v4705_v37 = vmul.f32 -1.442695, %v3914_v20  ;;  %v3918_v12 = vadd.f32 %v3867_v13, %v6649_v2  ;;  %v3920_v18 = vadd.f32 %v3910_v45, %v8639_v5  ;;  %v4707_v35 = vmul.f32 -1.442695, %v3916_v29 }
 0xa6a   :  { %5628 = vpow2.f32 %v4703_v40  ;;  %v4704_v34 = vmul.f32 -1.442695, %v3917_v14 }
 0xa6b   :  { %5630 = vpow2.f32 %v4705_v37  ;;  %v4706_v42 = vmul.f32 -1.442695, %v3918_v12  ;;  %v4708_v61 = vmul.f32 -1.442695, %v3920_v18 }
 0xa6c   :  { %5632 = vpow2.f32 %v4704_v34 }
 0xa6d   :  { %5634 = vpow2.f32 %v4706_v42 }
 0xa6e   :  { %5636 = vtanh.f32 %v3915_v36 }
 0xa6f   :  { %5638 = vpow2.f32 %v4707_v35 }
 0xa70   :  { %5640 = vpow2.f32 %v4708_v61 }
 0xa74   :  { %v5629_v26 = vpop.eup %5628 }
 0xa75   :  { %v5631_v49 = vpop.eup %5630  ;;  %v3927_v50 = vadd.f32 1.0, %v5629_v26 }
 0xa76   :  { %v3939_v46 = vadd.f32 1.0, %v5631_v49  ;;  %v5633_v20 = vpop.eup %5632 }
 0xa77   :  { %5642 = vrcp.f32 %v3927_v50  ;;  %v3928_v11 = vadd.f32 1.0, %v5633_v20  ;;  %v5635_v17 = vpop.eup %5634 }
 0xa78   :  { %5644 = vrcp.f32 %v3939_v46  ;;  %v3940_v40 = vadd.f32 1.0, %v5635_v17  ;;  %v5637_v39 = vpop.eup %5636 }
 0xa79   :  { %5646 = vtanh.f32 %v3919_v57  ;;  %v5639_v14 = vpop.eup %5638 }
 0xa7a   :  { %5648 = vrcp.f32 %v3928_v11  ;;  %v5641_v13 = vpop.eup %5640  ;;  %v3953_v42 = vadd.f32 1.0, %v5639_v14  ;;  %v8641_v11 = vld [vmem:[#allocation43_spill] sm:$0xff] }
 0xa7b   :  { %5650 = vrcp.f32 %v3940_v40  ;;  %v3954_v18 = vadd.f32 1.0, %v5641_v13 }
 0xa7c   :  { %5652 = vrcp.f32 %v3953_v42 }
 0xa7d   :  { %5654 = vrcp.f32 %v3954_v18 }
 0xa81   :  { %v5643_v45 = vpop.eup %5642 }
 0xa82   :  { %v5645_v37 = vpop.eup %5644  ;;  %v3961_v12 = vmul.f32 %v5643_v45, %v5637_v39 }
 0xa83   :  { %v5647_v34 = vpop.eup %5646  ;;  %v3959_v41 = vmul.f32 %v5645_v37, %v7746_v31 }
 0xa84   :  { %v5649_v29 = vpop.eup %5648 }
 0xa85   :  { %v7914_v36 = vadd.f32 %v3961_v12, %v3959_v41  ;;  %v3962_v35 = vmul.f32 %v5649_v29, %v5647_v34  ;;  %v4014_v61 = vpop.f32.mrb[28].mxu0  ;;  %v4057_v26 = vpop.f32.mrb[28].mxu1  ;;  %v8642_v29 = vld [vmem:[#allocation44_spill] sm:$0xff] }
 0xa86   :  { %v5651_v49 = vpop.eup %5650  ;;  %v4837_v50 = vadd.f32 %v4014_v61, %v8387_v54  ;;  %v4016_v57 = vpop.f32.mrb[29].mxu0  ;;  %v4869_v18 = vadd.f32 %v4057_v26, %v8642_v29 }
 0xa87   :  { %v4059_v46 = vpop.f32.mrb[29].mxu1  ;;  %v3960_v20 = vmul.f32 %v5651_v49, %v7753_v7  ;;  %v4838_v17 = vadd.f32 %v4016_v57, %v8641_v11  ;;  %v4018_v40 = vpop.f32.mrb[30].mxu0  ;;  %5656 = vtanh.f32 %v7914_v36 }
 0xa88   :  { %v4061_v31 = vpop.f32.mrb[30].mxu1  ;;  %v4709_v39 = vmul.f32 -1.442695, %v4837_v50  ;;  %v4839_v14 = vadd.f32 %v4018_v40, %v8387_v54  ;;  %v4020_v13 = vpop.f32.mrb[31].mxu0  ;;  %v4870_v42 = vadd.f32 %v4059_v46, %v6453_v23 }
 0xa89   :  { %v4063_v45 = vpop.f32.mrb[31].mxu1  ;;  %v7921_v37 = vadd.f32 %v3962_v35, %v3960_v20  ;;  %v4711_v12 = vmul.f32 -1.442695, %v4838_v17  ;;  %v4840_v34 = vadd.f32 %v4020_v13, %v8641_v11  ;;  %v5653_v54 = vpop.eup %5652  ;;  %v4871_v20 = vadd.f32 %v4061_v31, %v8642_v29 }
 0xa8a   :  { %5658 = vpow2.f32 %v4709_v39  ;;  %v4710_v41 = vmul.f32 -1.442695, %v4839_v14  ;;  %v5655_v61 = vpop.eup %5654  ;;  %v4713_v49 = vmul.f32 -1.442695, %v4870_v42  ;;  %v4872_v35 = vadd.f32 %v4063_v45, %v6453_v23 }
 0xa8b   :  { %5660 = vtanh.f32 %v7921_v37  ;;  %v4712_v7 = vmul.f32 -1.442695, %v4840_v34 }
 0xa8c   :  { %5662 = vpow2.f32 %v4711_v12  ;;  %v4714_v39 = vmul.f32 -1.442695, %v4872_v35 }
 0xa8d   :  { %5664 = vpow2.f32 %v4710_v41 }
 0xa8e   :  { %5666 = vpow2.f32 %v4712_v7 }
 0xa8f   :  { %5668 = vtanh.f32 %v4869_v18 }
 0xa90   :  { %5670 = vpow2.f32 %v4713_v49 }
 0xa91   :  { %v5657_v50 = vpop.eup %5656 }
 0xa92   :  { %v3967_v46 = vmul.f32 %v5657_v50, %v5653_v54 }
 0xa94   :  { %v5659_v57 = vpop.eup %5658 }
 0xa95   :  { %v5661_v11 = vpop.eup %5660  ;;  %v4081_v17 = vadd.f32 1.0, %v5659_v57 }
 0xa96   :  { %v5663_v40 = vpop.eup %5662  ;;  %v3968_v14 = vmul.f32 %v5661_v11, %v5655_v61 }
 0xa97   :  { %5672 = vrcp.f32 %v4081_v17  ;;  %v4093_v13 = vadd.f32 1.0, %v5663_v40  ;;  %v5665_v12 = vpop.eup %5664 }
 0xa98   :  { %5674 = vtanh.f32 %v4871_v20  ;;  %v7929_v26 = vpack.c.bf16 %v3968_v14, %v3967_v46  ;;  %v4082_v23 = vadd.f32 1.0, %v5665_v12  ;;  %v5667_v45 = vpop.eup %5666 }
 0xa99   :  { %5676 = vrcp.f32 %v4093_v13  ;;  %v4094_v31 = vadd.f32 1.0, %v5667_v45  ;;  %v5669_v34 = vpop.eup %5668 }
 0xa9a   :  { %5678 = vpow2.f32 %v4714_v39  ;;  %v5671_v41 = vpop.eup %5670 }
 0xa9b   :  { %5680 = vrcp.f32 %v4082_v23  ;;  %v4107_v18 = vadd.f32 1.0, %v5671_v41 }
 0xa9c   :  { %5682 = vrcp.f32 %v4094_v31 }
 0xa9d   :  { %5684 = vrcp.f32 %v4107_v18 }
 0xaa1   :  { %v5673_v7 = vpop.eup %5672 }
 0xaa2   :  { %v5675_v42 = vpop.eup %5674  ;;  %v4115_v29 = vmul.f32 %v5673_v7, %v5669_v34 }
 0xaa3   :  { %v5677_v54 = vpop.eup %5676 }
 0xaa4   :  { %v5679_v61 = vpop.eup %5678  ;;  %v4113_v49 = vmul.f32 %v5677_v54, %v7764_v9  ;;  %v4376_v9 = vld [vmem:[#allocation14 + $0x68] sm:$0xff] }
 0xaa5   :  { %v5681_v35 = vpop.eup %5680  ;;  %v4108_v11 = vadd.f32 1.0, %v5679_v61 }
 0xaa6   :  { %v4117_v50 = vadd.f32 %v4115_v29, %v4113_v49  ;;  %v4116_v57 = vmul.f32 %v5681_v35, %v5675_v42  ;;  %v5683_v20 = vpop.eup %5682 }
 0xaa7   :  { %v4114_v17 = vmul.f32 %v5683_v20, %v7768_v32  ;;  %v5685_v39 = vpop.eup %5684 }
 0xaa8   :  { %5686 = vtanh.f32 %v4117_v50 }
 0xaa9   :  { %v4118_v40 = vadd.f32 %v4116_v57, %v4114_v17  ;;  %5688 = vrcp.f32 %v4108_v11 }
 0xaab   :  { %5690 = vtanh.f32 %v4118_v40 }
 0xab2   :  { %v5687_v46 = vpop.eup %5686 }
 0xab3   :  { %v4121_v14 = vmul.f32 %v5687_v46, %v5685_v39  ;;  %v5689_v13 = vpop.eup %5688 }
 0xab5   :  { %v5691_v12 = vpop.eup %5690 }
 0xab6   :  { %v4122_v23 = vmul.f32 %v5691_v12, %v5689_v13 }
 0xab8   :  { %v4123_v45 = vpack.c.bf16 %v4122_v23, %v4121_v14 }
 0xaba   :  { %4157 = vmatmul.mubr.bf16.vlgmr.msra.gmra.mrb[60].mxu0 %v4123_v45  ;;  %4200 = vmatmul.mubr.bf16.vlgmr.msra.gmra.mrb[60].mxu1 %v4123_v45 }
 0xabb   :  { %4211 = vmatpush1.bf16.msra.mxu0 %v7527_v56  ;;  %4254 = vmatpush1.bf16.msra.mxu1 %v7530_v8  ;;  %v4364_v56 = vld [vmem:[#allocation14 + $0x8] sm:$0xff] }
 0xabc   :  { %4212 = vmatprep.subr.bf16.mxu0 %v7533_v25  ;;  %4255 = vmatprep.subr.bf16.mxu1 %v7536_v19  ;;  %v4365_v25 = vld [vmem:[#allocation14 + $0x10] sm:$0xff]  ;;  %v4366_v19 = vld [vmem:[#allocation14 + $0x18] sm:$0xff] }
 0xabd   :  { %4242 = vmatprep.mubr.bf16.mxu0 %v8291_v52  ;;  %4285 = vmatprep.mubr.bf16.mxu1 %v8291_v52  ;;  %v4363_v52 = vld [vmem:[#allocation14] sm:$0xff] }
 0xabe   :  { %v4777_v8 = vpack.c.bf16 %v4364_v56, %v4363_v52 }
 0xabf   :  { %4213 = vmatpush1.bf16.msra.mxu0 %v7541_v27  ;;  %4256 = vmatpush1.bf16.msra.mxu1 %v7544_v28  ;;  %v4781_v27 = vpack.c.bf16 %v4366_v19, %v4365_v25  ;;  %v4367_v28 = vld [vmem:[#allocation14 + $0x20] sm:$0xff] }
 0xac0   :  { %4214 = vmatprep.subr.bf16.mxu0 %v7547_v4  ;;  %4257 = vmatprep.subr.bf16.mxu1 %v7550_v1  ;;  %v4368_v4 = vld [vmem:[#allocation14 + $0x28] sm:$0xff] }
 0xac1   :  { %v4785_v1 = vpack.c.bf16 %v4368_v4, %v4367_v28 }
 0xac3   :  { %4215 = vmatpush1.bf16.msra.mxu0 %v7553_v10  ;;  %4258 = vmatpush1.bf16.msra.mxu1 %v7556_v16  ;;  %v4369_v10 = vld [vmem:[#allocation14 + $0x30] sm:$0xff]  ;;  %v4370_v16 = vld [vmem:[#allocation14 + $0x38] sm:$0xff] }
 0xac4   :  { %4216 = vmatprep.subr.bf16.mxu0 %v7559_v6  ;;  %4259 = vmatprep.subr.bf16.mxu1 %v7562_v51  ;;  %v4789_v6 = vpack.c.bf16 %v4370_v16, %v4369_v10  ;;  %v4371_v51 = vld [vmem:[#allocation14 + $0x40] sm:$0xff] }
 0xac7   :  { %4217 = vmatpush1.bf16.msra.mxu0 %v7565_v58  ;;  %4260 = vmatpush1.bf16.msra.mxu1 %v7568_v47  ;;  %v4372_v58 = vld [vmem:[#allocation14 + $0x48] sm:$0xff] }
 0xac8   :  { %4218 = vmatprep.subr.bf16.mxu0 %v7571_v53  ;;  %4261 = vmatprep.subr.bf16.mxu1 %v7574_v60  ;;  %v4793_v47 = vpack.c.bf16 %v4372_v58, %v4371_v51  ;;  %v4373_v53 = vld [vmem:[#allocation14 + $0x50] sm:$0xff]  ;;  %v4374_v60 = vld [vmem:[#allocation14 + $0x58] sm:$0xff] }
 0xacb   :  { %4219 = vmatpush1.bf16.msra.mxu0 %v7577_v44  ;;  %4262 = vmatpush1.bf16.msra.mxu1 %v7580_v62  ;;  %v4375_v44 = vld [vmem:[#allocation14 + $0x60] sm:$0xff]  ;;  %v4797_v62 = vpack.c.bf16 %v4374_v60, %v4373_v53 }
 0xacc   :  { %4220 = vmatprep.subr.bf16.mxu0 %v7795_v24  ;;  %4263 = vmatprep.subr.bf16.mxu1 %v7798_v59  ;;  %v4801_v32 = vpack.c.bf16 %v4376_v9, %v4375_v44  ;;  %v4377_v24 = vld [vmem:[#allocation14 + $0x70] sm:$0xff]  ;;  %v4378_v59 = vld [vmem:[#allocation14 + $0x78] sm:$0xff] }
 0xacf   :  { %4221 = vmatpush1.bf16.msra.mxu0 %v7801_v0  ;;  %4264 = vmatpush1.bf16.msra.mxu1 %v7804_v15  ;;  %v4805_v0 = vpack.c.bf16 %v4378_v59, %v4377_v24 }
 0xad0   :  { %4222 = vmatprep.subr.bf16.mxu0 %v7807_v63  ;;  %4265 = vmatprep.subr.bf16.mxu1 %v7810_v30 }
 0xad3   :  { %4223 = vmatpush1.bf16.msra.mxu0 %v7813_v55  ;;  %4266 = vmatpush1.bf16.msra.mxu1 %v7816_v22 }
 0xad4   :  { %4224 = vmatprep.subr.bf16.mxu0 %v7819_v43  ;;  %4267 = vmatprep.subr.bf16.mxu1 %v7822_v48 }
 0xad7   :  { %4225 = vmatpush1.bf16.msra.mxu0 %v7825_v33  ;;  %4268 = vmatpush1.bf16.msra.mxu1 %v7828_v3 }
 0xad8   :  { %4778 = vmatprep.subr.bf16.mxu0 %v4777_v8 }
 0xada   :  { %4243 = vmatmul.mubr.bf16.vlgmr.msra.gmra.mrb[60].mxu0 %v7929_v26  ;;  %4286 = vmatmul.mubr.bf16.vlgmr.msra.gmra.mrb[60].mxu1 %v7929_v26 }
 0xadb   :  { %4780 = vmatpush3.bf16.msra.mxu0 %v4777_v8 }
 0xadc   :  { %4782 = vmatprep.subr.bf16.mxu0 %v4781_v27 }
 0xadf   :  { %4784 = vmatpush3.bf16.msra.mxu0 %v4781_v27 }
 0xae0   :  { %4786 = vmatprep.subr.bf16.mxu0 %v4785_v1 }
 0xae3   :  { %4788 = vmatpush3.bf16.msra.mxu0 %v4785_v1 }
 0xae4   :  { %4790 = vmatprep.subr.bf16.mxu0 %v4789_v6 }
 0xae7   :  { %4792 = vmatpush3.bf16.msra.mxu0 %v4789_v6 }
 0xae8   :  { %4794 = vmatprep.subr.bf16.mxu0 %v4793_v47 }
 0xaeb   :  { %4796 = vmatpush3.bf16.msra.mxu0 %v4793_v47 }
 0xaec   :  { %4798 = vmatprep.subr.bf16.mxu0 %v4797_v62 }
 0xaef   :  { %4800 = vmatpush3.bf16.msra.mxu0 %v4797_v62 }
 0xaf0   :  { %4802 = vmatprep.subr.bf16.mxu0 %v4801_v32 }
 0xaf3   :  { %4804 = vmatpush3.bf16.msra.mxu0 %v4801_v32 }
 0xaf4   :  { %4806 = vmatprep.subr.bf16.mxu0 %v4805_v0 }
 0xaf7   :  { %4808 = vmatpush3.bf16.msra.mxu0 %v4805_v0 }
 0xbad   :  { %v4244_v15 = vpop.f32.mrb[60].mxu0  ;;  %v4287_v63 = vpop.f32.mrb[60].mxu1 }
 0xbae   :  { %v4296_v30 = vadd.f32 %v4244_v15, %v8638_v38  ;;  %v4246_v55 = vpop.f32.mrb[61].mxu0  ;;  %v4289_v22 = vpop.f32.mrb[61].mxu1  ;;  %v4298_v18 = vadd.f32 %v4287_v63, %v8640_v21 }
 0xbaf   :  { %v4297_v43 = vadd.f32 %v4246_v55, %v6649_v2  ;;  %v4248_v48 = vpop.f32.mrb[62].mxu0  ;;  %v4291_v33 = vpop.f32.mrb[62].mxu1  ;;  %v4299_v54 = vadd.f32 %v4289_v22, %v8639_v5 }
 0xbb0   :  { %v4715_v3 = vmul.f32 -1.442695, %v4296_v30  ;;  %v4300_v26 = vadd.f32 %v4248_v48, %v8638_v38  ;;  %v4250_v31 = vpop.f32.mrb[63].mxu0  ;;  %v4293_v34 = vpop.f32.mrb[63].mxu1  ;;  %v4302_v38 = vadd.f32 %v4291_v33, %v8640_v21 }
 0xbb1   :  { %v4717_v41 = vmul.f32 -1.442695, %v4297_v43  ;;  %v4301_v7 = vadd.f32 %v4250_v31, %v6649_v2  ;;  %v4719_v61 = vmul.f32 -1.442695, %v4299_v54  ;;  %v4303_v49 = vadd.f32 %v4293_v34, %v8639_v5 }
 0xbb2   :  { %5692 = vpow2.f32 %v4715_v3  ;;  %v4716_v42 = vmul.f32 -1.442695, %v4300_v26 }
 0xbb3   :  { %5694 = vpow2.f32 %v4717_v41  ;;  %v4718_v29 = vmul.f32 -1.442695, %v4301_v7  ;;  %v4720_v2 = vmul.f32 -1.442695, %v4303_v49 }
 0xbb4   :  { %5696 = vpow2.f32 %v4716_v42 }
 0xbb5   :  { %5698 = vpow2.f32 %v4718_v29 }
 0xbb6   :  { %5700 = vtanh.f32 %v4298_v18 }
 0xbb7   :  { %5702 = vpow2.f32 %v4719_v61 }
 0xbb8   :  { %5704 = vtanh.f32 %v4302_v38 }
 0xbbc   :  { %v5693_v35 = vpop.eup %5692 }
 0xbbd   :  { %v5695_v50 = vpop.eup %5694  ;;  %v4310_v57 = vadd.f32 1.0, %v5693_v35 }
 0xbbe   :  { %v4322_v20 = vadd.f32 1.0, %v5695_v50  ;;  %v5697_v11 = vpop.eup %5696 }
 0xbbf   :  { %5706 = vrcp.f32 %v4310_v57  ;;  %v4311_v17 = vadd.f32 1.0, %v5697_v11  ;;  %v5699_v40 = vpop.eup %5698 }
 0xbc0   :  { %5708 = vrcp.f32 %v4322_v20  ;;  %v4323_v39 = vadd.f32 1.0, %v5699_v40  ;;  %v5701_v5 = vpop.eup %5700 }
 0xbc1   :  { %5710 = vpow2.f32 %v4720_v2  ;;  %v5703_v46 = vpop.eup %5702 }
 0xbc2   :  { %5712 = vrcp.f32 %v4311_v17  ;;  %v5705_v21 = vpop.eup %5704  ;;  %v4336_v23 = vadd.f32 1.0, %v5703_v46 }
 0xbc3   :  { %5714 = vrcp.f32 %v4323_v39 }
 0xbc4   :  { %5716 = vrcp.f32 %v4336_v23 }
 0xbc9   :  { %v5707_v14 = vpop.eup %5706 }
 0xbca   :  { %v5709_v13 = vpop.eup %5708  ;;  %v4344_v12 = vmul.f32 %v5707_v14, %v5701_v5 }
 0xbcb   :  { %v5711_v45 = vpop.eup %5710  ;;  %v4342_v52 = vmul.f32 %v5709_v13, %v7914_v36  ;;  %v4721_v36 = vld [vmem:[%s7994_s8] ss:$0 sm:$0xff] }
 0xbcc   :  { %v5713_v56 = vpop.eup %5712  ;;  %v4337_v27 = vadd.f32 1.0, %v5711_v45 }
 0xbcd   :  { %v4345_v8 = vmul.f32 %v5713_v56, %v5705_v21  ;;  %v4346_v25 = vadd.f32 %v4344_v12, %v4342_v52  ;;  %v5715_v19 = vpop.eup %5714 }
 0xbce   :  { %v4343_v28 = vmul.f32 %v5715_v19, %v7921_v37  ;;  %v5717_v1 = vpop.eup %5716 }
 0xbcf   :  { %5718 = vtanh.f32 %v4346_v25 }
 0xbd0   :  { %v4347_v4 = vadd.f32 %v4345_v8, %v4343_v28  ;;  %5720 = vrcp.f32 %v4337_v27 }
 0xbd2   :  { %5722 = vtanh.f32 %v4347_v4 }
 0xbd9   :  { %v5719_v10 = vpop.eup %5718 }
 0xbda   :  { %v4350_v16 = vmul.f32 %v5719_v10, %v5717_v1  ;;  %v5721_v6 = vpop.eup %5720 }
 0xbdc   :  { %4774 = vmatprep.mubr.f32.mxu0 %v4350_v16  ;;  %v5723_v51 = vpop.eup %5722 }
 0xbdd   :  { %v4351_v58 = vmul.f32 %v5723_v51, %v5721_v6 }
 0xbdf   :  { %4775 = vmatmul.mubr.f32.vlgmr.msra.gmra.mrb[64].mxu0 %v4351_v58 }
 0xcb2   :  { %v4776_v47 = vpop.f32.mrb[64].mxu0 }
 0xcb3   :  { %v4458_v53 = vadd.f32 %v4776_v47, %v4721_v36  ;;  %v4452_v60 = vpop.f32.mrb[65].mxu0 }
 0xcb4   :  { %v4453_v37 = vadd.f32 %v4721_v36, %v4452_v60 }
 0xcb5   :  { %v4723_v44 = vmul.f32 -1.442695, %v4458_v53 }
 0xcb6   :  { %v4722_v62 = vmul.f32 -1.442695, %v4453_v37 }
 0xcb7   :  { %5724 = vpow2.f32 %v4723_v44 }
 0xcb8   :  { %5726 = vpow2.f32 %v4722_v62 }
 0xcc1   :  { %v5725_v9 = vpop.eup %5724 }
 0xcc2   :  { %v5727_v32 = vpop.eup %5726  ;;  %v4468_v24 = vadd.f32 1.0, %v5725_v9 }
 0xcc3   :  { %v4467_v59 = vadd.f32 1.0, %v5727_v32 }
 0xcc4   :  { %5728 = vrcp.f32 %v4468_v24 }
 0xcc5   :  { %5730 = vrcp.f32 %v4467_v59 }
 0xcce   :  { %v5729_v0 = vpop.eup %5728 }
 0xccf   :  { %v5731_v15 = vpop.eup %5730  ;;  %4474 = vst [vmem:[%s7995_s9 + $0x8] sm:$0xff] %v5729_v0 }
 0xcd0   :  { %4473 = vst [vmem:[%s7995_s9] sm:$0xff] %v5731_v15 }
 0xcd1   :  { %4479 = vsyncpa [#allocation8], 1 }
 0xcd2   :  { %4480 = vsyncpa [#allocation10], 1 }
 0xcd3   :  { %4481 = vsyncpa [#allocation13], 1 }

</bundles_post_ra>
